<compile_context>
chip_gen: v7x
topology: tpu7x:2x2x1
jax: 0.10.0
libtpu: 0.0.40
codegen_flags: <defaults>
</compile_context>

<pallas_src>
import jax
import jax.numpy as jnp
from jax import lax
from jax.experimental import pallas as pl
from jax.experimental.pallas import tpu as pltpu

EPS = 1e-5
SLOPE = 0.01      # InPlaceABN default leaky_relu negative slope
CMID = 64         # bottleneck width fixed by the module
PAD_L = 8         # left padding inside the conv3 scratch (keeps the store 8-aligned)


def _leaky(h):
    return jnp.where(h >= 0, h, SLOPE * h)


def _partial_stats(h):
    """(rows, K) f32 -> (2, K) [sum, sum-of-squares] (single pass)."""
    s = jnp.sum(h, axis=0, keepdims=True)
    q = jnp.sum(h * h, axis=0, keepdims=True)
    return jnp.concatenate([s, q], axis=0)


# ------- Kernel 1: packed 1x1 conv (x_packed @ blockdiag(W1)) + BN partials ----
def _conv1_kernel(x_ref, w1_ref, h1_ref, st_ref):
    h = jnp.dot(x_ref[...].astype(jnp.bfloat16), w1_ref[...],
                preferred_element_type=jnp.float32)            # (tm, 64*pack)
    h1_ref[...] = h.astype(h1_ref.dtype)
    st_ref[0] = _partial_stats(h)


# ------- Kernel 2: ABN1 + 3x3 conv as a single K=576 im2col matmul + partials --
def _conv3_kernel(h1_ref, w2_ref, s1_ref, t1_ref, h2_ref, st_ref, apad_ref):
    _, H, W, _ = h1_ref.shape
    # ABN1 on this image; conv zero-padding applies to the *post*-ABN activation,
    # so place it inside a zero-filled padded VMEM scratch (no HBM pad pass).
    a = _leaky(h1_ref[0].astype(jnp.float32) * s1_ref[...] + t1_ref[...])
    apad_ref[...] = jnp.zeros_like(apad_ref)        # scratch persists -> re-zero
    apad_ref[1:H + 1, PAD_L:PAD_L + W, :] = a       # 8-aligned sublane window
    ap = apad_ref[...]

    # im2col: 9 shifted taps concatenated along lanes -> one (H*W,576)@(576,64).
    taps = []
    for ki in range(3):
        for kj in range(3):
            st = PAD_L - 1 + kj
            taps.append(ap[ki:ki + H, st:st + W, :].reshape(H * W, CMID))
    slab = jnp.concatenate(taps, axis=-1)                       # (H*W, 576) f32
    acc = jnp.dot(slab.astype(jnp.bfloat16), w2_ref[...],
                  preferred_element_type=jnp.float32)           # (H*W, 64)
    h2_ref[...] = acc.astype(h2_ref.dtype)
    st_ref[0] = _partial_stats(acc)


# ------- Kernel 3: ABN2 + packed 1x1 conv (blockdiag W3) + residual + partials -
def _conv1_res_kernel(h2_ref, x_ref, w3_ref, s2_ref, t2_ref, y_ref, st_ref):
    h2a = _leaky(h2_ref[...].astype(jnp.float32) * s2_ref[...] + t2_ref[...])
    y = x_ref[...] + jnp.dot(h2a.astype(jnp.bfloat16), w3_ref[...],
                             preferred_element_type=jnp.float32)  # (tm, C*pack)
    y_ref[...] = y
    st_ref[0] = _partial_stats(y)


# ------- Kernel 4: final ABN on the lane-dense packed view ---------------------
def _abn_kernel(y_ref, s_ref, t_ref, o_ref):
    o_ref[...] = _leaky(y_ref[...] * s_ref[...] + t_ref[...])


def _row_tile(m, cap=1024):
    """Largest divisor of m that is a multiple of 8 and <= cap (else m)."""
    # TODO(synk): for awkward m with no such divisor this degenerates to a
    # single whole-array block; a cdiv grid + masked ragged tile would bound
    # VMEM for arbitrary m.
    best = m
    for t in range(8, min(m, cap) + 1, 8):
        if m % t == 0:
            best = t
    return best


def _finalize_stats(partial, count, gamma, beta, pack, c):
    """Reduce per-tile lane-packed (sum, sumsq) partials to BN scale/shift."""
    s = jnp.sum(partial, axis=0)                     # (2, c*pack)
    s = s.reshape(2, pack, c).sum(axis=1)            # (2, c)
    mean = s[0] / count
    var = s[1] / count - mean * mean                 # biased variance
    # TODO(synk): single-pass E[x^2]-E[x]^2 can cancel for very large M.
    scale = gamma * lax.rsqrt(var + EPS)             # (1, c)
    shift = beta - mean * scale                      # (1, c)
    return scale, shift


def res_layer(x_nchw, params):
    N, C, H, W = x_nchw.shape
    M = N * H * W
    HW = H * W

    # Lane-packing factor: view (M, C)/(M, 64) tensors as (M/pack, width*pack)
    # so every 1x1-conv kernel reads/writes 128+ lane-dense rows.
    pack = 128 // C if (128 % C == 0 and M % (128 // C) == 0) else 1
    Cp, Kp, Mp = C * pack, CMID * pack, M // pack

    eye = jnp.eye(pack, dtype=jnp.float32)
    w1_bd = jnp.kron(eye, params["w1"]).astype(jnp.bfloat16)   # (Cp, Kp) blockdiag
    w3_bd = jnp.kron(eye, params["w3"]).astype(jnp.bfloat16)   # (Kp, Cp) blockdiag
    w2f = params["w2"].astype(jnp.bfloat16).reshape(9 * CMID, CMID)   # (576, 64)
    g1, b1 = params["g1"], params["b1"]
    g2, b2 = params["g2"], params["b2"]
    g3, b3 = params["g3"], params["b3"]

    cparams = pltpu.CompilerParams(
        dimension_semantics=("parallel",),
        vmem_limit_bytes=32 * 1024 * 1024)           # safe on v5e/v6e/v7x

    # packed view of x (free reshape after the unavoidable NCHW->NHWC transpose)
    xp = jnp.transpose(x_nchw, (0, 2, 3, 1)).reshape(Mp, Cp)

    tm = _row_tile(Mp)
    nt = Mp // tm

    # ---- Kernel 1: h1_pre = x @ W1 (packed), per-tile BN partials ------------
    h1_pk, st1 = pl.pallas_call(
        _conv1_kernel,
        grid=(nt,),
        in_specs=[pl.BlockSpec((tm, Cp), lambda i: (i, 0)),
                  pl.BlockSpec((Cp, Kp), lambda i: (0, 0))],
        out_specs=(pl.BlockSpec((tm, Kp), lambda i: (i, 0)),
                   pl.BlockSpec((1, 2, Kp), lambda i: (i, 0, 0))),
        out_shape=(jax.ShapeDtypeStruct((Mp, Kp), jnp.bfloat16),
                   jax.ShapeDtypeStruct((nt, 2, Kp), jnp.float32)),
        compiler_params=cparams,
    )(xp, w1_bd)
    s1, t1 = _finalize_stats(st1, M, g1, b1, pack, CMID)

    # ---- Kernel 2: ABN1 + 3x3 conv via VMEM-padded im2col (no HBM pad) -------
    h1_img = h1_pk.reshape(N, H, W, CMID)            # free row-major reshape
    h2_pre, st2 = pl.pallas_call(
        _conv3_kernel,
        grid=(N,),
        in_specs=[pl.BlockSpec((1, H, W, CMID), lambda n: (n, 0, 0, 0)),
                  pl.BlockSpec((9 * CMID, CMID), lambda n: (0, 0)),
                  pl.BlockSpec((1, CMID), lambda n: (0, 0)),
                  pl.BlockSpec((1, CMID), lambda n: (0, 0))],
        out_specs=(pl.BlockSpec((HW, CMID), lambda n: (n, 0)),
                   pl.BlockSpec((1, 2, CMID), lambda n: (n, 0, 0))),
        out_shape=(jax.ShapeDtypeStruct((M, CMID), jnp.bfloat16),
                   jax.ShapeDtypeStruct((N, 2, CMID), jnp.float32)),
        scratch_shapes=[pltpu.VMEM((H + 2, W + PAD_L + 1, CMID), jnp.float32)],
        compiler_params=cparams,
    )(h1_img, w2f, s1, t1)
    s2, t2 = _finalize_stats(st2, M, g2, b2, 1, CMID)

    # ---- Kernel 3: ABN2 + packed 1x1 conv + residual add, BN partials --------
    h2_pk = h2_pre.reshape(Mp, Kp)                   # free row-major reshape
    s2p, t2p = jnp.tile(s2, (1, pack)), jnp.tile(t2, (1, pack))
    y_pk, st3 = pl.pallas_call(
        _conv1_res_kernel,
        grid=(nt,),
        in_specs=[pl.BlockSpec((tm, Kp), lambda i: (i, 0)),
                  pl.BlockSpec((tm, Cp), lambda i: (i, 0)),
                  pl.BlockSpec((Kp, Cp), lambda i: (0, 0)),
                  pl.BlockSpec((1, Kp), lambda i: (0, 0)),
                  pl.BlockSpec((1, Kp), lambda i: (0, 0))],
        out_specs=(pl.BlockSpec((tm, Cp), lambda i: (i, 0)),
                   pl.BlockSpec((1, 2, Cp), lambda i: (i, 0, 0))),
        out_shape=(jax.ShapeDtypeStruct((Mp, Cp), jnp.float32),
                   jax.ShapeDtypeStruct((nt, 2, Cp), jnp.float32)),
        compiler_params=cparams,
    )(h2_pk, xp, w3_bd, s2p, t2p)
    s3, t3 = _finalize_stats(st3, M, g3, b3, pack, C)

    # ---- Kernel 4: final ABN, lane-dense packed view --------------------------
    s3p, t3p = jnp.tile(s3, (1, pack)), jnp.tile(t3, (1, pack))
    out_pk = pl.pallas_call(
        _abn_kernel,
        grid=(nt,),
        in_specs=[pl.BlockSpec((tm, Cp), lambda i: (i, 0)),
                  pl.BlockSpec((1, Cp), lambda i: (0, 0)),
                  pl.BlockSpec((1, Cp), lambda i: (0, 0))],
        out_specs=pl.BlockSpec((tm, Cp), lambda i: (i, 0)),
        out_shape=jax.ShapeDtypeStruct((Mp, Cp), jnp.float32),
        compiler_params=cparams,
    )(y_pk, s3p, t3p)

    return jnp.transpose(out_pk.reshape(N, H, W, C), (0, 3, 1, 2))


def init_params(key, num_features):
    """Deterministic synthetic params (conv weights generated in OIHW like PyTorch)."""
    k1, k2, k3 = jax.random.split(key, 3)
    w1_oihw = 0.1 * jax.random.normal(k1, (64, num_features, 1, 1), jnp.float32)
    w2_oihw = 0.1 * jax.random.normal(k2, (64, 64, 3, 3), jnp.float32)
    w3_oihw = 0.1 * jax.random.normal(k3, (num_features, 64, 1, 1), jnp.float32)
    params = dict(
        # kernel-friendly layouts
        w1=jnp.transpose(w1_oihw[:, :, 0, 0], (1, 0)),                # (C, 64)
        w2=jnp.transpose(w2_oihw, (2, 3, 1, 0)).reshape(9, 64, 64),   # (tap, Cin, Cout)
        w3=jnp.transpose(w3_oihw[:, :, 0, 0], (1, 0)),                # (64, C)
        # InPlaceABN affine params at default init
        g1=jnp.ones((1, 64), jnp.float32), b1=jnp.zeros((1, 64), jnp.float32),
        g2=jnp.ones((1, 64), jnp.float32), b2=jnp.zeros((1, 64), jnp.float32),
        g3=jnp.ones((1, num_features), jnp.float32),
        b3=jnp.zeros((1, num_features), jnp.float32),
    )
    return params, (w1_oihw, w2_oihw, w3_oihw)


def ref_forward(x, w1_oihw, w2_oihw, w3_oihw, num_features):
    """Pure-JAX (XLA, f32) reference in NCHW, mirroring the PyTorch module."""
    dn = ('NCHW', 'OIHW', 'NCHW')

    def abn(y):
        mean = jnp.mean(y, axis=(0, 2, 3), keepdims=True)
        var = jnp.mean((y - mean) ** 2, axis=(0, 2, 3), keepdims=True)
        y = (y - mean) * lax.rsqrt(var + EPS)       # gamma=1, beta=0
        return jnp.where(y >= 0, y, SLOPE * y)

    h = lax.conv_general_dilated(x, w1_oihw, (1, 1), 'VALID', dimension_numbers=dn)
    h = abn(h)
    h = lax.conv_general_dilated(h, w2_oihw, (1, 1), ((1, 1), (1, 1)),
                                 dimension_numbers=dn)
    h = abn(h)
    h = lax.conv_general_dilated(h, w3_oihw, (1, 1), 'VALID', dimension_numbers=dn)
    return abn(x + h)


if __name__ == "__main__":
    num_features = 8
    N, H, W = 2, 16, 16

    key = jax.random.PRNGKey(0)
    kx, kp = jax.random.split(key)
    x = jax.random.normal(kx, (N, num_features, H, W), jnp.float32)
    params, (w1o, w2o, w3o) = init_params(kp, num_features)

    fwd = jax.jit(res_layer)
    out = jax.block_until_ready(fwd(x, params))
    assert out.shape == x.shape and out.dtype == jnp.float32

    ref = jax.block_until_ready(ref_forward(x, w1o, w2o, w3o, num_features))
    max_err = float(jnp.max(jnp.abs(out - ref)))
    # bf16 MXU operands + bf16 intermediate storage vs f32 reference
    assert max_err < 0.15, f"max_err={max_err}"

    print("KERNEL_OK")
</pallas_src>

<mosaic_0001>
module attributes {stable_mosaic.version = 11 : i64} {
  func.func @_conv1_kernel(%arg0: i32, %arg1: memref<32x128xf32, #tpu.memory_space<vmem>>, %arg2: memref<128x1024xbf16, #tpu.memory_space<vmem>>, %arg3: memref<32x1024xbf16, #tpu.memory_space<vmem>>, %arg4: memref<1x2x1024xf32, #tpu.memory_space<vmem>>) attributes {dimension_semantics = [#tpu.dimension_semantics<parallel>], iteration_bounds = array<i64: 1>, scalar_prefetch = 0 : i64, scratch_operands = 0 : i64, tpu.core_type = #tpu.core_type<tc>, window_params = [{transform_indices = @transform_0, window_bounds = array<i64: 32, 128>}, {pipeline_mode = #tpu.pipeline_mode<synchronous>, transform_indices = @transform_1, window_bounds = array<i64: 128, 1024>}, {transform_indices = @transform_2, window_bounds = array<i64: 32, 1024>}, {transform_indices = @transform_3, window_bounds = array<i64: 1, 2, 1024>}]} {
    %c0 = arith.constant 0 : index
    %c0_0 = arith.constant 0 : index
    %0 = vector.load %arg1[%c0, %c0_0] : memref<32x128xf32, #tpu.memory_space<vmem>>, vector<32x128xf32>
    %1 = arith.truncf %0 : vector<32x128xf32> to vector<32x128xbf16>
    %c0_1 = arith.constant 0 : index
    %c0_2 = arith.constant 0 : index
    %2 = vector.load %arg2[%c0_1, %c0_2] : memref<128x1024xbf16, #tpu.memory_space<vmem>>, vector<128x1024xbf16>
    %cst = arith.constant dense<0.000000e+00> : vector<32x1024xf32>
    %3 = tpu.matmul %1, %2, %cst {dimension_numbers = #tpu.dot_dimension_numbers<[1], [0], [0], [1], [0, 0, 1, 1], [], []>} : vector<32x128xbf16>, vector<128x1024xbf16>, vector<32x1024xf32> -> vector<32x1024xf32>
    %4 = arith.truncf %3 : vector<32x1024xf32> to vector<32x1024xbf16>
    %c0_3 = arith.constant 0 : index
    %c0_4 = arith.constant 0 : index
    %5 = vector.load %arg3[%c0_3, %c0_4] : memref<32x1024xbf16, #tpu.memory_space<vmem>>, vector<32x1024xbf16>
    tpu.vector_store %arg3[%c0_3, %c0_4], %4 {strides = array<i32>} : memref<32x1024xbf16, #tpu.memory_space<vmem>>, vector<32x1024xbf16>,
    %cst_5 = arith.constant dense<0.000000e+00> : vector<1024xf32>
    %6 = vector.multi_reduction <add>, %3, %cst_5 [0] : vector<32x1024xf32> to vector<1024xf32>
    %7 = vector.shape_cast %6 : vector<1024xf32> to vector<1x1024xf32>
    %8 = arith.mulf %3, %3 : vector<32x1024xf32>
    %cst_6 = arith.constant dense<0.000000e+00> : vector<1024xf32>
    %9 = vector.multi_reduction <add>, %8, %cst_6 [0] : vector<32x1024xf32> to vector<1024xf32>
    %10 = vector.shape_cast %9 : vector<1024xf32> to vector<1x1024xf32>
    %11 = tpu.concatenate %7, %10 in 0 : vector<1x1024xf32>, vector<1x1024xf32> -> vector<2x1024xf32>
    %c0_7 = arith.constant 0 : index
    %c0_8 = arith.constant 0 : index
    %c0_9 = arith.constant 0 : index
    %12 = vector.load %arg4[%c0_7, %c0_8, %c0_9] : memref<1x2x1024xf32, #tpu.memory_space<vmem>>, vector<1x2x1024xf32>
    %13 = vector.shape_cast %12 : vector<1x2x1024xf32> to vector<2x1024xf32>
    %14 = vector.shape_cast %11 : vector<2x1024xf32> to vector<1x2x1024xf32>
    tpu.vector_store %arg4[%c0_7, %c0_8, %c0_9], %14 {strides = array<i32>} : memref<1x2x1024xf32, #tpu.memory_space<vmem>>, vector<1x2x1024xf32>,
    return
  }
  func.func @transform_0(%arg0: i32) -> (i32, i32) {
    %c0_i32 = arith.constant 0 : i32
    %c0_i32_0 = arith.constant 0 : i32
    return %arg0, %c0_i32 : i32, i32
  }
  func.func @transform_1(%arg0: i32) -> (i32, i32) {
    %c0_i32 = arith.constant 0 : i32
    %c0_i32_0 = arith.constant 0 : i32
    %c0_i32_1 = arith.constant 0 : i32
    return %c0_i32, %c0_i32_0 : i32, i32
  }
  func.func @transform_2(%arg0: i32) -> (i32, i32) {
    %c0_i32 = arith.constant 0 : i32
    %c0_i32_0 = arith.constant 0 : i32
    return %arg0, %c0_i32 : i32, i32
  }
  func.func @transform_3(%arg0: i32) -> (i32, i32, i32) {
    %c0_i32 = arith.constant 0 : i32
    %c0_i32_0 = arith.constant 0 : i32
    %c0_i32_1 = arith.constant 0 : i32
    return %arg0, %c0_i32, %c0_i32_0 : i32, i32, i32
  }
}

module attributes {stable_mosaic.version = 11 : i64} {
  func.func @_conv3_kernel(%arg0: i32, %arg1: memref<1x16x16x64xbf16, #tpu.memory_space<vmem>>, %arg2: memref<576x64xbf16, #tpu.memory_space<vmem>>, %arg3: memref<1x64xf32, #tpu.memory_space<vmem>>, %arg4: memref<1x64xf32, #tpu.memory_space<vmem>>, %arg5: memref<256x64xbf16, #tpu.memory_space<vmem>>, %arg6: memref<1x2x64xf32, #tpu.memory_space<vmem>>, %arg7: memref<18x25x64xf32, #tpu.memory_space<vmem>>) attributes {dimension_semantics = [#tpu.dimension_semantics<parallel>], iteration_bounds = array<i64: 2>, scalar_prefetch = 0 : i64, scratch_operands = 1 : i64, tpu.core_type = #tpu.core_type<tc>, window_params = [{transform_indices = @transform_0, window_bounds = array<i64: 1, 16, 16, 64>}, {pipeline_mode = #tpu.pipeline_mode<synchronous>, transform_indices = @transform_1, window_bounds = array<i64: 576, 64>}, {pipeline_mode = #tpu.pipeline_mode<synchronous>, transform_indices = @transform_2, window_bounds = array<i64: 1, 64>}, {pipeline_mode = #tpu.pipeline_mode<synchronous>, transform_indices = @transform_3, window_bounds = array<i64: 1, 64>}, {transform_indices = @transform_4, window_bounds = array<i64: 256, 64>}, {transform_indices = @transform_5, window_bounds = array<i64: 1, 2, 64>}]} {
    %c0 = arith.constant 0 : index
    %c0_0 = arith.constant 0 : index
    %c0_1 = arith.constant 0 : index
    %c0_2 = arith.constant 0 : index
    %0 = vector.load %arg1[%c0, %c0_0, %c0_1, %c0_2] : memref<1x16x16x64xbf16, #tpu.memory_space<vmem>>, vector<1x16x16x64xbf16>
    %1 = vector.shape_cast %0 : vector<1x16x16x64xbf16> to vector<16x16x64xbf16>
    %2 = arith.extf %1 : vector<16x16x64xbf16> to vector<16x16x64xf32>
    %c0_3 = arith.constant 0 : index
    %c0_4 = arith.constant 0 : index
    %3 = vector.load %arg3[%c0_3, %c0_4] : memref<1x64xf32, #tpu.memory_space<vmem>>, vector<1x64xf32>
    %4 = vector.shape_cast %3 : vector<1x64xf32> to vector<1x1x64xf32>
    %5 = vector.broadcast %4 : vector<1x1x64xf32> to vector<16x16x64xf32>
    %6 = arith.mulf %2, %5 : vector<16x16x64xf32>
    %c0_5 = arith.constant 0 : index
    %c0_6 = arith.constant 0 : index
    %7 = vector.load %arg4[%c0_5, %c0_6] : memref<1x64xf32, #tpu.memory_space<vmem>>, vector<1x64xf32>
    %8 = vector.shape_cast %7 : vector<1x64xf32> to vector<1x1x64xf32>
    %9 = vector.broadcast %8 : vector<1x1x64xf32> to vector<16x16x64xf32>
    %10 = arith.addf %6, %9 : vector<16x16x64xf32>
    %cst = arith.constant 0.000000e+00 : f32
    %11 = vector.broadcast %cst : f32 to vector<16x16x64xf32>
    %12 = arith.cmpf oge, %10, %11 : vector<16x16x64xf32>
    %cst_7 = arith.constant 0.00999999977 : f32
    %13 = vector.broadcast %cst_7 : f32 to vector<16x16x64xf32>
    %14 = arith.mulf %13, %10 : vector<16x16x64xf32>
    %15 = arith.select %12, %10, %14 : vector<16x16x64xi1>, vector<16x16x64xf32>
    %cst_8 = arith.constant 0.000000e+00 : f32
    %16 = vector.broadcast %cst_8 : f32 to vector<18x25x64xf32>
    %c0_9 = arith.constant 0 : index
    %c0_10 = arith.constant 0 : index
    %c0_11 = arith.constant 0 : index
    %17 = vector.load %arg7[%c0_9, %c0_10, %c0_11] : memref<18x25x64xf32, #tpu.memory_space<vmem>>, vector<18x25x64xf32>
    tpu.vector_store %arg7[%c0_9, %c0_10, %c0_11], %16 {strides = array<i32>} : memref<18x25x64xf32, #tpu.memory_space<vmem>>, vector<18x25x64xf32>,
    %c1 = arith.constant 1 : index
    %c8 = arith.constant 8 : index
    %c0_12 = arith.constant 0 : index
    %18 = vector.load %arg7[%c1, %c8, %c0_12] : memref<18x25x64xf32, #tpu.memory_space<vmem>>, vector<16x16x64xf32>
    tpu.vector_store %arg7[%c1, %c8, %c0_12], %15 {strides = array<i32>} : memref<18x25x64xf32, #tpu.memory_space<vmem>>, vector<16x16x64xf32>,
    %c0_13 = arith.constant 0 : index
    %c0_14 = arith.constant 0 : index
    %c0_15 = arith.constant 0 : index
    %19 = vector.load %arg7[%c0_13, %c0_14, %c0_15] : memref<18x25x64xf32, #tpu.memory_space<vmem>>, vector<18x25x64xf32>
    %20 = vector.extract_strided_slice %19 {offsets = [0, 7, 0], sizes = [16, 16, 64], strides = [1, 1, 1]} : vector<18x25x64xf32> to vector<16x16x64xf32>
    %21 = vector.shape_cast %20 : vector<16x16x64xf32> to vector<256x64xf32>
    %22 = vector.extract_strided_slice %19 {offsets = [0, 8, 0], sizes = [16, 16, 64], strides = [1, 1, 1]} : vector<18x25x64xf32> to vector<16x16x64xf32>
    %23 = vector.shape_cast %22 : vector<16x16x64xf32> to vector<256x64xf32>
    %24 = vector.extract_strided_slice %19 {offsets = [0, 9, 0], sizes = [16, 16, 64], strides = [1, 1, 1]} : vector<18x25x64xf32> to vector<16x16x64xf32>
    %25 = vector.shape_cast %24 : vector<16x16x64xf32> to vector<256x64xf32>
    %26 = vector.extract_strided_slice %19 {offsets = [1, 7, 0], sizes = [16, 16, 64], strides = [1, 1, 1]} : vector<18x25x64xf32> to vector<16x16x64xf32>
    %27 = vector.shape_cast %26 : vector<16x16x64xf32> to vector<256x64xf32>
    %28 = vector.extract_strided_slice %19 {offsets = [1, 8, 0], sizes = [16, 16, 64], strides = [1, 1, 1]} : vector<18x25x64xf32> to vector<16x16x64xf32>
    %29 = vector.shape_cast %28 : vector<16x16x64xf32> to vector<256x64xf32>
    %30 = vector.extract_strided_slice %19 {offsets = [1, 9, 0], sizes = [16, 16, 64], strides = [1, 1, 1]} : vector<18x25x64xf32> to vector<16x16x64xf32>
    %31 = vector.shape_cast %30 : vector<16x16x64xf32> to vector<256x64xf32>
    %32 = vector.extract_strided_slice %19 {offsets = [2, 7, 0], sizes = [16, 16, 64], strides = [1, 1, 1]} : vector<18x25x64xf32> to vector<16x16x64xf32>
    %33 = vector.shape_cast %32 : vector<16x16x64xf32> to vector<256x64xf32>
    %34 = vector.extract_strided_slice %19 {offsets = [2, 8, 0], sizes = [16, 16, 64], strides = [1, 1, 1]} : vector<18x25x64xf32> to vector<16x16x64xf32>
    %35 = vector.shape_cast %34 : vector<16x16x64xf32> to vector<256x64xf32>
    %36 = vector.extract_strided_slice %19 {offsets = [2, 9, 0], sizes = [16, 16, 64], strides = [1, 1, 1]} : vector<18x25x64xf32> to vector<16x16x64xf32>
    %37 = vector.shape_cast %36 : vector<16x16x64xf32> to vector<256x64xf32>
    %38 = tpu.concatenate %21, %23, %25, %27, %29, %31, %33, %35, %37 in 1 : vector<256x64xf32>, vector<256x64xf32>, vector<256x64xf32>, vector<256x64xf32>, vector<256x64xf32>, vector<256x64xf32>, vector<256x64xf32>, vector<256x64xf32>, vector<256x64xf32> -> vector<256x576xf32>
    %39 = arith.truncf %38 : vector<256x576xf32> to vector<256x576xbf16>
    %c0_16 = arith.constant 0 : index
    %c0_17 = arith.constant 0 : index
    %40 = vector.load %arg2[%c0_16, %c0_17] : memref<576x64xbf16, #tpu.memory_space<vmem>>, vector<576x64xbf16>
    %cst_18 = arith.constant dense<0.000000e+00> : vector<256x64xf32>
    %41 = tpu.matmul %39, %40, %cst_18 {dimension_numbers = #tpu.dot_dimension_numbers<[1], [0], [0], [1], [0, 0, 1, 1], [], []>} : vector<256x576xbf16>, vector<576x64xbf16>, vector<256x64xf32> -> vector<256x64xf32>
    %42 = arith.truncf %41 : vector<256x64xf32> to vector<256x64xbf16>
    %c0_19 = arith.constant 0 : index
    %c0_20 = arith.constant 0 : index
    %43 = vector.load %arg5[%c0_19, %c0_20] : memref<256x64xbf16, #tpu.memory_space<vmem>>, vector<256x64xbf16>
    tpu.vector_store %arg5[%c0_19, %c0_20], %42 {strides = array<i32>} : memref<256x64xbf16, #tpu.memory_space<vmem>>, vector<256x64xbf16>,
    %cst_21 = arith.constant dense<0.000000e+00> : vector<64xf32>
    %44 = vector.multi_reduction <add>, %41, %cst_21 [0] : vector<256x64xf32> to vector<64xf32>
    %45 = vector.shape_cast %44 : vector<64xf32> to vector<1x64xf32>
    %46 = arith.mulf %41, %41 : vector<256x64xf32>
    %cst_22 = arith.constant dense<0.000000e+00> : vector<64xf32>
    %47 = vector.multi_reduction <add>, %46, %cst_22 [0] : vector<256x64xf32> to vector<64xf32>
    %48 = vector.shape_cast %47 : vector<64xf32> to vector<1x64xf32>
    %49 = tpu.concatenate %45, %48 in 0 : vector<1x64xf32>, vector<1x64xf32> -> vector<2x64xf32>
    %c0_23 = arith.constant 0 : index
    %c0_24 = arith.constant 0 : index
    %c0_25 = arith.constant 0 : index
    %50 = vector.load %arg6[%c0_23, %c0_24, %c0_25] : memref<1x2x64xf32, #tpu.memory_space<vmem>>, vector<1x2x64xf32>
    %51 = vector.shape_cast %50 : vector<1x2x64xf32> to vector<2x64xf32>
    %52 = vector.shape_cast %49 : vector<2x64xf32> to vector<1x2x64xf32>
    tpu.vector_store %arg6[%c0_23, %c0_24, %c0_25], %52 {strides = array<i32>} : memref<1x2x64xf32, #tpu.memory_space<vmem>>, vector<1x2x64xf32>,
    return
  }
  func.func @transform_0(%arg0: i32) -> (i32, i32, i32, i32) {
    %c0_i32 = arith.constant 0 : i32
    %c0_i32_0 = arith.constant 0 : i32
    %c0_i32_1 = arith.constant 0 : i32
    %c0_i32_2 = arith.constant 0 : i32
    return %arg0, %c0_i32, %c0_i32_0, %c0_i32_1 : i32, i32, i32, i32
  }
  func.func @transform_1(%arg0: i32) -> (i32, i32) {
    %c0_i32 = arith.constant 0 : i32
    %c0_i32_0 = arith.constant 0 : i32
    %c0_i32_1 = arith.constant 0 : i32
    return %c0_i32, %c0_i32_0 : i32, i32
  }
  func.func @transform_2(%arg0: i32) -> (i32, i32) {
    %c0_i32 = arith.constant 0 : i32
    %c0_i32_0 = arith.constant 0 : i32
    %c0_i32_1 = arith.constant 0 : i32
    return %c0_i32, %c0_i32_0 : i32, i32
  }
  func.func @transform_3(%arg0: i32) -> (i32, i32) {
    %c0_i32 = arith.constant 0 : i32
    %c0_i32_0 = arith.constant 0 : i32
    %c0_i32_1 = arith.constant 0 : i32
    return %c0_i32, %c0_i32_0 : i32, i32
  }
  func.func @transform_4(%arg0: i32) -> (i32, i32) {
    %c0_i32 = arith.constant 0 : i32
    %c0_i32_0 = arith.constant 0 : i32
    return %arg0, %c0_i32 : i32, i32
  }
  func.func @transform_5(%arg0: i32) -> (i32, i32, i32) {
    %c0_i32 = arith.constant 0 : i32
    %c0_i32_0 = arith.constant 0 : i32
    %c0_i32_1 = arith.constant 0 : i32
    return %arg0, %c0_i32, %c0_i32_0 : i32, i32, i32
  }
}

module attributes {stable_mosaic.version = 11 : i64} {
  func.func @_conv1_res_kernel(%arg0: i32, %arg1: memref<32x1024xbf16, #tpu.memory_space<vmem>>, %arg2: memref<32x128xf32, #tpu.memory_space<vmem>>, %arg3: memref<1024x128xbf16, #tpu.memory_space<vmem>>, %arg4: memref<1x1024xf32, #tpu.memory_space<vmem>>, %arg5: memref<1x1024xf32, #tpu.memory_space<vmem>>, %arg6: memref<32x128xf32, #tpu.memory_space<vmem>>, %arg7: memref<1x2x128xf32, #tpu.memory_space<vmem>>) attributes {dimension_semantics = [#tpu.dimension_semantics<parallel>], iteration_bounds = array<i64: 1>, scalar_prefetch = 0 : i64, scratch_operands = 0 : i64, tpu.core_type = #tpu.core_type<tc>, window_params = [{transform_indices = @transform_0, window_bounds = array<i64: 32, 1024>}, {transform_indices = @transform_1, window_bounds = array<i64: 32, 128>}, {pipeline_mode = #tpu.pipeline_mode<synchronous>, transform_indices = @transform_2, window_bounds = array<i64: 1024, 128>}, {pipeline_mode = #tpu.pipeline_mode<synchronous>, transform_indices = @transform_3, window_bounds = array<i64: 1, 1024>}, {pipeline_mode = #tpu.pipeline_mode<synchronous>, transform_indices = @transform_4, window_bounds = array<i64: 1, 1024>}, {transform_indices = @transform_5, window_bounds = array<i64: 32, 128>}, {transform_indices = @transform_6, window_bounds = array<i64: 1, 2, 128>}]} {
    %c0 = arith.constant 0 : index
    %c0_0 = arith.constant 0 : index
    %0 = vector.load %arg1[%c0, %c0_0] : memref<32x1024xbf16, #tpu.memory_space<vmem>>, vector<32x1024xbf16>
    %1 = arith.extf %0 : vector<32x1024xbf16> to vector<32x1024xf32>
    %c0_1 = arith.constant 0 : index
    %c0_2 = arith.constant 0 : index
    %2 = vector.load %arg4[%c0_1, %c0_2] : memref<1x1024xf32, #tpu.memory_space<vmem>>, vector<1x1024xf32>
    %3 = vector.broadcast %2 : vector<1x1024xf32> to vector<32x1024xf32>
    %4 = arith.mulf %1, %3 : vector<32x1024xf32>
    %c0_3 = arith.constant 0 : index
    %c0_4 = arith.constant 0 : index
    %5 = vector.load %arg5[%c0_3, %c0_4] : memref<1x1024xf32, #tpu.memory_space<vmem>>, vector<1x1024xf32>
    %6 = vector.broadcast %5 : vector<1x1024xf32> to vector<32x1024xf32>
    %7 = arith.addf %4, %6 : vector<32x1024xf32>
    %cst = arith.constant 0.000000e+00 : f32
    %8 = vector.broadcast %cst : f32 to vector<32x1024xf32>
    %9 = arith.cmpf oge, %7, %8 : vector<32x1024xf32>
    %cst_5 = arith.constant 0.00999999977 : f32
    %10 = vector.broadcast %cst_5 : f32 to vector<32x1024xf32>
    %11 = arith.mulf %10, %7 : vector<32x1024xf32>
    %12 = arith.select %9, %7, %11 : vector<32x1024xi1>, vector<32x1024xf32>
    %c0_6 = arith.constant 0 : index
    %c0_7 = arith.constant 0 : index
    %13 = vector.load %arg2[%c0_6, %c0_7] : memref<32x128xf32, #tpu.memory_space<vmem>>, vector<32x128xf32>
    %14 = arith.truncf %12 : vector<32x1024xf32> to vector<32x1024xbf16>
    %c0_8 = arith.constant 0 : index
    %c0_9 = arith.constant 0 : index
    %15 = vector.load %arg3[%c0_8, %c0_9] : memref<1024x128xbf16, #tpu.memory_space<vmem>>, vector<1024x128xbf16>
    %cst_10 = arith.constant dense<0.000000e+00> : vector<32x128xf32>
    %16 = tpu.matmul %14, %15, %cst_10 {dimension_numbers = #tpu.dot_dimension_numbers<[1], [0], [0], [1], [0, 0, 1, 1], [], []>} : vector<32x1024xbf16>, vector<1024x128xbf16>, vector<32x128xf32> -> vector<32x128xf32>
    %17 = arith.addf %13, %16 : vector<32x128xf32>
    %c0_11 = arith.constant 0 : index
    %c0_12 = arith.constant 0 : index
    %18 = vector.load %arg6[%c0_11, %c0_12] : memref<32x128xf32, #tpu.memory_space<vmem>>, vector<32x128xf32>
    tpu.vector_store %arg6[%c0_11, %c0_12], %17 {strides = array<i32>} : memref<32x128xf32, #tpu.memory_space<vmem>>, vector<32x128xf32>,
    %cst_13 = arith.constant dense<0.000000e+00> : vector<128xf32>
    %19 = vector.multi_reduction <add>, %17, %cst_13 [0] : vector<32x128xf32> to vector<128xf32>
    %20 = vector.shape_cast %19 : vector<128xf32> to vector<1x128xf32>
    %21 = arith.mulf %17, %17 : vector<32x128xf32>
    %cst_14 = arith.constant dense<0.000000e+00> : vector<128xf32>
    %22 = vector.multi_reduction <add>, %21, %cst_14 [0] : vector<32x128xf32> to vector<128xf32>
    %23 = vector.shape_cast %22 : vector<128xf32> to vector<1x128xf32>
    %24 = tpu.concatenate %20, %23 in 0 : vector<1x128xf32>, vector<1x128xf32> -> vector<2x128xf32>
    %c0_15 = arith.constant 0 : index
    %c0_16 = arith.constant 0 : index
    %c0_17 = arith.constant 0 : index
    %25 = vector.load %arg7[%c0_15, %c0_16, %c0_17] : memref<1x2x128xf32, #tpu.memory_space<vmem>>, vector<1x2x128xf32>
    %26 = vector.shape_cast %25 : vector<1x2x128xf32> to vector<2x128xf32>
    %27 = vector.shape_cast %24 : vector<2x128xf32> to vector<1x2x128xf32>
    tpu.vector_store %arg7[%c0_15, %c0_16, %c0_17], %27 {strides = array<i32>} : memref<1x2x128xf32, #tpu.memory_space<vmem>>, vector<1x2x128xf32>,
    return
  }
  func.func @transform_0(%arg0: i32) -> (i32, i32) {
    %c0_i32 = arith.constant 0 : i32
    %c0_i32_0 = arith.constant 0 : i32
    return %arg0, %c0_i32 : i32, i32
  }
  func.func @transform_1(%arg0: i32) -> (i32, i32) {
    %c0_i32 = arith.constant 0 : i32
    %c0_i32_0 = arith.constant 0 : i32
    return %arg0, %c0_i32 : i32, i32
  }
  func.func @transform_2(%arg0: i32) -> (i32, i32) {
    %c0_i32 = arith.constant 0 : i32
    %c0_i32_0 = arith.constant 0 : i32
    %c0_i32_1 = arith.constant 0 : i32
    return %c0_i32, %c0_i32_0 : i32, i32
  }
  func.func @transform_3(%arg0: i32) -> (i32, i32) {
    %c0_i32 = arith.constant 0 : i32
    %c0_i32_0 = arith.constant 0 : i32
    %c0_i32_1 = arith.constant 0 : i32
    return %c0_i32, %c0_i32_0 : i32, i32
  }
  func.func @transform_4(%arg0: i32) -> (i32, i32) {
    %c0_i32 = arith.constant 0 : i32
    %c0_i32_0 = arith.constant 0 : i32
    %c0_i32_1 = arith.constant 0 : i32
    return %c0_i32, %c0_i32_0 : i32, i32
  }
  func.func @transform_5(%arg0: i32) -> (i32, i32) {
    %c0_i32 = arith.constant 0 : i32
    %c0_i32_0 = arith.constant 0 : i32
    return %arg0, %c0_i32 : i32, i32
  }
  func.func @transform_6(%arg0: i32) -> (i32, i32, i32) {
    %c0_i32 = arith.constant 0 : i32
    %c0_i32_0 = arith.constant 0 : i32
    %c0_i32_1 = arith.constant 0 : i32
    return %arg0, %c0_i32, %c0_i32_0 : i32, i32, i32
  }
}

module attributes {stable_mosaic.version = 11 : i64} {
  func.func @_abn_kernel(%arg0: i32, %arg1: memref<32x128xf32, #tpu.memory_space<vmem>>, %arg2: memref<1x128xf32, #tpu.memory_space<vmem>>, %arg3: memref<1x128xf32, #tpu.memory_space<vmem>>, %arg4: memref<32x128xf32, #tpu.memory_space<vmem>>) attributes {dimension_semantics = [#tpu.dimension_semantics<parallel>], iteration_bounds = array<i64: 1>, scalar_prefetch = 0 : i64, scratch_operands = 0 : i64, tpu.core_type = #tpu.core_type<tc>, window_params = [{transform_indices = @transform_0, window_bounds = array<i64: 32, 128>}, {pipeline_mode = #tpu.pipeline_mode<synchronous>, transform_indices = @transform_1, window_bounds = array<i64: 1, 128>}, {pipeline_mode = #tpu.pipeline_mode<synchronous>, transform_indices = @transform_2, window_bounds = array<i64: 1, 128>}, {transform_indices = @transform_3, window_bounds = array<i64: 32, 128>}]} {
    %c0 = arith.constant 0 : index
    %c0_0 = arith.constant 0 : index
    %0 = vector.load %arg1[%c0, %c0_0] : memref<32x128xf32, #tpu.memory_space<vmem>>, vector<32x128xf32>
    %c0_1 = arith.constant 0 : index
    %c0_2 = arith.constant 0 : index
    %1 = vector.load %arg2[%c0_1, %c0_2] : memref<1x128xf32, #tpu.memory_space<vmem>>, vector<1x128xf32>
    %2 = vector.broadcast %1 : vector<1x128xf32> to vector<32x128xf32>
    %3 = arith.mulf %0, %2 : vector<32x128xf32>
    %c0_3 = arith.constant 0 : index
    %c0_4 = arith.constant 0 : index
    %4 = vector.load %arg3[%c0_3, %c0_4] : memref<1x128xf32, #tpu.memory_space<vmem>>, vector<1x128xf32>
    %5 = vector.broadcast %4 : vector<1x128xf32> to vector<32x128xf32>
    %6 = arith.addf %3, %5 : vector<32x128xf32>
    %cst = arith.constant 0.000000e+00 : f32
    %7 = vector.broadcast %cst : f32 to vector<32x128xf32>
    %8 = arith.cmpf oge, %6, %7 : vector<32x128xf32>
    %cst_5 = arith.constant 0.00999999977 : f32
    %9 = vector.broadcast %cst_5 : f32 to vector<32x128xf32>
    %10 = arith.mulf %9, %6 : vector<32x128xf32>
    %11 = arith.select %8, %6, %10 : vector<32x128xi1>, vector<32x128xf32>
    %c0_6 = arith.constant 0 : index
    %c0_7 = arith.constant 0 : index
    %12 = vector.load %arg4[%c0_6, %c0_7] : memref<32x128xf32, #tpu.memory_space<vmem>>, vector<32x128xf32>
    tpu.vector_store %arg4[%c0_6, %c0_7], %11 {strides = array<i32>} : memref<32x128xf32, #tpu.memory_space<vmem>>, vector<32x128xf32>,
    return
  }
  func.func @transform_0(%arg0: i32) -> (i32, i32) {
    %c0_i32 = arith.constant 0 : i32
    %c0_i32_0 = arith.constant 0 : i32
    return %arg0, %c0_i32 : i32, i32
  }
  func.func @transform_1(%arg0: i32) -> (i32, i32) {
    %c0_i32 = arith.constant 0 : i32
    %c0_i32_0 = arith.constant 0 : i32
    %c0_i32_1 = arith.constant 0 : i32
    return %c0_i32, %c0_i32_0 : i32, i32
  }
  func.func @transform_2(%arg0: i32) -> (i32, i32) {
    %c0_i32 = arith.constant 0 : i32
    %c0_i32_0 = arith.constant 0 : i32
    %c0_i32_1 = arith.constant 0 : i32
    return %c0_i32, %c0_i32_0 : i32, i32
  }
  func.func @transform_3(%arg0: i32) -> (i32, i32) {
    %c0_i32 = arith.constant 0 : i32
    %c0_i32_0 = arith.constant 0 : i32
    return %arg0, %c0_i32 : i32, i32
  }
}

</mosaic_0001>

<bundles_post_ra>
// kernel: res_layer.4
= control target key start
LH: loop header
LB: loop body
LE: loop exit
PB: predicated region body
PF: predicated region fallthrough
CT: control target
= control target key end

     0   :  { %v1065_v3 = vmov 0   ;;  %vm904_vm0 = vcmask 1040384   ;;  %s1383_s1 = inlined_call_operand.vmem [shape: bf16[128,1024], index: 1, kind: input, shape index: {}]   ;;  %s1384_s0 = inlined_call_operand.vmem [shape: f32[32,128], index: 0, kind: input, shape index: {}]   ;;  %s1385_s2 = inlined_call_operand.vmem [shape: bf16[32,1024], index: 2, kind: output, shape index: {0}]   ;;  %s1386_s3 = inlined_call_operand.vmem [shape: f32[1,2,1024], index: 3, kind: output, shape index: {1}]  }
   0x1   :  { %v20_v0 = vld [vmem:[%s1383_s1] sm:$0xff]  ;;  %v21_v2 = vld [vmem:[%s1383_s1 + $0x8] sm:$0xff]  ;;  %436 = vmatprep.mubr.bf16.mxu0 %v1065_v3  ;;  %489 = vmatprep.mubr.bf16.mxu1 %v1065_v3  ;;  %v22_v63 = vld [vmem:[%s1383_s1 + $0x10] sm:$0xff] }
   0x2   :  { %v24_v1 = vld [vmem:[%s1383_s1 + $0x20] sm:$0xff]  ;;  %v25_v5 = vld [vmem:[%s1383_s1 + $0x28] sm:$0xff] }
   0x3   :  { %v968_v4 = vcombine.high %v20_v0, %v24_v1  ;;  %v967_v6 = vcombine.low %v20_v0, %v24_v1  ;;  %v28_v7 = vld [vmem:[%s1383_s1 + $0x40] sm:$0xff]  ;;  %v970_v9 = vcombine.high %v21_v2, %v25_v5  ;;  %v969_v10 = vcombine.low %v21_v2, %v25_v5  ;;  %v29_v12 = vld [vmem:[%s1383_s1 + $0x48] sm:$0xff]  ;;  %v26_v0 = vld [vmem:[%s1383_s1 + $0x30] sm:$0xff] }
   0x4   :  { %v32_v8 = vld [vmem:[%s1383_s1 + $0x60] sm:$0xff]  ;;  %v33_v13 = vld [vmem:[%s1383_s1 + $0x68] sm:$0xff]  ;;  %v23_v1 = vld [vmem:[%s1383_s1 + $0x18] sm:$0xff] }
   0x5   :  { %v976_v11 = vcombine.high %v28_v7, %v32_v8  ;;  %v36_v14 = vld [vmem:[%s1383_s1 + $0x80] sm:$0xff]  ;;  %404 = vmatprep.subr.bf16.mxu0 %v968_v4  ;;  %v978_v15 = vcombine.high %v29_v12, %v33_v13  ;;  %v37_v17 = vld [vmem:[%s1383_s1 + $0x88] sm:$0xff]  ;;  %457 = vmatprep.subr.bf16.mxu1 %v970_v9  ;;  %v975_v19 = vcombine.low %v28_v7, %v32_v8  ;;  %v27_v2 = vld [vmem:[%s1383_s1 + $0x38] sm:$0xff] }
   0x6   :  { %v40_v16 = vld [vmem:[%s1383_s1 + $0xa0] sm:$0xff]  ;;  %v41_v18 = vld [vmem:[%s1383_s1 + $0xa8] sm:$0xff]  ;;  %405 = vmatpush1.bf16.msra.mxu0 %v967_v6  ;;  %458 = vmatpush1.bf16.msra.mxu1 %v969_v10  ;;  %v977_v20 = vcombine.low %v29_v12, %v33_v13  ;;  %v972_v8 = vcombine.high %v22_v63, %v26_v0  ;;  %v974_v9 = vcombine.high %v23_v1, %v27_v2  ;;  %v30_v10 = vld [vmem:[%s1383_s1 + $0x50] sm:$0xff] }
   0x7   :  { %406 = vmatprep.subr.bf16.mxu0 %v976_v11  ;;  %v984_v21 = vcombine.high %v36_v14, %v40_v16  ;;  %459 = vmatprep.subr.bf16.mxu1 %v978_v15  ;;  %v986_v22 = vcombine.high %v37_v17, %v41_v18  ;;  %v44_v23 = vld [vmem:[%s1383_s1 + $0xc0] sm:$0xff]  ;;  %v45_v25 = vld [vmem:[%s1383_s1 + $0xc8] sm:$0xff]  ;;  %v983_v27 = vcombine.low %v36_v14, %v40_v16  ;;  %v34_v11 = vld [vmem:[%s1383_s1 + $0x70] sm:$0xff] }
   0x8   :  { %v48_v24 = vld [vmem:[%s1383_s1 + $0xe0] sm:$0xff]  ;;  %v49_v26 = vld [vmem:[%s1383_s1 + $0xe8] sm:$0xff]  ;;  %v985_v28 = vcombine.low %v37_v17, %v41_v18  ;;  %v31_v13 = vld [vmem:[%s1383_s1 + $0x58] sm:$0xff]  ;;  %v971_v15 = vcombine.low %v22_v63, %v26_v0  ;;  %v973_v16 = vcombine.low %v23_v1, %v27_v2  ;;  %v980_v17 = vcombine.high %v30_v10, %v34_v11 }
   0x9   :  { %v992_v29 = vcombine.high %v44_v23, %v48_v24  ;;  %v994_v30 = vcombine.high %v45_v25, %v49_v26  ;;  %v52_v31 = vld [vmem:[%s1383_s1 + $0x100] sm:$0xff]  ;;  %v53_v33 = vld [vmem:[%s1383_s1 + $0x108] sm:$0xff]  ;;  %v991_v35 = vcombine.low %v44_v23, %v48_v24  ;;  %v993_v36 = vcombine.low %v45_v25, %v49_v26  ;;  %v35_v14 = vld [vmem:[%s1383_s1 + $0x78] sm:$0xff] }
   0xa   :  { %407 = vmatpush1.bf16.msra.mxu0 %v975_v19  ;;  %460 = vmatpush1.bf16.msra.mxu1 %v977_v20  ;;  %v56_v32 = vld [vmem:[%s1383_s1 + $0x120] sm:$0xff]  ;;  %v57_v34 = vld [vmem:[%s1383_s1 + $0x128] sm:$0xff]  ;;  %v982_v18 = vcombine.high %v31_v13, %v35_v14  ;;  %v38_v19 = vld [vmem:[%s1383_s1 + $0x90] sm:$0xff]  ;;  %v979_v23 = vcombine.low %v30_v10, %v34_v11  ;;  %v981_v26 = vcombine.low %v31_v13, %v35_v14 }
   0xb   :  { %408 = vmatprep.subr.bf16.mxu0 %v984_v21  ;;  %461 = vmatprep.subr.bf16.mxu1 %v986_v22  ;;  %v1000_v37 = vcombine.high %v52_v31, %v56_v32  ;;  %v1002_v38 = vcombine.high %v53_v33, %v57_v34  ;;  %v60_v39 = vld [vmem:[%s1383_s1 + $0x140] sm:$0xff]  ;;  %v61_v41 = vld [vmem:[%s1383_s1 + $0x148] sm:$0xff]  ;;  %v999_v43 = vcombine.low %v52_v31, %v56_v32  ;;  %v42_v20 = vld [vmem:[%s1383_s1 + $0xb0] sm:$0xff] }
   0xc   :  { %v64_v40 = vld [vmem:[%s1383_s1 + $0x160] sm:$0xff]  ;;  %v65_v42 = vld [vmem:[%s1383_s1 + $0x168] sm:$0xff]  ;;  %v1001_v44 = vcombine.low %v53_v33, %v57_v34  ;;  %v39_v21 = vld [vmem:[%s1383_s1 + $0x98] sm:$0xff]  ;;  %v987_v34 = vcombine.low %v38_v19, %v42_v20 }
   0xd   :  { %v1008_v45 = vcombine.high %v60_v39, %v64_v40  ;;  %v1010_v46 = vcombine.high %v61_v41, %v65_v42  ;;  %v68_v47 = vld [vmem:[%s1383_s1 + $0x180] sm:$0xff]  ;;  %v69_v49 = vld [vmem:[%s1383_s1 + $0x188] sm:$0xff]  ;;  %v1007_v51 = vcombine.low %v60_v39, %v64_v40  ;;  %v1009_v52 = vcombine.low %v61_v41, %v65_v42  ;;  %v43_v22 = vld [vmem:[%s1383_s1 + $0xb8] sm:$0xff] }
   0xe   :  { %409 = vmatpush1.bf16.msra.mxu0 %v983_v27  ;;  %462 = vmatpush1.bf16.msra.mxu1 %v985_v28  ;;  %v72_v48 = vld [vmem:[%s1383_s1 + $0x1a0] sm:$0xff]  ;;  %v73_v50 = vld [vmem:[%s1383_s1 + $0x1a8] sm:$0xff]  ;;  %v16_v24 = vld [vmem:[%s1384_s0 + $0x10] sm:$0xff]  ;;  %v988_v27 = vcombine.high %v38_v19, %v42_v20  ;;  %v990_v28 = vcombine.high %v39_v21, %v43_v22 }
   0xf   :  { %410 = vmatprep.subr.bf16.mxu0 %v992_v29  ;;  %463 = vmatprep.subr.bf16.mxu1 %v994_v30  ;;  %v1016_v53 = vcombine.high %v68_v47, %v72_v48  ;;  %v1018_v54 = vcombine.high %v69_v49, %v73_v50  ;;  %v76_v55 = vld [vmem:[%s1383_s1 + $0x1c0] sm:$0xff]  ;;  %v77_v57 = vld [vmem:[%s1383_s1 + $0x1c8] sm:$0xff]  ;;  %v1015_v59 = vcombine.low %v68_v47, %v72_v48  ;;  %v17_v25 = vld [vmem:[%s1384_s0 + $0x18] sm:$0xff] }
  0x10   :  { %v80_v56 = vld [vmem:[%s1383_s1 + $0x1e0] sm:$0xff]  ;;  %v81_v58 = vld [vmem:[%s1383_s1 + $0x1e8] sm:$0xff]  ;;  %v1017_v60 = vcombine.low %v69_v49, %v73_v50  ;;  %v46_v29 = vld [vmem:[%s1383_s1 + $0xd0] sm:$0xff]  ;;  %v1245_v31 = vpack.c.bf16 %v17_v25, %v16_v24 }
  0x11   :  { %v1024_v61 = vcombine.high %v76_v55, %v80_v56  ;;  %v1026_v62 = vcombine.high %v77_v57, %v81_v58  ;;  %v1023_v4 = vcombine.low %v76_v55, %v80_v56  ;;  %v14_v5 = vld [vmem:[%s1384_s0] sm:$0xff]  ;;  %v15_v6 = vld [vmem:[%s1384_s0 + $0x8] sm:$0xff]  ;;  %v1025_v7 = vcombine.low %v77_v57, %v81_v58  ;;  %v50_v30 = vld [vmem:[%s1383_s1 + $0xf0] sm:$0xff] }
  0x12   :  { %411 = vmatpush1.bf16.msra.mxu0 %v991_v35  ;;  %464 = vmatpush1.bf16.msra.mxu1 %v993_v36  ;;  %v1209_v12 = vpack.c.bf16 %v15_v6, %v14_v5  ;;  %v47_v32 = vld [vmem:[%s1383_s1 + $0xd8] sm:$0xff]  ;;  %v989_v35 = vcombine.low %v39_v21, %v43_v22  ;;  %v996_v36 = vcombine.high %v46_v29, %v50_v30  ;;  %v58_v39 = vld [vmem:[%s1383_s1 + $0x130] sm:$0xff] }
  0x13   :  { %412 = vmatprep.subr.bf16.mxu0 %v1000_v37  ;;  %465 = vmatprep.subr.bf16.mxu1 %v1002_v38  ;;  %v51_v33 = vld [vmem:[%s1383_s1 + $0xf8] sm:$0xff]  ;;  %v54_v38 = vld [vmem:[%s1383_s1 + $0x110] sm:$0xff]  ;;  %v995_v42 = vcombine.low %v46_v29, %v50_v30 }
  0x14   :  { %v998_v37 = vcombine.high %v47_v32, %v51_v33  ;;  %v55_v40 = vld [vmem:[%s1383_s1 + $0x118] sm:$0xff]  ;;  %v66_v47 = vld [vmem:[%s1383_s1 + $0x170] sm:$0xff]  ;;  %v1003_v50 = vcombine.low %v54_v38, %v58_v39 }
  0x15   :  { %v59_v41 = vld [vmem:[%s1383_s1 + $0x138] sm:$0xff]  ;;  %v74_v55 = vld [vmem:[%s1383_s1 + $0x1b0] sm:$0xff] }
  0x16   :  { %413 = vmatpush1.bf16.msra.mxu0 %v999_v43  ;;  %466 = vmatpush1.bf16.msra.mxu1 %v1001_v44  ;;  %v997_v43 = vcombine.low %v47_v32, %v51_v33  ;;  %v1004_v44 = vcombine.high %v54_v38, %v58_v39  ;;  %v63_v48 = vld [vmem:[%s1383_s1 + $0x158] sm:$0xff]  ;;  %v82_v63 = vld [vmem:[%s1383_s1 + $0x1f0] sm:$0xff] }
  0x17   :  { %414 = vmatprep.subr.bf16.mxu0 %v1008_v45  ;;  %467 = vmatprep.subr.bf16.mxu1 %v1010_v46  ;;  %v1006_v45 = vcombine.high %v55_v40, %v59_v41  ;;  %v62_v46 = vld [vmem:[%s1383_s1 + $0x150] sm:$0xff]  ;;  %v67_v49 = vld [vmem:[%s1383_s1 + $0x178] sm:$0xff] }
  0x18   :  { %v71_v56 = vld [vmem:[%s1383_s1 + $0x198] sm:$0xff]  ;;  %v1011_v58 = vcombine.low %v62_v46, %v66_v47 }
  0x19   :  { %v75_v57 = vld [vmem:[%s1383_s1 + $0x1b8] sm:$0xff] }
  0x1a   :  { %415 = vmatpush1.bf16.msra.mxu0 %v1007_v51  ;;  %468 = vmatpush1.bf16.msra.mxu1 %v1009_v52  ;;  %v1005_v51 = vcombine.low %v55_v40, %v59_v41  ;;  %v1012_v52 = vcombine.high %v62_v46, %v66_v47  ;;  %v79_v0 = vld [vmem:[%s1383_s1 + $0x1d8] sm:$0xff]  ;;  %v1066_v41 = vmov 1983009808  }
  0x1b   :  { %416 = vmatprep.subr.bf16.mxu0 %v1016_v53  ;;  %469 = vmatprep.subr.bf16.mxu1 %v1018_v54  ;;  %v1014_v53 = vcombine.high %v63_v48, %v67_v49  ;;  %v70_v54 = vld [vmem:[%s1383_s1 + $0x190] sm:$0xff]  ;;  %v83_v1 = vld [vmem:[%s1383_s1 + $0x1f8] sm:$0xff] }
  0x1c   :  { %v1019_v2 = vcombine.low %v70_v54, %v74_v55  ;;  %v1030_v6 = vcombine.high %v79_v0, %v83_v1 }
  0x1e   :  { %417 = vmatpush1.bf16.msra.mxu0 %v1015_v59  ;;  %470 = vmatpush1.bf16.msra.mxu1 %v1017_v60  ;;  %v1013_v59 = vcombine.low %v63_v48, %v67_v49  ;;  %v1020_v60 = vcombine.high %v70_v54, %v74_v55 }
  0x1f   :  { %418 = vmatprep.subr.bf16.mxu0 %v1024_v61  ;;  %471 = vmatprep.subr.bf16.mxu1 %v1026_v62  ;;  %v1022_v61 = vcombine.high %v71_v56, %v75_v57  ;;  %v78_v62 = vld [vmem:[%s1383_s1 + $0x1d0] sm:$0xff] }
  0x20   :  { %v1028_v5 = vcombine.high %v78_v62, %v82_v63 }
  0x22   :  { %419 = vmatpush1.bf16.msra.mxu0 %v1023_v4  ;;  %472 = vmatpush1.bf16.msra.mxu1 %v1025_v7  ;;  %v1021_v4 = vcombine.low %v71_v56, %v75_v57  ;;  %v1027_v7 = vcombine.low %v78_v62, %v82_v63 }
  0x23   :  { %510 = vmatprep.subr.bf16.mxu0 %v972_v8  ;;  %563 = vmatprep.subr.bf16.mxu1 %v974_v9  ;;  %v1029_v8 = vcombine.low %v79_v0, %v83_v1 }
  0x25   :  { %437 = vmatmul.mubr.bf16.vlgmr.msra.gmra.mrb[0].mxu0 %v1209_v12  ;;  %490 = vmatmul.mubr.bf16.vlgmr.msra.gmra.mrb[0].mxu1 %v1209_v12 }
  0x26   :  { %511 = vmatpush1.bf16.msra.mxu0 %v971_v15  ;;  %564 = vmatpush1.bf16.msra.mxu1 %v973_v16 }
  0x27   :  { %512 = vmatprep.subr.bf16.mxu0 %v980_v17  ;;  %565 = vmatprep.subr.bf16.mxu1 %v982_v18 }
  0x28   :  { %446 = vmatprep.mubr.bf16.mxu0 %v1065_v3  ;;  %499 = vmatprep.mubr.bf16.mxu1 %v1065_v3 }
  0x2a   :  { %513 = vmatpush1.bf16.msra.mxu0 %v979_v23  ;;  %566 = vmatpush1.bf16.msra.mxu1 %v981_v26 }
  0x2b   :  { %514 = vmatprep.subr.bf16.mxu0 %v988_v27  ;;  %567 = vmatprep.subr.bf16.mxu1 %v990_v28 }
  0x2d   :  { %447 = vmatmul.mubr.bf16.gmra.mrb[4].mxu0 %v1245_v31  ;;  %500 = vmatmul.mubr.bf16.gmra.mrb[4].mxu1 %v1245_v31 }
  0x2e   :  { %515 = vmatpush1.bf16.msra.mxu0 %v987_v34  ;;  %568 = vmatpush1.bf16.msra.mxu1 %v989_v35 }
  0x2f   :  { %516 = vmatprep.subr.bf16.mxu0 %v996_v36  ;;  %569 = vmatprep.subr.bf16.mxu1 %v998_v37 }
  0x30   :  { %542 = vmatprep.mubr.bf16.mxu0 %v1065_v3  ;;  %595 = vmatprep.mubr.bf16.mxu1 %v1065_v3 }
  0x32   :  { %517 = vmatpush1.bf16.msra.mxu0 %v995_v42  ;;  %570 = vmatpush1.bf16.msra.mxu1 %v997_v43  ;;  %v1323_v42 = vunpack.c.l.s4 %v1066_v41  ;;  %v926_v43 = vlaneseq }
  0x33   :  { %518 = vmatprep.subr.bf16.mxu0 %v1004_v44  ;;  %571 = vmatprep.subr.bf16.mxu1 %v1006_v45 }
  0x36   :  { %519 = vmatpush1.bf16.msra.mxu0 %v1003_v50  ;;  %572 = vmatpush1.bf16.msra.mxu1 %v1005_v51 }
  0x37   :  { %520 = vmatprep.subr.bf16.mxu0 %v1012_v52  ;;  %573 = vmatprep.subr.bf16.mxu1 %v1014_v53 }
  0x3a   :  { %521 = vmatpush1.bf16.msra.mxu0 %v1011_v58  ;;  %574 = vmatpush1.bf16.msra.mxu1 %v1013_v59 }
  0x3b   :  { %522 = vmatprep.subr.bf16.mxu0 %v1020_v60  ;;  %575 = vmatprep.subr.bf16.mxu1 %v1022_v61 }
  0x3e   :  { %523 = vmatpush1.bf16.msra.mxu0 %v1019_v2  ;;  %576 = vmatpush1.bf16.msra.mxu1 %v1021_v4 }
  0x3f   :  { %524 = vmatprep.subr.bf16.mxu0 %v1028_v5  ;;  %577 = vmatprep.subr.bf16.mxu1 %v1030_v6 }
  0x42   :  { %525 = vmatpush1.bf16.msra.mxu0 %v1027_v7  ;;  %578 = vmatpush1.bf16.msra.mxu1 %v1029_v8 }
  0x45   :  { %543 = vmatmul.mubr.bf16.vlgmr.msra.gmra.mrb[8].mxu0 %v1209_v12  ;;  %596 = vmatmul.mubr.bf16.vlgmr.msra.gmra.mrb[8].mxu1 %v1209_v12 }
  0x46   :  { %552 = vmatprep.mubr.bf16.mxu0 %v1065_v3  ;;  %605 = vmatprep.mubr.bf16.mxu1 %v1065_v3 }
  0x4d   :  { %553 = vmatmul.mubr.bf16.gmra.mrb[12].mxu0 %v1245_v31  ;;  %606 = vmatmul.mubr.bf16.gmra.mrb[12].mxu1 %v1245_v31 }
  0xf8   :  { %v438_v9 = vpop.f32.mrb[0].mxu0  ;;  %v491_v11 = vpop.f32.mrb[0].mxu1 }
  0xf9   :  { %v800_v10 = vmul.f32 %v438_v9, %v438_v9  ;;  %v440_v13 = vpop.f32.mrb[1].mxu0  ;;  %v802_v14 = vmul.f32 %v491_v11, %v491_v11  ;;  %v493_v16 = vpop.f32.mrb[1].mxu1 }
  0xfa   :  { %v1047_v15 = vpack.c.bf16 %v440_v13, %v438_v9  ;;  %v442_v17 = vpop.f32.mrb[2].mxu0  ;;  %v801_v18 = vmul.f32 %v440_v13, %v440_v13  ;;  %v1048_v19 = vpack.c.bf16 %v493_v16, %v491_v11  ;;  %v495_v21 = vpop.f32.mrb[2].mxu1  ;;  %v803_v31 = vmul.f32 %v493_v16, %v493_v16 }
  0xfb   :  { %v728_v20 = vadd.f32 %v442_v17, %v438_v9  ;;  %v808_v12 = vmul.f32 %v442_v17, %v442_v17  ;;  %v444_v22 = vpop.f32.mrb[3].mxu0  ;;  %v746_v3 = vadd.f32 %v495_v21, %v491_v11  ;;  %v810_v23 = vmul.f32 %v495_v21, %v495_v21  ;;  %v497_v26 = vpop.f32.mrb[3].mxu1 }
  0xfc   :  { %712 = vst [vmem:[%s1385_s2] sm:$0xff] %v1047_v15  ;;  %v1051_v24 = vpack.c.bf16 %v444_v22, %v442_v17  ;;  %v737_v25 = vadd.f32 %v444_v22, %v440_v13  ;;  %713 = vst [vmem:[%s1385_s2 + $0x8] sm:$0xff] %v1048_v19  ;;  %v809_v28 = vmul.f32 %v444_v22, %v444_v22 }
  0xfd   :  { %v832_v27 = vadd.f32 %v808_v12, %v800_v10  ;;  %v1052_v29 = vpack.c.bf16 %v497_v26, %v495_v21  ;;  %v755_v30 = vadd.f32 %v497_v26, %v493_v16  ;;  %v850_v32 = vadd.f32 %v810_v23, %v802_v14 }
  0xfe   :  { %716 = vst [vmem:[%s1385_s2 + $0x20] sm:$0xff] %v1051_v24  ;;  %v811_v33 = vmul.f32 %v497_v26, %v497_v26  ;;  %v841_v34 = vadd.f32 %v809_v28, %v801_v18 }
  0xff   :  { %717 = vst [vmem:[%s1385_s2 + $0x28] sm:$0xff] %v1052_v29 }
 0x100   :  { %v859_v35 = vadd.f32 %v811_v33, %v803_v31  ;;  %v448_v36 = vpop.f32.mrb[4].mxu0  ;;  %v501_v39 = vpop.f32.mrb[4].mxu1 }
 0x101   :  { %v729_v37 = vadd.f32 %v728_v20, %v448_v36  ;;  %v816_v38 = vmul.f32 %v448_v36, %v448_v36  ;;  %v450_v40 = vpop.f32.mrb[5].mxu0  ;;  %v747_v44 = vadd.f32 %v746_v3, %v501_v39  ;;  %v818_v45 = vmul.f32 %v501_v39, %v501_v39  ;;  %v503_v48 = vpop.f32.mrb[5].mxu1 }
 0x102   :  { %v1055_v46 = vpack.c.bf16 %v450_v40, %v448_v36  ;;  %v738_v47 = vadd.f32 %v737_v25, %v450_v40  ;;  %v452_v49 = vpop.f32.mrb[6].mxu0  ;;  %v817_v51 = vmul.f32 %v450_v40, %v450_v40  ;;  %v1056_v52 = vpack.c.bf16 %v503_v48, %v501_v39  ;;  %v505_v54 = vpop.f32.mrb[6].mxu1 }
 0x103   :  { %v833_v50 = vadd.f32 %v832_v27, %v816_v38  ;;  %v756_v53 = vadd.f32 %v755_v30, %v503_v48  ;;  %v454_v55 = vpop.f32.mrb[7].mxu0  ;;  %v851_v56 = vadd.f32 %v850_v32, %v818_v45  ;;  %v819_v57 = vmul.f32 %v503_v48, %v503_v48  ;;  %v507_v60 = vpop.f32.mrb[7].mxu1 }
 0x104   :  { %720 = vst [vmem:[%s1385_s2 + $0x40] sm:$0xff] %v1055_v46  ;;  %v730_v58 = vadd.f32 %v729_v37, %v452_v49  ;;  %v824_v59 = vmul.f32 %v452_v49, %v452_v49  ;;  %v842_v61 = vadd.f32 %v841_v34, %v817_v51  ;;  %721 = vst [vmem:[%s1385_s2 + $0x48] sm:$0xff] %v1056_v52 }
 0x105   :  { %v748_v62 = vadd.f32 %v747_v44, %v505_v54  ;;  %v826_v63 = vmul.f32 %v505_v54, %v505_v54  ;;  %v1059_v0 = vpack.c.bf16 %v454_v55, %v452_v49  ;;  %v860_v1 = vadd.f32 %v859_v35, %v819_v57 }
 0x106   :  { %v731_v2 = vrot.slane %v730_v58, 4  ;;  %v834_v4 = vadd.f32 %v833_v50, %v824_v59  ;;  %v739_v5 = vadd.f32 %v738_v47, %v454_v55  ;;  %v825_v8 = vmul.f32 %v454_v55, %v454_v55 }
 0x107   :  { %v749_v6 = vrot.slane %v748_v62, 4  ;;  %v852_v7 = vadd.f32 %v851_v56, %v826_v63  ;;  %724 = vst [vmem:[%s1385_s2 + $0x60] sm:$0xff] %v1059_v0  ;;  %v1060_v9 = vpack.c.bf16 %v507_v60, %v505_v54  ;;  %v757_v14 = vadd.f32 %v756_v53, %v507_v60 }
 0x108   :  { %v732_v10 = vadd.f32 %v731_v2, %v730_v58  ;;  %v835_v11 = vrot.slane %v834_v4, 4  ;;  %v740_v13 = vrot.slane %v739_v5, 4  ;;  %v843_v17 = vadd.f32 %v842_v61, %v825_v8 }
 0x109   :  { %v750_v15 = vadd.f32 %v749_v6, %v748_v62  ;;  %v853_v16 = vrot.slane %v852_v7, 4  ;;  %725 = vst [vmem:[%s1385_s2 + $0x68] sm:$0xff] %v1060_v9  ;;  %v827_v18 = vmul.f32 %v507_v60, %v507_v60  ;;  %v758_v21 = vrot.slane %v757_v14, 4 }
 0x10a   :  { %v733_v19 = vrot.slane %v732_v10, 2  ;;  %v836_v20 = vadd.f32 %v835_v11, %v834_v4  ;;  %v741_v12 = vadd.f32 %v740_v13, %v739_v5  ;;  %v844_v23 = vrot.slane %v843_v17, 4 }
 0x10b   :  { %v751_v22 = vrot.slane %v750_v15, 2  ;;  %v854_v3 = vadd.f32 %v853_v16, %v852_v7  ;;  %v861_v24 = vadd.f32 %v860_v1, %v827_v18  ;;  %v759_v28 = vadd.f32 %v758_v21, %v757_v14 }
 0x10c   :  { %v734_v25 = vadd.f32 %v733_v19, %v732_v10  ;;  %v837_v26 = vrot.slane %v836_v20, 2  ;;  %v742_v27 = vrot.slane %v741_v12, 2  ;;  %v845_v31 = vadd.f32 %v844_v23, %v843_v17 }
 0x10d   :  { %v752_v29 = vadd.f32 %v751_v22, %v750_v15  ;;  %v855_v30 = vrot.slane %v854_v3, 2  ;;  %v862_v32 = vrot.slane %v861_v24, 4  ;;  %v760_v36 = vrot.slane %v759_v28, 2 }
 0x10e   :  { %v735_v33 = vrot.slane %v734_v25, 1  ;;  %v838_v34 = vadd.f32 %v837_v26, %v836_v20  ;;  %v743_v35 = vadd.f32 %v742_v27, %v741_v12  ;;  %v846_v39 = vrot.slane %v845_v31, 2 }
 0x10f   :  { %v753_v37 = vrot.slane %v752_v29, 1  ;;  %v856_v38 = vadd.f32 %v855_v30, %v854_v3  ;;  %v863_v40 = vadd.f32 %v862_v32, %v861_v24  ;;  %v925_v44 = vunpack.c.0.s8 %v1323_v42 }
 0x110   :  { %v839_v41 = vrot.slane %v838_v34, 1  ;;  %v761_v45 = vadd.f32 %v760_v36, %v759_v28  ;;  %v744_v47 = vrot.slane %v743_v35, 1  ;;  %v847_v48 = vadd.f32 %v846_v39, %v845_v31 }
 0x111   :  { %v857_v46 = vrot.slane %v856_v38, 1  ;;  %v864_v49 = vrot.slane %v863_v40, 2  ;;  %v736_v50 = vadd.f32 %v735_v33, %v734_v25  ;;  %v754_v52 = vadd.f32 %v753_v37, %v752_v29 }
 0x112   :  { %v840_v51 = vadd.f32 %v839_v41, %v838_v34  ;;  %v927_v53 = vshrl.u32 %v926_v43, 7  ;;  %v848_v55 = vrot.slane %v847_v48, 1  ;;  %v762_v56 = vrot.slane %v761_v45, 1 }
 0x113   :  { %v858_v54 = vadd.f32 %v857_v46, %v856_v38  ;;  %v865_v57 = vadd.f32 %v864_v49, %v863_v40  ;;  %v745_v60 = vadd.f32 %v744_v47, %v743_v35 }
 0x114   :  { %v905_v58 = vsel %vm904_vm0, %v736_v50, %v840_v51  ;;  %v849_v42 = vadd.f32 %v848_v55, %v847_v48  ;;  %v1341_v62 = vsub.s32 %v925_v44, %v927_v53  ;;  %v763_v0 = vadd.f32 %v762_v56, %v761_v45 }
 0x115   :  { %v907_v59 = vsel %vm904_vm0, %v754_v52, %v858_v54  ;;  %v866_v61 = vrot.slane %v865_v57, 1 }
 0x116   :  { %v906_v63 = vsel %vm904_vm0, %v745_v60, %v849_v42 }
 0x117   :  { %v867_v1 = vadd.f32 %v866_v61, %v865_v57  ;;  %v921_v2 = vcombine.low %v905_v58, %v906_v63 }
 0x118   :  { %v544_v4 = vpop.f32.mrb[8].mxu0  ;;  %v597_v5 = vpop.f32.mrb[8].mxu1 }
 0x119   :  { %v908_v43 = vsel %vm904_vm0, %v763_v0, %v867_v1  ;;  %v546_v6 = vpop.f32.mrb[9].mxu0  ;;  %v929_v7 = vrot.slane %v921_v2, %v1341_v62  ;;  %v804_v9 = vmul.f32 %v544_v4, %v544_v4  ;;  %v599_v11 = vpop.f32.mrb[9].mxu1  ;;  %v806_v14 = vmul.f32 %v597_v5, %v597_v5 }
 0x11a   :  { %v922_v8 = vcombine.low %v907_v59, %v908_v43  ;;  %v1049_v10 = vpack.c.bf16 %v546_v6, %v544_v4  ;;  %v548_v13 = vpop.f32.mrb[10].mxu0  ;;  %v805_v15 = vmul.f32 %v546_v6, %v546_v6  ;;  %v1050_v16 = vpack.c.bf16 %v599_v11, %v597_v5  ;;  %v601_v18 = vpop.f32.mrb[10].mxu1 }
 0x11b   :  { %v764_v17 = vadd.f32 %v548_v13, %v544_v4  ;;  %v550_v19 = vpop.f32.mrb[11].mxu0  ;;  %v812_v12 = vmul.f32 %v548_v13, %v548_v13  ;;  %v782_v21 = vadd.f32 %v601_v18, %v597_v5  ;;  %v814_v22 = vmul.f32 %v601_v18, %v601_v18  ;;  %v603_v3 = vpop.f32.mrb[11].mxu1 }
 0x11c   :  { %v936_v20 = vrot.slane %v922_v8, %v1341_v62  ;;  %714 = vst [vmem:[%s1385_s2 + $0x10] sm:$0xff] %v1049_v10  ;;  %715 = vst [vmem:[%s1385_s2 + $0x18] sm:$0xff] %v1050_v16  ;;  %v1053_v23 = vpack.c.bf16 %v550_v19, %v548_v13  ;;  %v773_v24 = vadd.f32 %v550_v19, %v546_v6 }
 0x11d   :  { %v813_v25 = vmul.f32 %v550_v19, %v550_v19  ;;  %v1054_v26 = vpack.c.bf16 %v603_v3, %v601_v18  ;;  %v868_v28 = vadd.f32 %v812_v12, %v804_v9  ;;  %v886_v29 = vadd.f32 %v814_v22, %v806_v14 }
 0x11e   :  { %v937_v27 = vcombine.low %v929_v7, %v936_v20  ;;  %v791_v30 = vadd.f32 %v603_v3, %v599_v11  ;;  %v807_v31 = vmul.f32 %v599_v11, %v599_v11  ;;  %718 = vst [vmem:[%s1385_s2 + $0x30] sm:$0xff] %v1053_v23  ;;  %v815_v33 = vmul.f32 %v603_v3, %v603_v3 }
 0x11f   :  { %v877_v32 = vadd.f32 %v813_v25, %v805_v15  ;;  %719 = vst [vmem:[%s1385_s2 + $0x38] sm:$0xff] %v1054_v26 }
 0x120   :  { %v554_v34 = vpop.f32.mrb[12].mxu0  ;;  %957 = vst [vmem:[%s1386_s3] sm:$0xff] %v937_v27  ;;  %v895_v35 = vadd.f32 %v815_v33, %v807_v31  ;;  %v607_v38 = vpop.f32.mrb[12].mxu1 }
 0x121   :  { %v765_v36 = vadd.f32 %v764_v17, %v554_v34  ;;  %v820_v37 = vmul.f32 %v554_v34, %v554_v34  ;;  %v556_v39 = vpop.f32.mrb[13].mxu0  ;;  %v783_v40 = vadd.f32 %v782_v21, %v607_v38  ;;  %v822_v41 = vmul.f32 %v607_v38, %v607_v38  ;;  %v609_v46 = vpop.f32.mrb[13].mxu1 }
 0x122   :  { %v1057_v44 = vpack.c.bf16 %v556_v39, %v554_v34  ;;  %v774_v45 = vadd.f32 %v773_v24, %v556_v39  ;;  %v558_v47 = vpop.f32.mrb[14].mxu0  ;;  %v821_v49 = vmul.f32 %v556_v39, %v556_v39  ;;  %v1058_v50 = vpack.c.bf16 %v609_v46, %v607_v38  ;;  %v611_v52 = vpop.f32.mrb[14].mxu1 }
 0x123   :  { %v869_v48 = vadd.f32 %v868_v28, %v820_v37  ;;  %v792_v51 = vadd.f32 %v791_v30, %v609_v46  ;;  %v560_v53 = vpop.f32.mrb[15].mxu0  ;;  %v887_v54 = vadd.f32 %v886_v29, %v822_v41  ;;  %v823_v55 = vmul.f32 %v609_v46, %v609_v46  ;;  %v613_v58 = vpop.f32.mrb[15].mxu1 }
 0x124   :  { %722 = vst [vmem:[%s1385_s2 + $0x50] sm:$0xff] %v1057_v44  ;;  %v766_v56 = vadd.f32 %v765_v36, %v558_v47  ;;  %v828_v57 = vmul.f32 %v558_v47, %v558_v47  ;;  %v878_v59 = vadd.f32 %v877_v32, %v821_v49  ;;  %723 = vst [vmem:[%s1385_s2 + $0x58] sm:$0xff] %v1058_v50 }
 0x125   :  { %v784_v60 = vadd.f32 %v783_v40, %v611_v52  ;;  %v830_v42 = vmul.f32 %v611_v52, %v611_v52  ;;  %v1061_v61 = vpack.c.bf16 %v560_v53, %v558_v47  ;;  %v896_v63 = vadd.f32 %v895_v35, %v823_v55 }
 0x126   :  { %v767_v0 = vrot.slane %v766_v56, 4  ;;  %v870_v1 = vadd.f32 %v869_v48, %v828_v57  ;;  %v775_v2 = vadd.f32 %v774_v45, %v560_v53  ;;  %v829_v5 = vmul.f32 %v560_v53, %v560_v53 }
 0x127   :  { %v785_v4 = vrot.slane %v784_v60, 4  ;;  %v888_v43 = vadd.f32 %v887_v54, %v830_v42  ;;  %726 = vst [vmem:[%s1385_s2 + $0x70] sm:$0xff] %v1061_v61  ;;  %v1062_v6 = vpack.c.bf16 %v613_v58, %v611_v52  ;;  %v793_v10 = vadd.f32 %v792_v51, %v613_v58 }
 0x128   :  { %v768_v7 = vadd.f32 %v767_v0, %v766_v56  ;;  %v871_v8 = vrot.slane %v870_v1, 4  ;;  %v776_v9 = vrot.slane %v775_v2, 4  ;;  %v879_v14 = vadd.f32 %v878_v59, %v829_v5 }
 0x129   :  { %v786_v11 = vadd.f32 %v785_v4, %v784_v60  ;;  %v889_v13 = vrot.slane %v888_v43, 4  ;;  %727 = vst [vmem:[%s1385_s2 + $0x78] sm:$0xff] %v1062_v6  ;;  %v831_v15 = vmul.f32 %v613_v58, %v613_v58  ;;  %v794_v19 = vrot.slane %v793_v10, 4 }
 0x12a   :  { %v769_v16 = vrot.slane %v768_v7, 2  ;;  %v872_v17 = vadd.f32 %v871_v8, %v870_v1  ;;  %v777_v18 = vadd.f32 %v776_v9, %v775_v2  ;;  %v880_v21 = vrot.slane %v879_v14, 4 }
 0x12b   :  { %v787_v20 = vrot.slane %v786_v11, 2  ;;  %v890_v12 = vadd.f32 %v889_v13, %v888_v43  ;;  %v897_v22 = vadd.f32 %v896_v63, %v831_v15  ;;  %v795_v25 = vadd.f32 %v794_v19, %v793_v10 }
 0x12c   :  { %v770_v3 = vadd.f32 %v769_v16, %v768_v7  ;;  %v873_v23 = vrot.slane %v872_v17, 2  ;;  %v778_v24 = vrot.slane %v777_v18, 2  ;;  %v881_v28 = vadd.f32 %v880_v21, %v879_v14 }
 0x12d   :  { %v788_v26 = vadd.f32 %v787_v20, %v786_v11  ;;  %v891_v27 = vrot.slane %v890_v12, 2  ;;  %v898_v29 = vrot.slane %v897_v22, 4  ;;  %v796_v33 = vrot.slane %v795_v25, 2 }
 0x12e   :  { %v771_v30 = vrot.slane %v770_v3, 1  ;;  %v874_v31 = vadd.f32 %v873_v23, %v872_v17  ;;  %v779_v32 = vadd.f32 %v778_v24, %v777_v18  ;;  %v882_v36 = vrot.slane %v881_v28, 2 }
 0x12f   :  { %v789_v34 = vrot.slane %v788_v26, 1  ;;  %v892_v35 = vadd.f32 %v891_v27, %v890_v12  ;;  %v899_v37 = vadd.f32 %v898_v29, %v897_v22  ;;  %v797_v39 = vadd.f32 %v796_v33, %v795_v25 }
 0x130   :  { %v875_v38 = vrot.slane %v874_v31, 1  ;;  %v780_v41 = vrot.slane %v779_v32, 1  ;;  %v883_v44 = vadd.f32 %v882_v36, %v881_v28  ;;  %v772_v46 = vadd.f32 %v771_v30, %v770_v3 }
 0x131   :  { %v893_v40 = vrot.slane %v892_v35, 1  ;;  %v900_v45 = vrot.slane %v899_v37, 2  ;;  %v790_v48 = vadd.f32 %v789_v34, %v788_v26  ;;  %v798_v51 = vrot.slane %v797_v39, 1 }
 0x132   :  { %v876_v47 = vadd.f32 %v875_v38, %v874_v31  ;;  %v884_v50 = vrot.slane %v883_v44, 1  ;;  %v781_v55 = vadd.f32 %v780_v41, %v779_v32 }
 0x133   :  { %v894_v49 = vadd.f32 %v893_v40, %v892_v35  ;;  %v901_v52 = vadd.f32 %v900_v45, %v899_v37  ;;  %v799_v59 = vadd.f32 %v798_v51, %v797_v39 }
 0x134   :  { %v909_v53 = vsel %vm904_vm0, %v772_v46, %v876_v47  ;;  %v885_v56 = vadd.f32 %v884_v50, %v883_v44 }
 0x135   :  { %v911_v54 = vsel %vm904_vm0, %v790_v48, %v894_v49  ;;  %v902_v57 = vrot.slane %v901_v52, 1 }
 0x136   :  { %v910_v58 = vsel %vm904_vm0, %v781_v55, %v885_v56 }
 0x137   :  { %v903_v60 = vadd.f32 %v902_v57, %v901_v52  ;;  %v938_v42 = vcombine.low %v909_v53, %v910_v58 }
 0x139   :  { %v912_v61 = vsel %vm904_vm0, %v799_v59, %v903_v60  ;;  %v946_v63 = vrot.slane %v938_v42, %v1341_v62 }
 0x13a   :  { %v939_v0 = vcombine.low %v911_v54, %v912_v61 }
 0x13c   :  { %v953_v1 = vrot.slane %v939_v0, %v1341_v62 }
 0x13e   :  { %v954_v2 = vcombine.low %v946_v63, %v953_v1 }
 0x140   :  { %958 = vst [vmem:[%s1386_s3 + $0x8] sm:$0xff] %v954_v2 }

// kernel: res_layer.5
= control target key start
LH: loop header
LB: loop body
LE: loop exit
PB: predicated region body
PF: predicated region fallthrough
CT: control target
= control target key end

     0   :  { %s3567_s18 = smov 0   ;;  %s5078_s0 = inlined_call_operand.vmem [shape: bf16[2,16,16,64], index: 0, kind: input, shape index: {}]   ;;  %s5079_s1 = inlined_call_operand.vmem [shape: bf16[576,64], index: 1, kind: input, shape index: {}]   ;;  %s5080_s2 = inlined_call_operand.vmem [shape: f32[1,64], index: 2, kind: input, shape index: {}]   ;;  %s5081_s3 = inlined_call_operand.vmem [shape: f32[1,64], index: 3, kind: input, shape index: {}]   ;;  %s5082_s4 = inlined_call_operand.vmem [shape: bf16[512,64], index: 4, kind: output, shape index: {0}]   ;;  %s5083_s5 = inlined_call_operand.vmem [shape: f32[2,2,64], index: 5, kind: output, shape index: {1}]  }
   0x1 LB: > { %s3573_s19 = sadd.s32 4294967295, %s3533_s18   ;;  %p2691_p0 = scmp.ge.s32.totalorder %s3533_s18, 1  ;;  %s3533_s18 = sphi %s3567_s18, %s16_s18  }
   0x2   : > { %p190_p1 = scmp.lt.s32.totalorder %s3533_s18, 3 }
   0x4   : > { %p191_p2 = pnand %p2691_p0, %p190_p1 }
   0x6   : > { %194 = sbr.rel (%p191_p2) target bundleno = 583 (0x247), region = 36 }
   0xd   : > { %p222_p3 = scmp.lt.s32.totalorder %s3573_s19, 1  ;;  %vm476_vm0 = vcmask 523264   ;;  %vm480_vm1 = vcmask 516096   ;;  %v3581_v0 = vld [vmem:[%s5079_s1 + $0x40] sm:$0xff]   ;;  %v3535_v1 = vmov 0.0   ;;  %v3459_v4 = vld [vmem:[%s5079_s1 + $0x48] sm:$0xff]  }
   0xe   : > { %482 = vst.msk [vmem:[#allocation2 + $0x20] sm:$0xff] %vm476_vm0, %v3535_v1  ;;  %483 = vst.msk [vmem:[#allocation2 + $0x28] sm:$0xff] %vm476_vm0, %v3535_v1  ;;  %v3458_v2 = vld [vmem:[%s5079_s1] sm:$0xff]   ;;  %2897 = vmatprep.subr.bf16.mxu0 %v3581_v0  ;;  %3181 = vmatprep.subr.bf16.mxu1 %v3581_v0  ;;  %v3460_v5 = vld [vmem:[%s5079_s1 + $0x8] sm:$0xff]   ;;  %s3536_s12 = smov 64   ;;  %vm703_vm7 = vcmask 1040384  }
   0xf   : > { %s3584_s22 = scalar_select %p222_p3, %s3573_s19, 1  ;;  %484 = vst.msk [vmem:[#allocation2 + $0x30] sm:$0xff] %vm476_vm0, %v3535_v1  ;;  %477 = vst.msk [vmem:[#allocation2] sm:$0xff] %vm476_vm0, %v3535_v1  ;;  %v3739_v3 = vld [vmem:[%s5080_s2] ss:$0 sm:$0xff]  ;;  %2898 = vmatpush3.bf16.msra.mxu0 %v3458_v2  ;;  %3189 = vmatpush3.bf16.msra.mxu1 %v3458_v2 }
  0x10   : > { %478 = vst.msk [vmem:[#allocation2 + $0x8] sm:$0xff] %vm476_vm0, %v3535_v1  ;;  %479 = vst.msk [vmem:[#allocation2 + $0x10] sm:$0xff] %vm476_vm0, %v3535_v1  ;;  %2899 = vmatprep.subr.bf16.mxu0 %v3459_v4  ;;  %3182 = vmatprep.subr.bf16.mxu1 %v3459_v4  ;;  %v3758_v13 = vld [vmem:[%s5081_s3] ss:$0 sm:$0xff]  ;;  %s2694_s17 = sshll.u32 %s3573_s19, 5 }
  0x11   : > { %486 = vst.msk [vmem:[#allocation2 + $0x40] sm:$0xff] %vm476_vm0, %v3535_v1  ;;  %487 = vst.msk [vmem:[#allocation2 + $0x48] sm:$0xff] %vm476_vm0, %v3535_v1  ;;  %s2785_s25 = sshll.u32 %s3584_s22, 7  ;;  %p228_p4 = scmp.lt.s32.totalorder %s2694_s17, 63 }
  0x12   : > { %488 = vst.msk [vmem:[#allocation2 + $0x50] sm:$0xff] %vm476_vm0, %v3535_v1  ;;  %490 = vst.msk [vmem:[#allocation2 + $0x60] sm:$0xff] %vm476_vm0, %v3535_v1  ;;  %s3747_s7 = scalar_lea.vmem %s5078_s0, %s2785_s25 }
  0x13   : > { %491 = vst.msk [vmem:[#allocation2 + $0x68] sm:$0xff] %vm476_vm0, %v3535_v1  ;;  %492 = vst.msk [vmem:[#allocation2 + $0x70] sm:$0xff] %vm476_vm0, %v3535_v1  ;;  %v2819_v6 = vld [vmem:[%s3747_s7] sm:$0xff]   ;;  %v2892_v8 = vld [vmem:[%s3747_s7 + $0x58] sm:$0xff]   ;;  %2900 = vmatpush3.bf16.msra.mxu0 %v3460_v5  ;;  %3190 = vmatpush3.bf16.msra.mxu1 %v3460_v5  ;;  %s5175_s17 = smov (!%p228_p4, %s2694_s17), 63 }
  0x14   : > { %494 = vst.msk [vmem:[#allocation2 + $0x80] sm:$0xff] %vm476_vm0, %v3535_v1  ;;  %495 = vst.msk [vmem:[#allocation2 + $0x88] sm:$0xff] %vm476_vm0, %v3535_v1  ;;  %v2893_v7 = vld [vmem:[%s3747_s7 + $0x60] sm:$0xff]   ;;  %v2820_v9 = vunpack.c.l.bf16 %v2819_v6  ;;  %v2821_v10 = vunpack.c.h.bf16 %v2819_v6  ;;  %v2864_v14 = vunpack.c.l.bf16 %v2892_v8  ;;  %v2882_v15 = vld [vmem:[%s3747_s7 + $0x8] sm:$0xff]   ;;  %v2865_v25 = vunpack.c.h.bf16 %v2892_v8  ;;  %s2695_s19 = sshll.u32 %s5175_s17, 2 }
  0x15   : > { %496 = vst.msk [vmem:[#allocation2 + $0x90] sm:$0xff] %vm476_vm0, %v3535_v1  ;;  %498 = vst.msk [vmem:[#allocation2 + $0xa0] sm:$0xff] %vm476_vm0, %v3535_v1  ;;  %v2868_v11 = vunpack.c.l.bf16 %v2893_v7  ;;  %v2869_v12 = vunpack.c.h.bf16 %v2893_v7  ;;  %v2824_v26 = vunpack.c.l.bf16 %v2882_v15  ;;  %v2825_v30 = vunpack.c.h.bf16 %v2882_v15  ;;  %v2894_v39 = vld [vmem:[%s3747_s7 + $0x68] sm:$0xff]   ;;  %v2883_v50 = vld [vmem:[%s3747_s7 + $0x10] sm:$0xff]   ;;  %s4888_s23 = scalar_lea.vmem %s5082_s4, %s2695_s19 }
  0x16   : > { %499 = vst.msk [vmem:[#allocation2 + $0xa8] sm:$0xff] %vm476_vm0, %v3535_v1  ;;  %500 = vst.msk [vmem:[#allocation2 + $0xb0] sm:$0xff] %vm476_vm0, %v3535_v1  ;;  %v309_v16 = vmul.f32 %v2820_v9, %v3739_v3  ;;  %v310_v17 = vmul.f32 %v2821_v10, %v3739_v3  ;;  %v331_v29 = vmul.f32 %v2864_v14, %v3739_v3  ;;  %v2872_v48 = vunpack.c.l.bf16 %v2894_v39  ;;  %v587_v51 = vld [vmem:[#allocation2 + $0x20] sm:$0xff]  ;;  %v3788_v61 = vld [vmem:[%s3747_s7 + $0x70] sm:$0xff]  }
  0x17   : > { %502 = vst.msk [vmem:[#allocation2 + $0xc0] sm:$0xff] %vm476_vm0, %v3535_v1  ;;  %503 = vst.msk [vmem:[#allocation2 + $0xc8] sm:$0xff] %vm476_vm0, %v3535_v1  ;;  %v584_v18 = vld [vmem:[#allocation2 + $0x8] sm:$0xff]  ;;  %v585_v19 = vld [vmem:[#allocation2 + $0x10] sm:$0xff]  ;;  %v333_v20 = vmul.f32 %v2868_v11, %v3739_v3  ;;  %v334_v21 = vmul.f32 %v2869_v12, %v3739_v3  ;;  %v332_v37 = vmul.f32 %v2865_v25, %v3739_v3  ;;  %v2873_v49 = vunpack.c.h.bf16 %v2894_v39 }
  0x18   : > { %504 = vst.msk [vmem:[#allocation2 + $0xd0] sm:$0xff] %vm476_vm0, %v3535_v1  ;;  %506 = vst.msk [vmem:[#allocation2 + $0xe0] sm:$0xff] %vm476_vm0, %v3535_v1  ;;  %v3217_v22 = vpack.i.bf16 %v585_v19, %v584_v18  ;;  %v348_v23 = vadd.f32 %v3758_v13, %v309_v16  ;;  %v349_v24 = vadd.f32 %v3758_v13, %v310_v17  ;;  %v2828_v60 = vunpack.c.l.bf16 %v2883_v50  ;;  %v591_v18 = vld [vmem:[#allocation2 + $0x40] sm:$0xff]  ;;  %v3811_v19 = vld [vmem:[%s3747_s7 + $0x18] sm:$0xff]  }
  0x19   : > { %507 = vst.msk [vmem:[#allocation2 + $0xe8] sm:$0xff] %vm476_vm0, %v3535_v1  ;;  %508 = vst.msk [vmem:[#allocation2 + $0xf0] sm:$0xff] %vm476_vm0, %v3535_v1  ;;  %v372_v27 = vadd.f32 %v3758_v13, %v333_v20  ;;  %v373_v28 = vadd.f32 %v3758_v13, %v334_v21  ;;  %v370_v38 = vadd.f32 %v3758_v13, %v331_v29  ;;  %v709_v62 = vrot.slane %v587_v51, 7  ;;  %v3461_v29 = vld [vmem:[%s5079_s1 + $0x50] sm:$0xff]   ;;  %v3465_v51 = vld [vmem:[%s5079_s1 + $0x60] sm:$0xff]  }
  0x1a   : > { %510 = vst.msk [vmem:[#allocation2 + $0x100] sm:$0xff] %vm476_vm0, %v3535_v1  ;;  %511 = vst.msk [vmem:[#allocation2 + $0x108] sm:$0xff] %vm476_vm0, %v3535_v1  ;;  %3218 = vrot.lane.b32.xlu1 %v3217_v22, %s3536_s12  ;;  %vm380_vm2 = vcmp.ge.f32.partialorder %v348_v23, 0.0  ;;  %vm381_vm3 = vcmp.ge.f32.partialorder %v349_v24, 0.0  ;;  %v412_v31 = vmul.f32 0.01, %v348_v23  ;;  %v311_v42 = vmul.f32 %v2824_v26, %v3739_v3  ;;  %2901 = vmatprep.subr.bf16.mxu0 %v3461_v29 }
  0x1b   : > { %512 = vst.msk [vmem:[#allocation2 + $0x110] sm:$0xff] %vm476_vm0, %v3535_v1  ;;  %514 = vst.msk [vmem:[#allocation2 + $0x120] sm:$0xff] %vm476_vm0, %v3535_v1  ;;  %v413_v32 = vmul.f32 0.01, %v349_v24  ;;  %vm404_vm4 = vcmp.ge.f32.partialorder %v372_v27, 0.0  ;;  %vm405_vm5 = vcmp.ge.f32.partialorder %v373_v28, 0.0  ;;  %v312_v43 = vmul.f32 %v2825_v30, %v3739_v3  ;;  %3183 = vmatprep.subr.bf16.mxu1 %v3461_v29 }
  0x1c   : > { %515 = vst.msk [vmem:[#allocation2 + $0x128] sm:$0xff] %vm476_vm0, %v3535_v1  ;;  %516 = vst.msk [vmem:[#allocation2 + $0x130] sm:$0xff] %vm476_vm0, %v3535_v1  ;;  %v436_v33 = vmul.f32 0.01, %v372_v27  ;;  %v437_v34 = vmul.f32 0.01, %v373_v28  ;;  %v444_v35 = vsel %vm380_vm2, %v348_v23, %v412_v31  ;;  %v371_v44 = vadd.f32 %v3758_v13, %v332_v37 }
  0x1d   : > { %518 = vst.msk [vmem:[#allocation2 + $0x140] sm:$0xff] %vm476_vm0, %v3535_v1  ;;  %519 = vst.msk [vmem:[#allocation2 + $0x148] sm:$0xff] %vm476_vm0, %v3535_v1  ;;  %v445_v36 = vsel %vm381_vm3, %v349_v24, %v413_v32  ;;  %vm402_vm6 = vcmp.ge.f32.partialorder %v370_v38, 0.0  ;;  %v434_v45 = vmul.f32 0.01, %v370_v38  ;;  %v350_v46 = vadd.f32 %v3758_v13, %v311_v42 }
  0x1e   : > { %520 = vst.msk [vmem:[#allocation2 + $0x150] sm:$0xff] %vm476_vm0, %v3535_v1  ;;  %522 = vst.msk [vmem:[#allocation2 + $0x160] sm:$0xff] %vm476_vm0, %v3535_v1  ;;  %v468_v40 = vsel %vm404_vm4, %v372_v27, %v436_v33  ;;  %v469_v41 = vsel %vm405_vm5, %v373_v28, %v437_v34  ;;  %v351_v47 = vadd.f32 %v3758_v13, %v312_v43  ;;  %vm403_vm8 = vcmp.ge.f32.partialorder %v371_v44, 0.0  ;;  %v3462_v34 = vld [vmem:[%s5079_s1 + $0x10] sm:$0xff]  }
  0x1f   : > { %523 = vst.msk [vmem:[#allocation2 + $0x168] sm:$0xff] %vm476_vm0, %v3535_v1  ;;  %524 = vst.msk [vmem:[#allocation2 + $0x170] sm:$0xff] %vm476_vm0, %v3535_v1  ;;  %v435_v53 = vmul.f32 0.01, %v371_v44  ;;  %v466_v54 = vsel %vm402_vm6, %v370_v38, %v434_v45  ;;  %vm382_vm9 = vcmp.ge.f32.partialorder %v350_v46, 0.0  ;;  %v335_v58 = vmul.f32 %v2872_v48, %v3739_v3  ;;  %2902 = vmatpush3.bf16.msra.mxu0 %v3462_v34 }
  0x20   : > { %526 = vst.msk [vmem:[#allocation2 + $0x180] sm:$0xff] %vm476_vm0, %v3535_v1  ;;  %527 = vst.msk [vmem:[#allocation2 + $0x188] sm:$0xff] %vm476_vm0, %v3535_v1  ;;  %vm383_vm10 = vcmp.ge.f32.partialorder %v351_v47, 0.0  ;;  %v414_v55 = vmul.f32 0.01, %v350_v46  ;;  %v336_v59 = vmul.f32 %v2873_v49, %v3739_v3  ;;  %v313_v8 = vmul.f32 %v2828_v60, %v3739_v3  ;;  %3191 = vmatpush3.bf16.msra.mxu1 %v3462_v34 }
  0x21   : > { %528 = vst.msk [vmem:[#allocation2 + $0x190] sm:$0xff] %vm476_vm0, %v3535_v1  ;;  %530 = vst.msk [vmem:[#allocation2 + $0x1a0] sm:$0xff] %vm476_vm0, %v3535_v1  ;;  %v415_v56 = vmul.f32 0.01, %v351_v47  ;;  %v467_v57 = vsel %vm403_vm8, %v371_v44, %v435_v53  ;;  %v374_v6 = vadd.f32 %v3758_v13, %v335_v58  ;;  %v2876_v15 = vunpack.c.l.bf16 %v3788_v61 }
  0x22   : > { %531 = vst.msk [vmem:[#allocation2 + $0x1a8] sm:$0xff] %vm476_vm0, %v3535_v1  ;;  %532 = vst.msk [vmem:[#allocation2 + $0x1b0] sm:$0xff] %vm476_vm0, %v3535_v1  ;;  %v446_v63 = vsel %vm382_vm9, %v350_v46, %v414_v55  ;;  %v375_v7 = vadd.f32 %v3758_v13, %v336_v59  ;;  %v714_v30 = vrot.slane %v591_v18, 7  ;;  %v352_v33 = vadd.f32 %v3758_v13, %v313_v8  ;;  %v2896_v46 = vld [vmem:[%s3747_s7 + $0x78] sm:$0xff]   ;;  %v3467_v8 = vld [vmem:[%s5079_s1 + $0x68] sm:$0xff]  }
  0x23   : > { %534 = vst.msk [vmem:[#allocation2 + $0x1c0] sm:$0xff] %vm476_vm0, %v3535_v1  ;;  %535 = vst.msk [vmem:[#allocation2 + $0x1c8] sm:$0xff] %vm476_vm0, %v3535_v1  ;;  %v447_v0 = vsel %vm383_vm10, %v351_v47, %v415_v56  ;;  %vm406_vm11 = vcmp.ge.f32.partialorder %v374_v6, 0.0  ;;  %v438_v22 = vmul.f32 0.01, %v374_v6  ;;  %v2877_v38 = vunpack.c.h.bf16 %v3788_v61  ;;  %v3464_v47 = vld [vmem:[%s5079_s1 + $0x18] sm:$0xff]  }
  0x24   : > { %536 = vst.msk [vmem:[#allocation2 + $0x1d0] sm:$0xff] %vm476_vm0, %v3535_v1  ;;  %538 = vst.msk [vmem:[#allocation2 + $0x1e0] sm:$0xff] %vm476_vm0, %v3535_v1  ;;  %vm407_vm12 = vcmp.ge.f32.partialorder %v375_v7, 0.0  ;;  %v439_v23 = vmul.f32 0.01, %v375_v7  ;;  %v337_v39 = vmul.f32 %v2876_v15, %v3739_v3  ;;  %vm384_vm13 = vcmp.ge.f32.partialorder %v352_v33, 0.0 }
  0x25   : > { %539 = vst.msk [vmem:[#allocation2 + $0x1e8] sm:$0xff] %vm476_vm0, %v3535_v1  ;;  %540 = vst.msk [vmem:[#allocation2 + $0x1f0] sm:$0xff] %vm476_vm0, %v3535_v1  ;;  %v470_v31 = vsel %vm406_vm11, %v374_v6, %v438_v22  ;;  %v416_v44 = vmul.f32 0.01, %v352_v33  ;;  %v2832_v45 = vunpack.c.l.bf16 %v3811_v19  ;;  %v338_v55 = vmul.f32 %v2877_v38, %v3739_v3 }
  0x26   : > { %542 = vst.msk [vmem:[#allocation2 + $0x200] sm:$0xff] %vm476_vm0, %v3535_v1  ;;  %543 = vst.msk [vmem:[#allocation2 + $0x208] sm:$0xff] %vm476_vm0, %v3535_v1  ;;  %v471_v32 = vsel %vm407_vm12, %v375_v7, %v439_v23  ;;  %v376_v56 = vadd.f32 %v3758_v13, %v337_v39  ;;  %v2833_v60 = vunpack.c.h.bf16 %v3811_v19  ;;  %v2880_v7 = vunpack.c.l.bf16 %v2896_v46  ;;  %v3468_v23 = vld [vmem:[%s5079_s1 + $0x28] sm:$0xff]  }
  0x27   : > { %544 = vst.msk [vmem:[#allocation2 + $0x210] sm:$0xff] %vm476_vm0, %v3535_v1  ;;  %546 = vst.msk [vmem:[#allocation2 + $0x220] sm:$0xff] %vm476_vm0, %v3535_v1  ;;  %v448_v53 = vsel %vm384_vm13, %v352_v33, %v416_v44  ;;  %vm832_vm6 = vcmask 1046528  }
  0x28   : > { %547 = vst.msk [vmem:[#allocation2 + $0x228] sm:$0xff] %vm476_vm0, %v3535_v1  ;;  %548 = vst.msk [vmem:[#allocation2 + $0x230] sm:$0xff] %vm476_vm0, %v3535_v1  ;;  %v635_v52 = vld [vmem:[#allocation2 + $0x1a0] sm:$0xff]  ;;  %vm408_vm15 = vcmp.ge.f32.partialorder %v376_v56, 0.0  ;;  %v316_v6 = vmul.f32 %v2833_v60, %v3739_v3 }
  0x29   : > { %485 = vst.msk [vmem:[#allocation2 + $0x38] sm:$0x1] %vm480_vm1, %v3535_v1  ;;  %481 = vst.msk [vmem:[#allocation2 + $0x18] sm:$0x1] %vm480_vm1, %v3535_v1  ;;  %v769_v5 = vrot.slane %v635_v52, 7 }
  0x2a   : > { %489 = vst.msk [vmem:[#allocation2 + $0x58] sm:$0x1] %vm480_vm1, %v3535_v1  ;;  %493 = vst.msk [vmem:[#allocation2 + $0x78] sm:$0x1] %vm480_vm1, %v3535_v1  ;;  %v3829_v28 = vld [vmem:[#allocation2 + $0x1c0] sm:$0xff]  ;;  %v355_v29 = vadd.f32 %v3758_v13, %v316_v6 }
  0x2b   : > { %497 = vst.msk [vmem:[#allocation2 + $0x98] sm:$0x1] %vm480_vm1, %v3535_v1  ;;  %501 = vst.msk [vmem:[#allocation2 + $0xb8] sm:$0x1] %vm480_vm1, %v3535_v1  ;;  %v774_v52 = vrot.slane %v3829_v28, 7  ;;  %v3910_v28 = vld [vmem:[#allocation2 + $0x1e0] sm:$0xff] }
  0x2c   : > { %505 = vst.msk [vmem:[#allocation2 + $0xd8] sm:$0x1] %vm480_vm1, %v3535_v1  ;;  %509 = vst.msk [vmem:[#allocation2 + $0xf8] sm:$0x1] %vm480_vm1, %v3535_v1  ;;  %vm387_vm3 = vcmp.ge.f32.partialorder %v355_v29, 0.0 }
  0x2d   : > { %513 = vst.msk [vmem:[#allocation2 + $0x118] sm:$0x1] %vm480_vm1, %v3535_v1  ;;  %517 = vst.msk [vmem:[#allocation2 + $0x138] sm:$0x1] %vm480_vm1, %v3535_v1 }
  0x2e   : > { %521 = vst.msk [vmem:[#allocation2 + $0x158] sm:$0x1] %vm480_vm1, %v3535_v1  ;;  %525 = vst.msk [vmem:[#allocation2 + $0x178] sm:$0x1] %vm480_vm1, %v3535_v1 }
  0x2f   : > { %529 = vst.msk [vmem:[#allocation2 + $0x198] sm:$0x1] %vm480_vm1, %v3535_v1  ;;  %533 = vst.msk [vmem:[#allocation2 + $0x1b8] sm:$0x1] %vm480_vm1, %v3535_v1 }
  0x30   : > { %537 = vst.msk [vmem:[#allocation2 + $0x1d8] sm:$0x1] %vm480_vm1, %v3535_v1  ;;  %541 = vst.msk [vmem:[#allocation2 + $0x1f8] sm:$0x1] %vm480_vm1, %v3535_v1 }
  0x31   : > { %545 = vst.msk [vmem:[#allocation2 + $0x218] sm:$0x1] %vm480_vm1, %v3535_v1  ;;  %549 = vst.msk [vmem:[#allocation2 + $0x238] sm:$0x1] %vm480_vm1, %v3535_v1  ;;  %v2829_v1 = vunpack.c.h.bf16 %v2883_v50 }
  0x32   : > { %551 = vst.msk [vmem:[#allocation2 + $0x28] sm:$0xff] %vm476_vm0, %v444_v35  ;;  %552 = vst.msk [vmem:[#allocation2 + $0x30] sm:$0xff] %vm476_vm0, %v445_v36 }
  0x33   : > { %575 = vst.msk [vmem:[#allocation2 + $0x1a8] sm:$0xff] %vm476_vm0, %v468_v40  ;;  %576 = vst.msk [vmem:[#allocation2 + $0x1b0] sm:$0xff] %vm476_vm0, %v469_v41  ;;  %v314_v14 = vmul.f32 %v2829_v1, %v3739_v3  ;;  %v3463_v40 = vld [vmem:[%s5079_s1 + $0x58] sm:$0xff]  }
  0x34   : > { %573 = vst.msk [vmem:[#allocation2 + $0x188] sm:$0xff] %vm476_vm0, %v466_v54  ;;  %574 = vst.msk [vmem:[#allocation2 + $0x190] sm:$0xff] %vm476_vm0, %v467_v57  ;;  %2903 = vmatprep.subr.bf16.mxu0 %v3463_v40  ;;  %v3870_v54 = vld [vmem:[#allocation2 + $0x60] sm:$0xff]  ;;  %3184 = vmatprep.subr.bf16.mxu1 %v3463_v40  ;;  %v419_v40 = vmul.f32 0.01, %v355_v29 }
  0x35   : > { %553 = vst.msk [vmem:[#allocation2 + $0x48] sm:$0xff] %vm476_vm0, %v446_v63  ;;  %554 = vst.msk [vmem:[#allocation2 + $0x50] sm:$0xff] %vm476_vm0, %v447_v0  ;;  %v353_v37 = vadd.f32 %v3758_v13, %v314_v14  ;;  %v440_v63 = vmul.f32 0.01, %v376_v56  ;;  %2904 = vmatpush3.bf16.msra.mxu0 %v3464_v47  ;;  %v3466_v0 = vld [vmem:[%s5079_s1 + $0x20] sm:$0xff]   ;;  %v719_v1 = vrot.slane %v3870_v54, 7  ;;  %3192 = vmatpush3.bf16.msra.mxu1 %v3464_v47 }
  0x36   : > { %577 = vst.msk [vmem:[#allocation2 + $0x1c8] sm:$0xff] %vm476_vm0, %v470_v31  ;;  %578 = vst.msk [vmem:[#allocation2 + $0x1d0] sm:$0xff] %vm476_vm0, %v471_v32  ;;  %2905 = vmatprep.subr.bf16.mxu0 %v3465_v51  ;;  %3185 = vmatprep.subr.bf16.mxu1 %v3465_v51  ;;  %v451_v51 = vsel %vm387_vm3, %v355_v29, %v419_v40  ;;  %v3471_v54 = vld [vmem:[%s5079_s1 + $0x78] sm:$0xff]   ;;  %v3987_v29 = vld [vmem:[%s5079_s1 + $0x100] sm:$0xff]  }
  0x37   : > { %vm385_vm14 = vcmp.ge.f32.partialorder %v353_v37, 0.0  ;;  %v417_v50 = vmul.f32 0.01, %v353_v37  ;;  %555 = vst.msk [vmem:[#allocation2 + $0x68] sm:$0xff] %vm476_vm0, %v448_v53  ;;  %v472_v15 = vsel %vm408_vm15, %v376_v56, %v440_v63  ;;  %558 = vst.msk [vmem:[#allocation2 + $0x90] sm:$0xff] %vm476_vm0, %v451_v51 }
  0x38   : > { %579 = vst.msk [vmem:[#allocation2 + $0x1e8] sm:$0xff] %vm476_vm0, %v472_v15  ;;  %v3472_v15 = vld [vmem:[%s5079_s1 + $0x38] sm:$0xff]  }
  0x39   : > { %v3791_v2 = vld [vmem:[#allocation2 + $0x28] sm:$0xff]  ;;  %v3793_v4 = vld [vmem:[#allocation2 + $0x30] sm:$0xff]  ;;  %v449_v59 = vsel %vm385_vm14, %v353_v37, %v417_v50  ;;  %2906 = vmatpush3.bf16.msra.mxu0 %v3466_v0  ;;  %3193 = vmatpush3.bf16.msra.mxu1 %v3466_v0  ;;  %v599_v0 = vld [vmem:[#allocation2 + $0x80] sm:$0xff] }
  0x3a   : > { %v710_v9 = vrot.slane %v3791_v2, 7  ;;  %v712_v10 = vrot.slane %v3793_v4, 7  ;;  %v3802_v11 = vld [vmem:[#allocation2 + $0x1a8] sm:$0xff]  ;;  %v3804_v12 = vld [vmem:[#allocation2 + $0x1b0] sm:$0xff]  ;;  %556 = vst.msk [vmem:[#allocation2 + $0x70] sm:$0xff] %vm476_vm0, %v449_v59  ;;  %v3232_v19 = vpack.i.bf16 %v3793_v4, %v3791_v2  ;;  %2907 = vmatprep.subr.bf16.mxu0 %v3467_v8  ;;  %3186 = vmatprep.subr.bf16.mxu1 %v3467_v8 }
  0x3b   : > { %v770_v16 = vrot.slane %v3802_v11, 7  ;;  %v772_v17 = vrot.slane %v3804_v12, 7  ;;  %v3827_v27 = vld [vmem:[#allocation2 + $0x188] sm:$0xff]  ;;  %v3841_v36 = vld [vmem:[#allocation2 + $0x190] sm:$0xff]  ;;  %v3242_v44 = vpack.i.bf16 %v3804_v12, %v3802_v11 }
  0x3c   : > { %v3814_v20 = vsel %vm703_vm7, %v709_v62, %v710_v9  ;;  %v3817_v21 = vsel %vm703_vm7, %v710_v9, %v712_v10  ;;  %v3222_v41 = vpack.i.bf16 %v3841_v36, %v3827_v27  ;;  %v3853_v42 = vld [vmem:[#allocation2 + $0x48] sm:$0xff]  ;;  %v3855_v43 = vld [vmem:[#allocation2 + $0x50] sm:$0xff]  ;;  %v377_v62 = vadd.f32 %v3758_v13, %v338_v55 }
  0x3d   : > { %v3207_v24 = vpack.i.bf16 %v3817_v21, %v3814_v20  ;;  %v3822_v25 = vsel %vm703_vm7, %v769_v5, %v770_v16  ;;  %v3825_v26 = vsel %vm703_vm7, %v770_v16, %v772_v17  ;;  %v715_v48 = vrot.slane %v3853_v42, 7  ;;  %v3896_v9 = vld [vmem:[#allocation2 + $0x1c8] sm:$0xff]  ;;  %v3898_v10 = vld [vmem:[#allocation2 + $0x1d0] sm:$0xff]  ;;  %2908 = vmatpush3.bf16.msra.mxu0 %v3468_v23  ;;  %3194 = vmatpush3.bf16.msra.mxu1 %v3468_v23 }
  0x3e   : > { %v3212_v35 = vpack.i.bf16 %v3825_v26, %v3822_v25  ;;  %v717_v49 = vrot.slane %v3855_v43, 7  ;;  %3223 = vrot.lane.b32.xlu1 %v3222_v41, %s3536_s12  ;;  %v315_v5 = vmul.f32 %v2832_v45, %v3739_v3  ;;  %vm409_vm1 = vcmp.ge.f32.partialorder %v377_v62, 0.0  ;;  %v3469_v37 = vld [vmem:[%s5079_s1 + $0x70] sm:$0xff]   ;;  %v3928_v39 = vld [vmem:[#allocation2 + $0x68] sm:$0xff] }
  0x3f   : > { %3208 = vrot.lane.b32.xlu0 %v3207_v24, %s3536_s12  ;;  %v3876_v57 = vsel %vm703_vm7, %v714_v30, %v715_v48  ;;  %v441_v14 = vmul.f32 0.01, %v377_v62  ;;  %v2881_v16 = vunpack.c.h.bf16 %v2896_v46  ;;  %v775_v17 = vrot.slane %v3896_v9, 7  ;;  %2909 = vmatprep.subr.bf16.mxu0 %v3469_v37  ;;  %v3956_v56 = vld [vmem:[#allocation2 + $0x1e8] sm:$0xff] }
  0x40   : > { %v3879_v58 = vsel %vm703_vm7, %v715_v48, %v717_v49  ;;  %v777_v18 = vrot.slane %v3898_v10, 7  ;;  %v354_v22 = vadd.f32 %v3758_v13, %v315_v5  ;;  %v339_v30 = vmul.f32 %v2880_v7, %v3739_v3  ;;  %v3470_v49 = vld [vmem:[%s5079_s1 + $0x30] sm:$0xff]   ;;  %3187 = vmatprep.subr.bf16.mxu1 %v3469_v37  ;;  %v2886_v5 = vld [vmem:[%s3747_s7 + $0x28] sm:$0xff]   ;;  %v647_v7 = vld [vmem:[#allocation2 + $0x200] sm:$0xff] }
  0x41   : > { %v3227_v61 = vpack.i.bf16 %v3879_v58, %v3876_v57  ;;  %v473_v24 = vsel %vm409_vm1, %v377_v62, %v441_v14  ;;  %v340_v31 = vmul.f32 %v2881_v16, %v3739_v3  ;;  %v3916_v32 = vsel %vm703_vm7, %v774_v52, %v775_v17  ;;  %v3934_v45 = vld [vmem:[#allocation2 + $0x70] sm:$0xff]  ;;  %2910 = vmatpush3.bf16.msra.mxu0 %v3470_v49 }
  0x42   : > { %v3919_v33 = vsel %vm703_vm7, %v775_v17, %v777_v18  ;;  %580 = vst.msk [vmem:[#allocation2 + $0x1f0] sm:$0xff] %vm476_vm0, %v473_v24  ;;  %vm386_vm2 = vcmp.ge.f32.partialorder %v354_v22, 0.0  ;;  %v418_v34 = vmul.f32 0.01, %v354_v22  ;;  %v378_v41 = vadd.f32 %v3758_v13, %v339_v30  ;;  %3195 = vmatpush3.bf16.msra.mxu1 %v3470_v49  ;;  %2911 = vmatprep.subr.bf16.mxu0 %v3471_v54 }
  0x43   : > { %3213 = vrot.lane.b32.xlu0 %v3212_v35, %s3536_s12  ;;  %v2885_v35 = vld [vmem:[%s3747_s7 + $0x20] sm:$0xff]   ;;  %v3237_v38 = vpack.i.bf16 %v3919_v33, %v3916_v32  ;;  %v720_v46 = vrot.slane %v3928_v39, 7  ;;  %v379_v48 = vadd.f32 %v3758_v13, %v340_v31  ;;  %v722_v50 = vrot.slane %v3934_v45, 7  ;;  %3188 = vmatprep.subr.bf16.mxu1 %v3471_v54 }
  0x44   : > { %v450_v47 = vsel %vm386_vm2, %v354_v22, %v418_v34  ;;  %vm410_vm4 = vcmp.ge.f32.partialorder %v378_v41, 0.0  ;;  %v442_v11 = vmul.f32 0.01, %v378_v41  ;;  %v779_v52 = vrot.slane %v3910_v28, 7 }
  0x45   : > { %3238 = vrot.lane.b32.xlu1 %v3237_v38, %s3536_s12  ;;  %557 = vst.msk [vmem:[#allocation2 + $0x88] sm:$0xff] %vm476_vm0, %v450_v47  ;;  %v3946_v12 = vsel %vm703_vm7, %v719_v1, %v720_v46  ;;  %vm411_vm5 = vcmp.ge.f32.partialorder %v379_v48, 0.0  ;;  %v443_v53 = vmul.f32 0.01, %v379_v48  ;;  %v3954_v55 = vsel %vm703_vm7, %v720_v46, %v722_v50  ;;  %v3998_v38 = vld [vmem:[#allocation2 + $0x90] sm:$0xff]  ;;  %2912 = vmatpush3.bf16.msra.mxu0 %v3472_v15 }
  0x46   : > { %v474_v59 = vsel %vm410_vm4, %v378_v41, %v442_v11  ;;  %v2836_v60 = vunpack.c.l.bf16 %v2885_v35  ;;  %v3247_v62 = vpack.i.bf16 %v3954_v55, %v3946_v12  ;;  %v780_v63 = vrot.slane %v3956_v56, 7  ;;  %v590_v41 = vld [vmem:[#allocation2 + $0x38] sm:$0x1]  ;;  %3196 = vmatpush3.bf16.msra.mxu1 %v3472_v15  ;;  %3141 = vmatprep.subr.bf16.mxu0 %v3987_v29 }
  0x47   : > { %3228 = vrot.lane.b32.xlu0 %v3227_v61, %s3536_s12  ;;  %v2837_v61 = vunpack.c.h.bf16 %v2885_v35  ;;  %v475_v1 = vsel %vm411_vm5, %v379_v48, %v443_v53  ;;  %581 = vst.msk [vmem:[#allocation2 + $0x208] sm:$0xff] %vm476_vm0, %v474_v59  ;;  %v3252_v18 = vpack.i.bf16 %v3855_v43, %v3853_v42  ;;  %v724_v22 = vrot.slane %v599_v0, 7  ;;  %v603_v0 = vld [vmem:[#allocation2 + $0xa0] sm:$0xff] }
  0x48   : > { %582 = vst.msk [vmem:[#allocation2 + $0x210] sm:$0xff] %vm476_vm0, %v475_v1  ;;  %v317_v8 = vmul.f32 %v2836_v60, %v3739_v3  ;;  %v3974_v16 = vsel %vm703_vm7, %v779_v52, %v780_v63  ;;  %v2840_v28 = vunpack.c.l.bf16 %v2886_v5  ;;  %v3262_v31 = vpack.i.bf16 %v3898_v10, %v3896_v9 }
  0x49   : > { %3243 = vrot.lane.b32.xlu1 %v3242_v44, %s3536_s12  ;;  %v3964_v6 = vld [vmem:[#allocation2 + $0x1f0] sm:$0xff]  ;;  %v318_v14 = vmul.f32 %v2837_v61, %v3739_v3  ;;  %v2841_v35 = vunpack.c.h.bf16 %v2886_v5  ;;  %v727_v44 = vrot.slane %v3998_v38, 7  ;;  %v948_v46 = vrot.slane %v647_v7, 7 }
  0x4a   : > { %v782_v17 = vrot.slane %v3964_v6, 7  ;;  %v356_v23 = vadd.f32 %v3758_v13, %v317_v8  ;;  %v3272_v51 = vpack.i.bf16 %v3934_v45, %v3928_v39  ;;  %v319_v11 = vmul.f32 %v2840_v28, %v3739_v3  ;;  %v2887_v7 = vld [vmem:[%s3747_s7 + $0x30] sm:$0xff]  }
  0x4b   : > { %3233 = vrot.lane.b32.xlu0 %v3232_v19, %s3536_s12  ;;  %v3473_v19 = vld [vmem:[%s5079_s1 + $0xc0] sm:$0xff]   ;;  %v357_v24 = vadd.f32 %v3758_v13, %v318_v14  ;;  %v320_v52 = vmul.f32 %v2841_v35, %v3739_v3  ;;  %v838_v14 = vrot.slane %v3791_v2, 1  ;;  %v839_v15 = vrot.slane %v3793_v4, 1 }
  0x4c   : > { %v3990_v30 = vsel %vm703_vm7, %v780_v63, %v782_v17  ;;  %v3994_v34 = vld [vmem:[#allocation2 + $0x88] sm:$0xff]  ;;  %vm388_vm8 = vcmp.ge.f32.partialorder %v356_v23, 0.0  ;;  %v420_v47 = vmul.f32 0.01, %v356_v23  ;;  %3009 = vmatprep.subr.bf16.mxu1 %v3473_v19  ;;  %v358_v1 = vadd.f32 %v3758_v13, %v319_v11  ;;  %v607_v2 = vld [vmem:[#allocation2 + $0xc0] sm:$0xff] }
  0x4d   : > { %v3257_v37 = vpack.i.bf16 %v3990_v30, %v3974_v16  ;;  %v725_v40 = vrot.slane %v3994_v34, 7  ;;  %vm389_vm9 = vcmp.ge.f32.partialorder %v357_v24, 0.0  ;;  %v421_v48 = vmul.f32 0.01, %v357_v24 }
  0x4e   : > { %v4007_v50 = vld [vmem:[#allocation2 + $0x208] sm:$0xff]  ;;  %v452_v60 = vsel %vm388_vm8, %v356_v23, %v420_v47  ;;  %v359_v5 = vadd.f32 %v3758_v13, %v320_v52  ;;  %v841_v17 = vrot.slane %v590_v41, 1  ;;  %vm390_vm10 = vcmp.ge.f32.partialorder %v358_v1, 0.0 }
  0x4f   : > { %3248 = vrot.lane.b32.xlu0 %v3247_v62, %s3536_s12  ;;  %3258 = vrot.lane.b32.xlu1 %v3257_v37, %s3536_s12  ;;  %v4005_v49 = vsel %vm703_vm7, %v724_v22, %v725_v40  ;;  %v4014_v53 = vsel %vm703_vm7, %v725_v40, %v727_v44  ;;  %v4016_v54 = vld [vmem:[#allocation2 + $0x210] sm:$0xff]  ;;  %v949_v59 = vrot.slane %v4007_v50, 7  ;;  %v453_v61 = vsel %vm389_vm9, %v357_v24, %v421_v48  ;;  %v594_v44 = vld [vmem:[#allocation2 + $0x58] sm:$0x1] }
  0x50   : > { %v3267_v62 = vpack.i.bf16 %v4014_v53, %v4005_v49  ;;  %v951_v63 = vrot.slane %v4016_v54, 7  ;;  %559 = vst.msk [vmem:[#allocation2 + $0xa8] sm:$0xff] %vm476_vm0, %v452_v60  ;;  %560 = vst.msk [vmem:[#allocation2 + $0xb0] sm:$0xff] %vm476_vm0, %v453_v61  ;;  %vm391_vm11 = vcmp.ge.f32.partialorder %v359_v5, 0.0  ;;  %v422_v22 = vmul.f32 0.01, %v358_v1 }
  0x51   : > { %v4031_v8 = vsel %vm703_vm7, %v948_v46, %v949_v59  ;;  %v423_v24 = vmul.f32 0.01, %v359_v5  ;;  %v2844_v35 = vunpack.c.l.bf16 %v2887_v7  ;;  %v2845_v4 = vunpack.c.h.bf16 %v2887_v7 }
  0x52   : > { %5115 = vst [vmem:[#allocation3_spill] sm:$0xff] %v4031_v8  ;;  %v4039_v19 = vsel %vm703_vm7, %v949_v59, %v951_v63  ;;  %v454_v28 = vsel %vm390_vm10, %v358_v1, %v422_v22  ;;  %v3282_v37 = vpack.i.bf16 %v3964_v6, %v3956_v56  ;;  %v4049_v41 = vsel %vm832_vm6, %v838_v14, %v839_v15 }
  0x53   : > { %3253 = vrot.lane.b32.xlu0 %v3252_v18, %s3536_s12  ;;  %v2888_v18 = vld [vmem:[%s3747_s7 + $0x38] sm:$0xff]   ;;  %3263 = vrot.lane.b32.xlu1 %v3262_v31, %s3536_s12  ;;  %5116 = vst [vmem:[#allocation4_spill] sm:$0xff] %v4039_v19  ;;  %v3277_v23 = vpack.i.bf16 %v4039_v19, %v4031_v8  ;;  %v729_v31 = vrot.slane %v603_v0, 7  ;;  %v455_v40 = vsel %vm391_vm11, %v359_v5, %v423_v24  ;;  %561 = vst.msk [vmem:[#allocation2 + $0xc8] sm:$0xff] %vm476_vm0, %v454_v28  ;;  %vm2598_vm9 = vcmask 517120  }
  0x54   : > { %562 = vst.msk [vmem:[#allocation2 + $0xd0] sm:$0xff] %vm476_vm0, %v455_v40  ;;  %v321_v46 = vmul.f32 %v2844_v35, %v3739_v3  ;;  %v322_v47 = vmul.f32 %v2845_v4, %v3739_v3  ;;  %v2848_v48 = vunpack.c.l.bf16 %v2888_v18  ;;  %v4059_v59 = vsel %vm832_vm6, %v839_v15, %v841_v17  ;;  %v598_v24 = vld [vmem:[#allocation2 + $0x78] sm:$0x1] }
  0x55   : > { %v734_v60 = vrot.slane %v607_v2, 7  ;;  %v2849_v61 = vunpack.c.h.bf16 %v2888_v18  ;;  %v844_v0 = vrot.slane %v3855_v43, 1  ;;  %v3292_v5 = vpack.i.bf16 %v3998_v38, %v3994_v34 }
  0x56   : > { %v360_v1 = vadd.f32 %v3758_v13, %v321_v46  ;;  %v361_v7 = vadd.f32 %v3758_v13, %v322_v47  ;;  %v323_v14 = vmul.f32 %v2848_v48, %v3739_v3  ;;  %v846_v22 = vrot.slane %v594_v44, 1  ;;  %v2889_v48 = vld [vmem:[%s3747_s7 + $0x40] sm:$0xff]  }
  0x57   : > { %3268 = vrot.lane.b32.xlu0 %v3267_v62, %s3536_s12  ;;  %3278 = vrot.lane.b32.xlu1 %v3277_v23, %s3536_s12  ;;  %v4054_v11 = vld [vmem:[#allocation2 + $0xa8] sm:$0xff]  ;;  %v4056_v52 = vld [vmem:[#allocation2 + $0xb0] sm:$0xff]  ;;  %v324_v15 = vmul.f32 %v2849_v61, %v3739_v3  ;;  %v3297_v28 = vpack.i.bf16 %v4059_v59, %v4049_v41  ;;  %v848_v47 = vrot.slane %v3928_v39, 1 }
  0x58   : > { %v730_v62 = vrot.slane %v4054_v11, 7  ;;  %v732_v63 = vrot.slane %v4056_v52, 7  ;;  %vm392_vm12 = vcmp.ge.f32.partialorder %v360_v1, 0.0  ;;  %v424_v43 = vmul.f32 0.01, %v360_v1 }
  0x59   : > { %vm393_vm13 = vcmp.ge.f32.partialorder %v361_v7, 0.0  ;;  %v425_v23 = vmul.f32 0.01, %v361_v7  ;;  %v362_v4 = vadd.f32 %v3758_v13, %v323_v14  ;;  %v4106_v39 = vsel %vm832_vm6, %v844_v0, %v846_v22 }
  0x5a   : > { %v4076_v17 = vsel %vm703_vm7, %v730_v62, %v732_v63  ;;  %v4082_v2 = vld [vmem:[#allocation2 + $0xc8] sm:$0xff]  ;;  %v456_v35 = vsel %vm392_vm12, %v360_v1, %v424_v43  ;;  %v849_v63 = vrot.slane %v3934_v45, 1  ;;  %v2852_v43 = vunpack.c.l.bf16 %v2889_v48 }
  0x5b   : > { %3273 = vrot.lane.b32.xlu0 %v3272_v51, %s3536_s12  ;;  %v843_v51 = vrot.slane %v3853_v42, 1  ;;  %3283 = vrot.lane.b32.xlu1 %v3282_v37, %s3536_s12  ;;  %v4073_v42 = vsel %vm703_vm7, %v729_v31, %v730_v62  ;;  %5118 = vst [vmem:[#allocation6_spill] sm:$0xff] %v4076_v17  ;;  %v363_v37 = vadd.f32 %v3758_v13, %v324_v15  ;;  %v4087_v31 = vld [vmem:[#allocation2 + $0xd0] sm:$0xff]  ;;  %v735_v40 = vrot.slane %v4082_v2, 7  ;;  %v611_v62 = vld [vmem:[#allocation2 + $0xe0] sm:$0xff] }
  0x5c   : > { %5117 = vst [vmem:[#allocation5_spill] sm:$0xff] %v4073_v42  ;;  %v3287_v18 = vpack.i.bf16 %v4076_v17, %v4073_v42  ;;  %v457_v46 = vsel %vm393_vm13, %v361_v7, %v425_v23  ;;  %563 = vst.msk [vmem:[#allocation2 + $0xe8] sm:$0xff] %vm476_vm0, %v456_v35  ;;  %v737_v61 = vrot.slane %v4087_v31, 7  ;;  %vm394_vm14 = vcmp.ge.f32.partialorder %v362_v4, 0.0  ;;  %v2890_v23 = vld [vmem:[%s3747_s7 + $0x48] sm:$0xff]  }
  0x5d   : > { %v4091_v44 = vsel %vm832_vm6, %v843_v51, %v844_v0  ;;  %564 = vst.msk [vmem:[#allocation2 + $0xf0] sm:$0xff] %vm476_vm0, %v457_v46  ;;  %vm395_vm15 = vcmp.ge.f32.partialorder %v363_v37, 0.0  ;;  %v4100_v51 = vld [vmem:[#allocation2 + $0x100] sm:$0xff]  ;;  %v4103_v1 = vsel %vm703_vm7, %v734_v60, %v735_v40  ;;  %v426_v7 = vmul.f32 0.01, %v362_v4 }
  0x5e   : > { %5119 = vst [vmem:[#allocation7_spill] sm:$0xff] %v4103_v1  ;;  %v4109_v14 = vsel %vm703_vm7, %v735_v40, %v737_v61  ;;  %v851_v15 = vrot.slane %v598_v24, 1  ;;  %v3307_v60 = vpack.i.bf16 %v4056_v52, %v4054_v11  ;;  %v3312_v22 = vpack.i.bf16 %v4106_v39, %v4091_v44  ;;  %v602_v24 = vld [vmem:[#allocation2 + $0x98] sm:$0x1] }
  0x5f   : > { %3288 = vrot.lane.b32.xlu0 %v3287_v18, %s3536_s12  ;;  %3293 = vrot.lane.b32.xlu1 %v3292_v5, %s3536_s12  ;;  %v427_v5 = vmul.f32 0.01, %v363_v37  ;;  %5120 = vst [vmem:[#allocation8_spill] sm:$0xff] %v4109_v14  ;;  %v2853_v18 = vunpack.c.h.bf16 %v2889_v48  ;;  %v3302_v45 = vpack.i.bf16 %v4109_v14, %v4103_v1  ;;  %v458_v35 = vsel %vm394_vm14, %v362_v4, %v426_v7  ;;  %v634_v1 = vld [vmem:[#allocation2 + $0x198] sm:$0x1] }
  0x60   : > { %565 = vst.msk [vmem:[#allocation2 + $0x108] sm:$0xff] %vm476_vm0, %v458_v35  ;;  %v325_v40 = vmul.f32 %v2852_v43, %v3739_v3  ;;  %v739_v46 = vrot.slane %v611_v62, 7  ;;  %v744_v48 = vrot.slane %v4100_v51, 7  ;;  %v853_v4 = vrot.slane %v3994_v34, 1 }
  0x61   : > { %v459_v0 = vsel %vm395_vm15, %v363_v37, %v427_v5  ;;  %v2856_v37 = vunpack.c.l.bf16 %v2890_v23  ;;  %v854_v7 = vrot.slane %v3998_v38, 1  ;;  %v4136_v51 = vsel %vm832_vm6, %v848_v47, %v849_v63 }
  0x62   : > { %566 = vst.msk [vmem:[#allocation2 + $0x110] sm:$0xff] %vm476_vm0, %v459_v0  ;;  %v364_v5 = vadd.f32 %v3758_v13, %v325_v40  ;;  %v2857_v0 = vunpack.c.h.bf16 %v2890_v23  ;;  %v4139_v34 = vsel %vm832_vm6, %v849_v63, %v851_v15  ;;  %v893_v17 = vrot.slane %v3827_v27, 1 }
  0x63   : > { %3298 = vrot.lane.b32.xlu0 %v3297_v28, %s3536_s12  ;;  %v326_v28 = vmul.f32 %v2853_v18, %v3739_v3  ;;  %3303 = vrot.lane.b32.xlu1 %v3302_v45, %s3536_s12  ;;  %v4126_v61 = vld [vmem:[#allocation2 + $0xe8] sm:$0xff]  ;;  %v327_v18 = vmul.f32 %v2856_v37, %v3739_v3  ;;  %v856_v45 = vrot.slane %v602_v24, 1  ;;  %v3327_v15 = vpack.i.bf16 %v4139_v34, %v4136_v51 }
  0x64   : > { %v4132_v43 = vld [vmem:[#allocation2 + $0xf0] sm:$0xff]  ;;  %v740_v62 = vrot.slane %v4126_v61, 7  ;;  %vm396_vm1 = vcmp.ge.f32.partialorder %v364_v5, 0.0  ;;  %v428_v47 = vmul.f32 0.01, %v364_v5  ;;  %v328_v24 = vmul.f32 %v2857_v0, %v3739_v3 }
  0x65   : > { %v365_v35 = vadd.f32 %v3758_v13, %v326_v28  ;;  %v742_v38 = vrot.slane %v4132_v43, 7  ;;  %v366_v28 = vadd.f32 %v3758_v13, %v327_v18  ;;  %v4163_v19 = vsel %vm832_vm6, %v853_v4, %v854_v7  ;;  %v606_v0 = vld [vmem:[#allocation2 + $0xb8] sm:$0x1] }
  0x66   : > { %v4145_v23 = vsel %vm703_vm7, %v739_v46, %v740_v62  ;;  %v4168_v3 = vsel %vm832_vm6, %v854_v7, %v856_v45  ;;  %v367_v18 = vadd.f32 %v3758_v13, %v328_v24  ;;  %v858_v4 = vrot.slane %v4054_v11, 1 }
  0x67   : > { %3308 = vrot.lane.b32.xlu0 %v3307_v60, %s3536_s12  ;;  %vm397_vm2 = vcmp.ge.f32.partialorder %v365_v35, 0.0  ;;  %3313 = vrot.lane.b32.xlu1 %v3312_v22, %s3536_s12  ;;  %5121 = vst [vmem:[#allocation9_spill] sm:$0xff] %v4145_v23  ;;  %v3322_v60 = vpack.i.bf16 %v4087_v31, %v4082_v2  ;;  %v429_v40 = vmul.f32 0.01, %v365_v35  ;;  %v4150_v63 = vsel %vm703_vm7, %v740_v62, %v742_v38  ;;  %v4158_v46 = vld [vmem:[#allocation2 + $0x108] sm:$0xff] }
  0x68   : > { %5122 = vst [vmem:[#allocation10_spill] sm:$0xff] %v4150_v63  ;;  %v3317_v22 = vpack.i.bf16 %v4150_v63, %v4145_v23  ;;  %v460_v62 = vsel %vm396_vm1, %v364_v5, %v428_v47  ;;  %v745_v8 = vrot.slane %v4158_v46, 7  ;;  %v2891_v63 = vld [vmem:[%s3747_s7 + $0x50] sm:$0xff]   ;;  %v859_v5 = vrot.slane %v4056_v52, 1  ;;  %v631_v23 = vld [vmem:[#allocation2 + $0x180] sm:$0xff]  ;;  %s2696_s7 = sshll.u32 %s3584_s22, 1 }
  0x69   : > { %v4160_v37 = vld [vmem:[#allocation2 + $0x110] sm:$0xff]  ;;  %v461_v38 = vsel %vm397_vm2, %v365_v35, %v429_v40  ;;  %567 = vst.msk [vmem:[#allocation2 + $0x128] sm:$0xff] %vm476_vm0, %v460_v62  ;;  %vm398_vm3 = vcmp.ge.f32.partialorder %v366_v28, 0.0  ;;  %v430_v35 = vmul.f32 0.01, %v366_v28  ;;  %vm399_vm4 = vcmp.ge.f32.partialorder %v367_v18, 0.0  ;;  %s236_s26 = scalar_lea.vmem %s5083_s5, %s2696_s7 }
  0x6a   : > { %v747_v14 = vrot.slane %v4160_v37, 7  ;;  %568 = vst.msk [vmem:[#allocation2 + $0x130] sm:$0xff] %vm476_vm0, %v461_v38  ;;  %v4179_v7 = vsel %vm703_vm7, %v744_v48, %v745_v8  ;;  %v431_v47 = vmul.f32 0.01, %v367_v18  ;;  %v619_v40 = vld [vmem:[#allocation2 + $0x120] sm:$0xff]  ;;  %v861_v24 = vrot.slane %v606_v0, 1 }
  0x6b   : > { %3318 = vrot.lane.b32.xlu0 %v3317_v22, %s3536_s12  ;;  %3323 = vrot.lane.b32.xlu1 %v3322_v60, %s3536_s12  ;;  %5123 = vst [vmem:[#allocation11_spill] sm:$0xff] %v4179_v7  ;;  %v462_v60 = vsel %vm398_vm3, %v366_v28, %v430_v35  ;;  %v623_v22 = vld [vmem:[#allocation2 + $0x140] sm:$0xff]  ;;  %v2860_v11 = vunpack.c.l.bf16 %v2891_v63  ;;  %v2861_v52 = vunpack.c.h.bf16 %v2891_v63  ;;  %v749_v38 = vrot.slane %v619_v40, 7  ;;  %v610_v63 = vld [vmem:[#allocation2 + $0xd8] sm:$0x1] }
  0x6c   : > { %v4182_v45 = vsel %vm703_vm7, %v745_v8, %v747_v14  ;;  %v463_v62 = vsel %vm399_vm4, %v367_v18, %v431_v47  ;;  %569 = vst.msk [vmem:[#allocation2 + $0x148] sm:$0xff] %vm476_vm0, %v462_v60  ;;  %v3337_v8 = vpack.i.bf16 %v4132_v43, %v4126_v61  ;;  %v3342_v14 = vpack.i.bf16 %v4168_v3, %v4163_v19  ;;  %v3493_v48 = vld [vmem:[%s5080_s2] ss:$0 sm:$0xff] }
  0x6d   : > { %5124 = vst [vmem:[#allocation12_spill] sm:$0xff] %v4182_v45  ;;  %v3332_v13 = vpack.i.bf16 %v4182_v45, %v4179_v7  ;;  %570 = vst.msk [vmem:[#allocation2 + $0x150] sm:$0xff] %vm476_vm0, %v463_v62  ;;  %v329_v28 = vmul.f32 %v3493_v48, %v2860_v11  ;;  %v754_v0 = vrot.slane %v623_v22, 7  ;;  %v330_v18 = vmul.f32 %v3493_v48, %v2861_v52  ;;  %v3494_v11 = vld [vmem:[%s5081_s3] ss:$0 sm:$0xff] }
  0x6e   : > { %v4202_v47 = vsel %vm832_vm6, %v858_v4, %v859_v5  ;;  %v863_v60 = vrot.slane %v4082_v2, 1  ;;  %v864_v52 = vrot.slane %v4087_v31, 1  ;;  %v3352_v4 = vpack.i.bf16 %v4160_v37, %v4158_v46 }
  0x6f   : > { %3328 = vrot.lane.b32.xlu0 %v3327_v15, %s3536_s12  ;;  %3333 = vrot.lane.b32.xlu1 %v3332_v13, %s3536_s12  ;;  %v4205_v13 = vsel %vm832_vm6, %v859_v5, %v861_v24  ;;  %v368_v40 = vadd.f32 %v3494_v11, %v329_v28  ;;  %v369_v48 = vadd.f32 %v3494_v11, %v330_v18  ;;  %v866_v2 = vrot.slane %v610_v63, 1  ;;  %v4228_v18 = vld [vmem:[#allocation2 + $0x10] sm:$0xff] }
  0x70   : > { %v4197_v15 = vld [vmem:[#allocation2 + $0x128] sm:$0xff]  ;;  %5125 = vst [vmem:[#allocation13_spill] sm:$0xff] %v4205_v13  ;;  %v707_v63 = vrot.slane %v4228_v18, 7 }
  0x71   : > { %v4199_v35 = vld [vmem:[#allocation2 + $0x130] sm:$0xff]  ;;  %v750_v22 = vrot.slane %v4197_v15, 7  ;;  %vm400_vm5 = vcmp.ge.f32.partialorder %v368_v40, 0.0  ;;  %v432_v5 = vmul.f32 0.01, %v368_v40  ;;  %vm401_vm8 = vcmp.ge.f32.partialorder %v369_v48, 0.0 }
  0x72   : > { %v752_v62 = vrot.slane %v4199_v35, 7  ;;  %v433_v45 = vmul.f32 0.01, %v369_v48 }
  0x73   : > { %3338 = vrot.lane.b32.xlu0 %v3337_v8, %s3536_s12  ;;  %3343 = vrot.lane.b32.xlu1 %v3342_v14, %s3536_s12  ;;  %v4219_v24 = vsel %vm703_vm7, %v749_v38, %v750_v22  ;;  %v4226_v8 = vld [vmem:[#allocation2 + $0x148] sm:$0xff]  ;;  %v464_v14 = vsel %vm400_vm5, %v368_v40, %v432_v5  ;;  %v3357_v40 = vpack.i.bf16 %v4205_v13, %v4202_v47  ;;  %v622_v13 = vld [vmem:[#allocation2 + $0x138] sm:$0x1] }
  0x74   : > { %5126 = vst [vmem:[#allocation14_spill] sm:$0xff] %v4219_v24  ;;  %v4222_v28 = vsel %vm703_vm7, %v750_v22, %v752_v62  ;;  %v4231_v11 = vld [vmem:[#allocation2 + $0x150] sm:$0xff]  ;;  %v755_v38 = vrot.slane %v4226_v8, 7  ;;  %v465_v7 = vsel %vm401_vm8, %v369_v48, %v433_v45  ;;  %571 = vst.msk [vmem:[#allocation2 + $0x168] sm:$0xff] %vm476_vm0, %v464_v14  ;;  %v4236_v62 = vld [vmem:[#allocation2 + $0x8] sm:$0xff]  ;;  %v4250_v14 = vsel %vm832_vm6, %v863_v60, %v864_v52 }
  0x75   : > { %5127 = vst [vmem:[#allocation15_spill] sm:$0xff] %v4222_v28  ;;  %v3347_v31 = vpack.i.bf16 %v4222_v28, %v4219_v24  ;;  %v833_v28 = vrot.slane %v4236_v62, 1  ;;  %v757_v5 = vrot.slane %v4231_v11, 7  ;;  %572 = vst.msk [vmem:[#allocation2 + $0x170] sm:$0xff] %vm476_vm0, %v465_v7  ;;  %v4253_v22 = vsel %vm832_vm6, %v864_v52, %v866_v2  ;;  %v627_v24 = vld [vmem:[#allocation2 + $0x160] sm:$0xff] }
  0x76   : > { %v4247_v48 = vsel %vm703_vm7, %v754_v0, %v755_v38  ;;  %5129 = vst [vmem:[#allocation17_spill] sm:$0xff] %v4250_v14  ;;  %5130 = vst [vmem:[#allocation18_spill] sm:$0xff] %v4253_v22  ;;  %v868_v45 = vrot.slane %v4126_v61, 1  ;;  %v869_v0 = vrot.slane %v4132_v43, 1  ;;  %v3367_v60 = vpack.i.bf16 %v4199_v35, %v4197_v15  ;;  %v618_v43 = vld [vmem:[#allocation2 + $0x118] sm:$0x1] }
  0x77   : > { %3348 = vrot.lane.b32.xlu0 %v3347_v31, %s3536_s12  ;;  %3353 = vrot.lane.b32.xlu1 %v3352_v4, %s3536_s12  ;;  %5128 = vst [vmem:[#allocation16_spill] sm:$0xff] %v4247_v48  ;;  %v614_v31 = vld [vmem:[#allocation2 + $0xf8] sm:$0x1]  ;;  %v4256_v4 = vsel %vm703_vm7, %v755_v38, %v757_v5  ;;  %v3372_v52 = vpack.i.bf16 %v4253_v22, %v4250_v14  ;;  %v5132_v38 = vrot.slane %v4228_v18, 1  ;;  %v759_v61 = vrot.slane %v627_v24, 7 }
  0x78   : > { %5131 = vst [vmem:[#allocation19_spill] sm:$0xff] %v4256_v4  ;;  %v3362_v7 = vpack.i.bf16 %v4256_v4, %v4247_v48  ;;  %v871_v2 = vrot.slane %v614_v31, 1  ;;  %v764_v4 = vrot.slane %v631_v23, 7  ;;  %v5133_v48 = vrot.slane %v4236_v62, 7 }
  0x79   : > { %v4270_v5 = vsel %vm832_vm6, %v833_v28, %v5132_v38  ;;  %v765_v31 = vrot.slane %v3827_v27, 7  ;;  %v767_v22 = vrot.slane %v3841_v36, 7  ;;  %v894_v28 = vrot.slane %v3841_v36, 1 }
  0x7a   : > { %v896_v38 = vrot.slane %v634_v1, 1  ;;  %v4288_v24 = vsel %vm832_vm6, %v868_v45, %v869_v0  ;;  %v4294_v27 = vsel %vm832_vm6, %v869_v0, %v871_v2  ;;  %v874_v14 = vrot.slane %v4160_v37, 1 }
  0x7b   : > { %3358 = vrot.lane.b32.xlu0 %v3357_v40, %s3536_s12  ;;  %3363 = vrot.lane.b32.xlu1 %v3362_v7, %s3536_s12  ;;  %v4276_v40 = vsel %vm703_vm7, %v5133_v48, %v707_v63  ;;  %v4279_v42 = vld [vmem:[#allocation2 + $0x168] sm:$0xff]  ;;  %v873_v63 = vrot.slane %v4158_v46, 1  ;;  %v876_v36 = vrot.slane %v618_v43, 1  ;;  %v3382_v45 = vpack.i.bf16 %v4231_v11, %v4226_v8 }
  0x7c   : > { %5134 = vst [vmem:[#allocation20_spill] sm:$0xff] %v4279_v42  ;;  %v4284_v7 = vld [vmem:[#allocation2 + $0x170] sm:$0xff]  ;;  %v760_v23 = vrot.slane %v4279_v42, 7  ;;  %v4304_v46 = vsel %vm832_vm6, %v893_v17, %v894_v28  ;;  %v4313_v37 = vsel %vm703_vm7, %v764_v4, %v765_v31  ;;  %v626_v17 = vld [vmem:[#allocation2 + $0x158] sm:$0x1]  ;;  %v3387_v43 = vpack.i.bf16 %v4294_v27, %v4288_v24 }
  0x7d   : > { %5135 = vst [vmem:[#allocation21_spill] sm:$0xff] %v4284_v7  ;;  %v762_v48 = vrot.slane %v4284_v7, 7  ;;  %v4331_v4 = vsel %vm832_vm6, %v873_v63, %v874_v14  ;;  %v883_v2 = vrot.slane %v4226_v8, 1  ;;  %v3397_v8 = vpack.i.bf16 %v4284_v7, %v4279_v42 }
  0x7e   : > { %v4299_v1 = vsel %vm703_vm7, %v759_v61, %v760_v23 }
  0x7f   : > { %3368 = vrot.lane.b32.xlu0 %v3367_v60, %s3536_s12  ;;  %3373 = vrot.lane.b32.xlu1 %v3372_v52, %s3536_s12  ;;  %5136 = vst [vmem:[#allocation22_spill] sm:$0xff] %v4299_v1  ;;  %v4307_v60 = vsel %vm832_vm6, %v894_v28, %v896_v38  ;;  %v4310_v0 = vsel %vm703_vm7, %v760_v23, %v762_v48  ;;  %v878_v28 = vrot.slane %v4197_v15, 1  ;;  %v879_v38 = vrot.slane %v4199_v35, 1  ;;  %v630_v48 = vld [vmem:[#allocation2 + $0x178] sm:$0x1] }
  0x80   : > { %5137 = vst [vmem:[#allocation23_spill] sm:$0xff] %v4310_v0  ;;  %v4316_v52 = vsel %vm703_vm7, %v765_v31, %v767_v22  ;;  %v3377_v61 = vpack.i.bf16 %v4310_v0, %v4299_v1  ;;  %v881_v23 = vrot.slane %v622_v13, 1  ;;  %v4334_v31 = vsel %vm832_vm6, %v874_v14, %v876_v36  ;;  %v650_v13 = vld [vmem:[#allocation2 + $0x218] sm:$0x1] }
  0x81   : > { %v3392_v22 = vpack.i.bf16 %v4316_v52, %v4313_v37  ;;  %v884_v15 = vrot.slane %v4231_v11, 1  ;;  %v886_v35 = vrot.slane %v626_v17, 1  ;;  %v891_v63 = vrot.slane %v630_v48, 1  ;;  %v638_v48 = vld [vmem:[#allocation2 + $0x1b8] sm:$0x1] }
  0x82   : > { %v4344_v0 = vsel %vm832_vm6, %v879_v38, %v881_v23  ;;  %v954_v11 = vrot.slane %v4007_v50, 1  ;;  %v955_v14 = vrot.slane %v4016_v54, 1  ;;  %v957_v36 = vrot.slane %v650_v13, 1 }
  0x83   : > { %3378 = vrot.lane.b32.xlu0 %v3377_v61, %s3536_s12  ;;  %3383 = vrot.lane.b32.xlu1 %v3382_v45, %s3536_s12  ;;  %v3402_v61 = vpack.i.bf16 %v4334_v31, %v4331_v4  ;;  %v4341_v45 = vsel %vm832_vm6, %v878_v28, %v879_v38  ;;  %v4353_v17 = vsel %vm832_vm6, %v883_v2, %v884_v15  ;;  %v888_v38 = vrot.slane %v4279_v42, 1 }
  0x84   : > { %v4356_v28 = vsel %vm832_vm6, %v884_v15, %v886_v35  ;;  %v4361_v23 = vsel %vm832_vm6, %v954_v11, %v955_v14  ;;  %v3407_v2 = vpack.i.bf16 %v4344_v0, %v4341_v45  ;;  %v642_v35 = vld [vmem:[#allocation2 + $0x1d8] sm:$0x1]  ;;  %v903_v42 = vrot.slane %v3896_v9, 1 }
  0x85   : > { %5138 = vst [vmem:[#allocation24_spill] sm:$0xff] %v4356_v28  ;;  %5139 = vst [vmem:[#allocation25_spill] sm:$0xff] %v4361_v23  ;;  %v3412_v15 = vpack.i.bf16 %v4356_v28, %v4353_v17  ;;  %v904_v1 = vrot.slane %v3898_v10, 1  ;;  %v906_v28 = vrot.slane %v642_v35, 1  ;;  %v908_v10 = vrot.slane %v3956_v56, 1 }
  0x87   : > { %3388 = vrot.lane.b32.xlu0 %v3387_v43, %s3536_s12  ;;  %3393 = vrot.lane.b32.xlu1 %v3392_v22, %s3536_s12  ;;  %v889_v43 = vrot.slane %v4284_v7, 1  ;;  %v4364_v22 = vsel %vm832_vm6, %v955_v14, %v957_v36  ;;  %v4380_v36 = vld [vmem:[#allocation2 + $0x1a8] sm:$0xff]  ;;  %v901_v7 = vrot.slane %v638_v48, 1  ;;  %v4402_v48 = vsel %vm832_vm6, %v903_v42, %v904_v1 }
  0x88   : > { %5141 = vst [vmem:[#allocation27_spill] sm:$0xff] %v4380_v36  ;;  %v898_v13 = vrot.slane %v4380_v36, 1  ;;  %v583_v36 = vld [vmem:[#allocation2] sm:$0xff] }
  0x89   : > { %v4375_v11 = vsel %vm832_vm6, %v888_v38, %v889_v43  ;;  %v4378_v14 = vsel %vm832_vm6, %v889_v43, %v891_v63  ;;  %v3422_v38 = vpack.i.bf16 %v4307_v60, %v4304_v46  ;;  %v646_v43 = vld [vmem:[#allocation2 + $0x1f8] sm:$0x1] }
  0x8a   : > { %5140 = vst [vmem:[#allocation26_spill] sm:$0xff] %v4378_v14  ;;  %v3417_v63 = vpack.i.bf16 %v4378_v14, %v4375_v11  ;;  %v911_v35 = vrot.slane %v646_v43, 1  ;;  %v704_v14 = vrot.slane %v583_v36, 7  ;;  %v3437_v36 = vpack.i.bf16 %v4016_v54, %v4007_v50  ;;  %v4429_v43 = vld [vmem:[#allocation2 + $0x228] sm:$0xff] }
  0x8b   : > { %3398 = vrot.lane.b32.xlu0 %v3397_v8, %s3536_s12  ;;  %3403 = vrot.lane.b32.xlu1 %v3402_v61, %s3536_s12  ;;  %v4383_v8 = vld [vmem:[#allocation2 + $0x1b0] sm:$0xff]  ;;  %v3452_v54 = vpack.i.bf16 %v4364_v22, %v4361_v23 }
  0x8c   : > { %5142 = vst [vmem:[#allocation28_spill] sm:$0xff] %v4383_v8  ;;  %v899_v61 = vrot.slane %v4383_v8, 1 }
  0x8e   : > { %v4395_v8 = vsel %vm832_vm6, %v898_v13, %v899_v61  ;;  %v4398_v9 = vsel %vm832_vm6, %v899_v61, %v901_v7 }
  0x8f   : > { %3408 = vrot.lane.b32.xlu0 %v3407_v2, %s3536_s12  ;;  %3413 = vrot.lane.b32.xlu1 %v3412_v15, %s3536_s12  ;;  %v4405_v2 = vsel %vm832_vm6, %v904_v1, %v906_v28  ;;  %v909_v15 = vrot.slane %v3964_v6, 1  ;;  %v3427_v7 = vpack.i.bf16 %v4398_v9, %v4395_v8  ;;  %v3219_v28 = vpop.permute.xlu1 %3218  ;;  %v5143_v6 = vrot.slane %v4236_v62, 7 }
  0x90   : > { %v3432_v56 = vpack.i.bf16 %v4405_v2, %v4402_v48 }
  0x91   : > { %v4415_v42 = vsel %vm832_vm6, %v908_v10, %v909_v15  ;;  %v4418_v1 = vsel %vm832_vm6, %v909_v15, %v911_v35  ;;  %v706_v13 = vsel %vm703_vm7, %v704_v14, %v5143_v6  ;;  %v4431_v10 = vld [vmem:[#allocation2 + $0x230] sm:$0xff]  ;;  %v586_v35 = vld [vmem:[#allocation2 + $0x18] sm:$0x1] }
  0x92   : > { %v3442_v61 = vpack.i.bf16 %v4418_v1, %v4415_v42  ;;  %v3447_v50 = vpack.i.bf16 %v4431_v10, %v4429_v43 }
  0x93   : > { %3418 = vrot.lane.b32.xlu0 %v3417_v63, %s3536_s12  ;;  %3423 = vrot.lane.b32.xlu1 %v3422_v38, %s3536_s12  ;;  %v3221_v63 = vunpack.i.h.bf16 %v3219_v28  ;;  %v3220_v38 = vunpack.i.l.bf16 %v3219_v28 }
  0x95   : > { %v1281_v62 = vsel %vm476_vm0, %v706_v13, %v3220_v38  ;;  %v1282_v14 = vsel %vm476_vm0, %v4276_v40, %v3221_v63  ;;  %v5144_v40 = vrot.slane %v4228_v18, 1  ;;  %v3487_v18 = vld [vmem:[%s5079_s1 + $0x108] sm:$0xff]  }
  0x96   : > { %v1381_v15 = vpack.c.bf16 %v1282_v14, %v1281_v62 }
  0x97   : > { %3428 = vrot.lane.b32.xlu0 %v3427_v7, %s3536_s12  ;;  %3433 = vrot.lane.b32.xlu1 %v3432_v56, %s3536_s12  ;;  %v836_v7 = vrot.slane %v586_v35, 1 }
  0x99   : > { %v837_v28 = vsel %vm832_vm6, %v5144_v40, %v836_v7 }
  0x9b   : > { %3438 = vrot.lane.b32.xlu0 %v3437_v36, %s3536_s12  ;;  %3443 = vrot.lane.b32.xlu1 %v3442_v61, %s3536_s12 }
  0x9f   : > { %3448 = vrot.lane.b32.xlu0 %v3447_v50, %s3536_s12  ;;  %3453 = vrot.lane.b32.xlu1 %v3452_v54, %s3536_s12 }
  0xb0   : > { %v3224_v36 = vpop.permute.xlu1 %3223 }
  0xb1   : > { %v3209_v56 = vpop.permute.xlu0 %3208  ;;  %v3226_v62 = vunpack.i.h.bf16 %v3224_v36  ;;  %v3225_v14 = vunpack.i.l.bf16 %v3224_v36 }
  0xb2   : > { %v3211_v6 = vunpack.i.h.bf16 %v3209_v56  ;;  %v3210_v13 = vunpack.i.l.bf16 %v3209_v56 }
  0xb3   : > { %v1305_v35 = vsel %vm476_vm0, %v4313_v37, %v3225_v14  ;;  %v1306_v7 = vsel %vm476_vm0, %v4316_v52, %v3226_v62  ;;  %v3476_v52 = vld [vmem:[%s5079_s1 + $0xc8] sm:$0xff]  }
  0xb4   : > { %v1313_v61 = vsel %vm476_vm0, %v4270_v5, %v3210_v13  ;;  %v1314_v63 = vsel %vm476_vm0, %v837_v28, %v3211_v6  ;;  %v4461_v40 = vpack.c.bf16 %v1306_v7, %v1305_v35  ;;  %v3475_v13 = vld [vmem:[%s5079_s1 + $0x80] sm:$0xff]  }
  0xb5   : > { %v3214_v38 = vpop.permute.xlu0 %3213  ;;  %v1382_v50 = vpack.c.bf16 %v1314_v63, %v1313_v61 }
  0xb6   : > { %v3216_v54 = vunpack.i.h.bf16 %v3214_v38  ;;  %v3215_v23 = vunpack.i.l.bf16 %v3214_v38  ;;  %v3477_v38 = vld [vmem:[%s5079_s1 + $0x88] sm:$0xff]  }
  0xb7   : > { %1815 = vmatprep.mubr.bf16.mxu0 %v1382_v50  ;;  %v3239_v62 = vpop.permute.xlu1 %3238 }
  0xb8   : > { %1816 = vmatmul.mubr.bf16.vlgmr.msra.gmra.mrb[0].mxu0 %v1381_v15  ;;  %v1337_v5 = vsel %vm476_vm0, %v4304_v46, %v3215_v23  ;;  %v1338_v56 = vsel %vm476_vm0, %v4307_v60, %v3216_v54  ;;  %v3491_v23 = vld [vmem:[%s5079_s1 + $0x110] sm:$0xff]   ;;  %v3240_v35 = vunpack.i.l.bf16 %v3239_v62 }
  0xb9   : > { %v3229_v28 = vpop.permute.xlu0 %3228  ;;  %v1431_v6 = vpack.c.bf16 %v1338_v56, %v1337_v5  ;;  %3142 = vmatpush3.bf16.msra.mxu0 %v3987_v29  ;;  %v3478_v54 = vld [vmem:[%s5079_s1 + $0xd0] sm:$0xff]  }
  0xba   : > { %v3231_v37 = vunpack.i.h.bf16 %v3229_v28  ;;  %v3230_v36 = vunpack.i.l.bf16 %v3229_v28  ;;  %3143 = vmatprep.subr.bf16.mxu0 %v3487_v18  ;;  %v1339_v5 = vsel %vm476_vm0, %v4395_v8, %v3240_v35 }
  0xbb   : > { %1911 = vmatprep.mubr.bf16.mxu1 %v1431_v6  ;;  %v3479_v6 = vld [vmem:[%s5079_s1 + $0x90] sm:$0xff]  }
  0xbc   : > { %1912 = vmatmul.mubr.bf16.vlgmr.msra.gmra.mrb[0].mxu1 %v4461_v40  ;;  %v1315_v15 = vsel %vm476_vm0, %v4049_v41, %v3230_v36  ;;  %v1316_v29 = vsel %vm476_vm0, %v4059_v59, %v3231_v37  ;;  %v3492_v41 = vld [vmem:[%s5079_s1 + $0x118] sm:$0xff]   ;;  %v3241_v59 = vunpack.i.h.bf16 %v3239_v62 }
  0xbd   : > { %3010 = vmatpush3.bf16.msra.mxu1 %v3475_v13  ;;  %v3234_v61 = vpop.permute.xlu0 %3233  ;;  %v1387_v63 = vpack.c.bf16 %v1316_v29, %v1315_v15  ;;  %3144 = vmatpush3.bf16.msra.mxu0 %v3487_v18  ;;  %v3244_v13 = vpop.permute.xlu1 %3243  ;;  %v1430_v15 = vpack.c.bf16 %v4398_v9, %v4395_v8  ;;  %v3524_v8 = vld [vmem:[#allocation2 + $0x1f0] sm:$0xff] }
  0xbe   : > { %v3236_v14 = vunpack.i.h.bf16 %v3234_v61  ;;  %v3235_v50 = vunpack.i.l.bf16 %v3234_v61  ;;  %3011 = vmatprep.subr.bf16.mxu1 %v3476_v52  ;;  %3145 = vmatprep.subr.bf16.mxu0 %v3491_v23  ;;  %v1340_v56 = vsel %vm476_vm0, %v4398_v9, %v3241_v59  ;;  %v3245_v36 = vunpack.i.l.bf16 %v3244_v13 }
  0xbf   : > { %1823 = vmatprep.mubr.bf16.mxu0 %v1387_v63  ;;  %v1435_v37 = vpack.c.bf16 %v1340_v56, %v1339_v5  ;;  %v3483_v5 = vld [vmem:[%s5079_s1 + $0xa0] sm:$0xff]  }
  0xc0   : > { %v1283_v7 = vsel %vm476_vm0, %v3814_v20, %v3235_v50  ;;  %v1284_v18 = vsel %vm476_vm0, %v3817_v21, %v3236_v14  ;;  %v3480_v20 = vld [vmem:[%s5079_s1 + $0xd8] sm:$0xff]   ;;  %v3246_v21 = vunpack.i.h.bf16 %v3244_v13  ;;  %v1434_v13 = vpack.c.bf16 %v4405_v2, %v4402_v48 }
  0xc1   : > { %3012 = vmatpush3.bf16.msra.mxu1 %v3477_v38  ;;  %v1386_v28 = vpack.c.bf16 %v1284_v18, %v1283_v7  ;;  %3146 = vmatpush3.bf16.msra.mxu0 %v3491_v23  ;;  %v3249_v52 = vpop.permute.xlu0 %3248  ;;  %v1307_v23 = vsel %vm476_vm0, %v3822_v25, %v3245_v36  ;;  %v3481_v38 = vld [vmem:[%s5079_s1 + $0x98] sm:$0xff]   ;;  %v3482_v25 = vld [vmem:[%s5079_s1 + $0xe0] sm:$0xff]   ;;  %v3259_v59 = vpop.permute.xlu1 %3258 }
  0xc2   : > { %3013 = vmatprep.subr.bf16.mxu1 %v3478_v54  ;;  %3147 = vmatprep.subr.bf16.mxu0 %v3492_v41  ;;  %v3251_v29 = vunpack.i.h.bf16 %v3249_v52  ;;  %v3250_v61 = vunpack.i.l.bf16 %v3249_v52  ;;  %v1308_v63 = vsel %vm476_vm0, %v3825_v26, %v3246_v21  ;;  %v3261_v7 = vunpack.i.h.bf16 %v3259_v59 }
  0xc3   : > { %1824 = vmatmul.mubr.bf16.gmra.mrb[4].mxu0 %v1386_v28  ;;  %1919 = vmatprep.mubr.bf16.mxu1 %v1435_v37  ;;  %v4510_v62 = vpack.c.bf16 %v1308_v63, %v1307_v23  ;;  %v3260_v18 = vunpack.i.l.bf16 %v3259_v59  ;;  %v3485_v63 = vld [vmem:[%s5079_s1 + $0xa8] sm:$0xff]   ;;  %v3486_v59 = vld [vmem:[%s5079_s1 + $0xf0] sm:$0xff]  }
  0xc4   : > { %v1317_v14 = vsel %vm476_vm0, %v4091_v44, %v3250_v61  ;;  %v1318_v50 = vsel %vm476_vm0, %v4106_v39, %v3251_v29 }
  0xc5   : > { %3014 = vmatpush3.bf16.msra.mxu1 %v3479_v6  ;;  %3148 = vmatpush3.bf16.msra.mxu0 %v3492_v41  ;;  %v3254_v26 = vpop.permute.xlu0 %3253  ;;  %v1391_v54 = vpack.c.bf16 %v1318_v50, %v1317_v14  ;;  %v3484_v6 = vld [vmem:[%s5079_s1 + $0xe8] sm:$0xff]   ;;  %v1341_v37 = vsel %vm476_vm0, %v4402_v48, %v3260_v18  ;;  %v963_v14 = vrot.slane %v4429_v43, 7 }
  0xc6   : > { %3015 = vmatprep.subr.bf16.mxu1 %v3480_v20  ;;  %1920 = vmatmul.mubr.bf16.gmra.mrb[4].mxu1 %v4510_v62  ;;  %v3256_v35 = vunpack.i.h.bf16 %v3254_v26  ;;  %v3255_v41 = vunpack.i.l.bf16 %v3254_v26  ;;  %v1342_v20 = vsel %vm476_vm0, %v4405_v2, %v3261_v7  ;;  %v5171_v2 = vld [vmem:[#allocation25_spill] sm:$0xff] }
  0xc7   : > { %1831 = vmatprep.mubr.bf16.mxu0 %v1391_v54  ;;  %v1439_v36 = vpack.c.bf16 %v1342_v20, %v1341_v37  ;;  %v3488_v37 = vld [vmem:[%s5079_s1 + $0xb0] sm:$0xff]  }
  0xc8   : > { %v1285_v56 = vsel %vm476_vm0, %v3876_v57, %v3255_v41  ;;  %v1286_v28 = vsel %vm476_vm0, %v3879_v58, %v3256_v35  ;;  %v3264_v57 = vpop.permute.xlu1 %3263 }
  0xc9   : > { %3016 = vmatpush3.bf16.msra.mxu1 %v3481_v38  ;;  %v4536_v21 = vpack.c.bf16 %v1286_v28, %v1285_v56  ;;  %v3269_v52 = vpop.permute.xlu0 %3268  ;;  %v3266_v58 = vunpack.i.h.bf16 %v3264_v57  ;;  %v3265_v29 = vunpack.i.l.bf16 %v3264_v57  ;;  %1927 = vmatprep.mubr.bf16.mxu1 %v1439_v36  ;;  %v965_v38 = vrot.slane %v4431_v10, 7 }
  0xca   : > { %3017 = vmatprep.subr.bf16.mxu1 %v3482_v25  ;;  %v3271_v61 = vunpack.i.h.bf16 %v3269_v52  ;;  %v3270_v23 = vunpack.i.l.bf16 %v3269_v52 }
  0xcb   : > { %1832 = vmatmul.mubr.bf16.gmra.mrb[8].mxu0 %v4536_v21  ;;  %v1309_v50 = vsel %vm476_vm0, %v3916_v32, %v3265_v29  ;;  %v1310_v25 = vsel %vm476_vm0, %v3919_v33, %v3266_v58  ;;  %v973_v32 = vrot.slane %v4431_v10, 1  ;;  %v4566_v20 = vsel %vm703_vm7, %v963_v14, %v965_v38  ;;  %v3489_v58 = vld [vmem:[%s5079_s1 + $0xf8] sm:$0xff]  }
  0xcc   : > { %v1319_v26 = vsel %vm476_vm0, %v4136_v51, %v3270_v23  ;;  %v1320_v54 = vsel %vm476_vm0, %v4139_v34, %v3271_v61  ;;  %v3279_v35 = vpop.permute.xlu1 %3278  ;;  %v4555_v41 = vpack.c.bf16 %v1310_v25, %v1309_v50  ;;  %v654_v29 = vld [vmem:[#allocation2 + $0x238] sm:$0x1] }
  0xcd   : > { %3018 = vmatpush3.bf16.msra.mxu1 %v3483_v5  ;;  %v3274_v7 = vpop.permute.xlu0 %3273  ;;  %v1395_v18 = vpack.c.bf16 %v1320_v54, %v1319_v26  ;;  %v972_v5 = vrot.slane %v4429_v43, 1  ;;  %v3281_v33 = vunpack.i.h.bf16 %v3279_v35  ;;  %v3280_v56 = vunpack.i.l.bf16 %v3279_v35 }
  0xce   : > { %3019 = vmatprep.subr.bf16.mxu1 %v3484_v6  ;;  %v3276_v28 = vunpack.i.h.bf16 %v3274_v7  ;;  %v3275_v6 = vunpack.i.l.bf16 %v3274_v7  ;;  %1928 = vmatmul.mubr.bf16.gmra.mrb[8].mxu1 %v4555_v41 }
  0xcf   : > { %1839 = vmatprep.mubr.bf16.mxu0 %v1395_v18  ;;  %v1343_v10 = vsel %vm476_vm0, %v4415_v42, %v3280_v56  ;;  %v1344_v57 = vsel %vm476_vm0, %v4418_v1, %v3281_v33  ;;  %v4580_v38 = vsel %vm832_vm6, %v972_v5, %v973_v32 }
  0xd0   : > { %v1287_v36 = vsel %vm476_vm0, %v3946_v12, %v3275_v6  ;;  %v1288_v52 = vsel %vm476_vm0, %v3954_v55, %v3276_v28  ;;  %v3284_v61 = vpop.permute.xlu1 %3283  ;;  %v1443_v23 = vpack.c.bf16 %v1344_v57, %v1343_v10  ;;  %v3490_v12 = vld [vmem:[%s5079_s1 + $0xb8] sm:$0xff]   ;;  %v975_v55 = vrot.slane %v654_v29, 1 }
  0xd1   : > { %3020 = vmatpush3.bf16.msra.mxu1 %v3485_v63  ;;  %v1389_v63 = vpack.c.bf16 %v1288_v52, %v1287_v36  ;;  %v3286_v50 = vunpack.i.h.bf16 %v3284_v61  ;;  %v3285_v25 = vunpack.i.l.bf16 %v3284_v61  ;;  %v3289_v26 = vpop.permute.xlu0 %3288  ;;  %v3499_v61 = vld [vmem:[#allocation2 + $0x30] sm:$0xff] }
  0xd2   : > { %3021 = vmatprep.subr.bf16.mxu1 %v3486_v59  ;;  %1935 = vmatprep.mubr.bf16.mxu1 %v1443_v23  ;;  %v4590_v35 = vsel %vm832_vm6, %v973_v32, %v975_v55  ;;  %v3291_v7 = vunpack.i.h.bf16 %v3289_v26  ;;  %v3290_v18 = vunpack.i.l.bf16 %v3289_v26  ;;  %vm2394_vm6 = vcmask 519168  }
  0xd3   : > { %1840 = vmatmul.mubr.bf16.gmra.mrb[12].mxu0 %v1389_v63  ;;  %v1311_v54 = vsel %vm476_vm0, %v3974_v16, %v3285_v25  ;;  %v1312_v59 = vsel %vm476_vm0, %v3990_v30, %v3286_v50  ;;  %v3500_v50 = vld [vmem:[#allocation2 + $0x28] sm:$0xff] }
  0xd4   : > { %v4592_v5 = vpack.c.bf16 %v1312_v59, %v1311_v54  ;;  %v3294_v33 = vpop.permute.xlu1 %3293  ;;  %v1321_v16 = vsel %vm476_vm0, %v4163_v19, %v3290_v18  ;;  %v1322_v30 = vsel %vm476_vm0, %v4168_v3, %v3291_v7  ;;  %v5145_v59 = vld [vmem:[#allocation13_spill] sm:$0xff] }
  0xd5   : > { %3022 = vmatpush3.bf16.msra.mxu1 %v3488_v37  ;;  %v3296_v28 = vunpack.i.h.bf16 %v3294_v33  ;;  %v3295_v6 = vunpack.i.l.bf16 %v3294_v33  ;;  %v3299_v32 = vpop.permute.xlu0 %3298  ;;  %v1399_v37 = vpack.c.bf16 %v1322_v30, %v1321_v16  ;;  %v5146_v16 = vld [vmem:[#allocation5_spill] sm:$0xff] }
  0xd6   : > { %3023 = vmatprep.subr.bf16.mxu1 %v3489_v58  ;;  %1936 = vmatmul.mubr.bf16.gmra.mrb[12].mxu1 %v4592_v5  ;;  %v3301_v36 = vunpack.i.h.bf16 %v3299_v32  ;;  %v3300_v52 = vunpack.i.l.bf16 %v3299_v32  ;;  %v5147_v32 = vld [vmem:[#allocation6_spill] sm:$0xff] }
  0xd7   : > { %1976 = vmatprep.mubr.bf16.mxu1 %v4536_v21  ;;  %v1289_v10 = vsel %vm476_vm0, %v4005_v49, %v3295_v6  ;;  %v1290_v57 = vsel %vm476_vm0, %v4014_v53, %v3296_v28  ;;  %1847 = vmatprep.mubr.bf16.mxu0 %v1399_v37 }
  0xd8   : > { %v1393_v58 = vpack.c.bf16 %v1290_v57, %v1289_v10  ;;  %v3304_v29 = vpop.permute.xlu1 %3303  ;;  %v1346_v23 = vsel %vm476_vm0, %v3499_v61, %v3301_v36  ;;  %v1345_v25 = vsel %vm476_vm0, %v3500_v50, %v3300_v52  ;;  %v3501_v57 = vld [vmem:[#allocation2 + $0x48] sm:$0xff]  ;;  %v3502_v52 = vld [vmem:[#allocation2 + $0x50] sm:$0xff] }
  0xd9   : > { %3024 = vmatpush3.bf16.msra.mxu1 %v3490_v12  ;;  %v3306_v21 = vunpack.i.h.bf16 %v3304_v29  ;;  %v3305_v12 = vunpack.i.l.bf16 %v3304_v29  ;;  %v1383_v55 = vpack.c.bf16 %v1346_v23, %v1345_v25  ;;  %v3309_v26 = vpop.permute.xlu0 %3308 }
  0xda   : > { %v3311_v49 = vunpack.i.h.bf16 %v3309_v26  ;;  %v3310_v54 = vunpack.i.l.bf16 %v3309_v26  ;;  %v5148_v26 = vld [vmem:[#allocation17_spill] sm:$0xff] }
  0xdb   : > { %1848 = vmatmul.mubr.bf16.gmra.mrb[16].mxu0 %v1393_v58  ;;  %v1323_v53 = vsel %vm476_vm0, %v4202_v47, %v3305_v12  ;;  %v1324_v7 = vsel %vm476_vm0, %v5145_v59, %v3306_v21 }
  0xdc   : > { %v3314_v18 = vpop.permute.xlu1 %3313  ;;  %v1403_v33 = vpack.c.bf16 %v1324_v7, %v1323_v53  ;;  %v1291_v30 = vsel %vm476_vm0, %v5146_v16, %v3310_v54  ;;  %v1292_v37 = vsel %vm476_vm0, %v5147_v32, %v3311_v49  ;;  %v5150_v53 = vld [vmem:[#allocation7_spill] sm:$0xff] }
  0xdd   : > { %v3316_v28 = vunpack.i.h.bf16 %v3314_v18  ;;  %v3315_v6 = vunpack.i.l.bf16 %v3314_v18  ;;  %v1397_v10 = vpack.c.bf16 %v1292_v37, %v1291_v30  ;;  %v3319_v61 = vpop.permute.xlu0 %3318  ;;  %v5151_v18 = vld [vmem:[#allocation8_spill] sm:$0xff] }
  0xde   : > { %1977 = vmatmul.mubr.bf16.vlgmr.msra.gmra.mrb[16].mxu1 %v1383_v55  ;;  %1855 = vmatprep.mubr.bf16.mxu0 %v1403_v33  ;;  %v3321_v25 = vunpack.i.h.bf16 %v3319_v61  ;;  %v3320_v21 = vunpack.i.l.bf16 %v3319_v61  ;;  %v3504_v61 = vld [vmem:[#allocation2 + $0x70] sm:$0xff] }
  0xdf   : > { %1984 = vmatprep.mubr.bf16.mxu1 %v1389_v63  ;;  %v1347_v36 = vsel %vm476_vm0, %v3501_v57, %v3315_v6  ;;  %v1348_v29 = vsel %vm476_vm0, %v3502_v52, %v3316_v28  ;;  %v5149_v63 = vld [vmem:[#allocation18_spill] sm:$0xff]  ;;  %v3503_v52 = vld [vmem:[#allocation2 + $0x68] sm:$0xff] }
  0xe0   : > { %v1388_v23 = vpack.c.bf16 %v1348_v29, %v1347_v36  ;;  %v3324_v50 = vpop.permute.xlu1 %3323  ;;  %v1325_v49 = vsel %vm476_vm0, %v5148_v26, %v3320_v21  ;;  %v1326_v54 = vsel %vm476_vm0, %v5149_v63, %v3321_v25 }
  0xe1   : > { %v3326_v12 = vunpack.i.h.bf16 %v3324_v50  ;;  %v3325_v55 = vunpack.i.l.bf16 %v3324_v50  ;;  %v3329_v28 = vpop.permute.xlu0 %3328  ;;  %v1407_v6 = vpack.c.bf16 %v1326_v54, %v1325_v49 }
  0xe2   : > { %v3331_v32 = vunpack.i.h.bf16 %v3329_v28  ;;  %v3330_v37 = vunpack.i.l.bf16 %v3329_v28  ;;  %v5153_v28 = vld [vmem:[#allocation10_spill] sm:$0xff] }
  0xe3   : > { %1856 = vmatmul.mubr.bf16.gmra.mrb[20].mxu0 %v1397_v10  ;;  %v1293_v7 = vsel %vm476_vm0, %v5150_v53, %v3325_v55  ;;  %v1294_v33 = vsel %vm476_vm0, %v5151_v18, %v3326_v12  ;;  %v5152_v18 = vld [vmem:[#allocation9_spill] sm:$0xff] }
  0xe4   : > { %v3334_v16 = vpop.permute.xlu1 %3333  ;;  %v1401_v30 = vpack.c.bf16 %v1294_v33, %v1293_v7  ;;  %1863 = vmatprep.mubr.bf16.mxu0 %v1407_v6  ;;  %v1349_v29 = vsel %vm476_vm0, %v3503_v52, %v3330_v37  ;;  %v1350_v50 = vsel %vm476_vm0, %v3504_v61, %v3331_v32 }
  0xe5   : > { %v3336_v57 = vunpack.i.h.bf16 %v3334_v16  ;;  %v3335_v36 = vunpack.i.l.bf16 %v3334_v16  ;;  %v3339_v12 = vpop.permute.xlu0 %3338  ;;  %v1392_v49 = vpack.c.bf16 %v1350_v50, %v1349_v29  ;;  %v3505_v29 = vld [vmem:[#allocation2 + $0x88] sm:$0xff]  ;;  %v3506_v50 = vld [vmem:[#allocation2 + $0x90] sm:$0xff] }
  0xe6   : > { %1985 = vmatmul.mubr.bf16.gmra.mrb[20].mxu1 %v1388_v23  ;;  %v3341_v54 = vunpack.i.h.bf16 %v3339_v12 }
  0xe7   : > { %1992 = vmatprep.mubr.bf16.mxu1 %v1393_v58  ;;  %v1327_v25 = vsel %vm476_vm0, %v4288_v24, %v3335_v36  ;;  %v1328_v21 = vsel %vm476_vm0, %v4294_v27, %v3336_v57  ;;  %v3340_v58 = vunpack.i.l.bf16 %v3339_v12 }
  0xe8   : > { %v3344_v23 = vpop.permute.xlu1 %3343  ;;  %v1411_v55 = vpack.c.bf16 %v1328_v21, %v1327_v25  ;;  %v1296_v6 = vsel %vm476_vm0, %v5153_v28, %v3341_v54 }
  0xe9   : > { %v3346_v53 = vunpack.i.h.bf16 %v3344_v23  ;;  %v3345_v7 = vunpack.i.l.bf16 %v3344_v23  ;;  %v1295_v33 = vsel %vm476_vm0, %v5152_v18, %v3340_v58  ;;  %v3349_v16 = vpop.permute.xlu0 %3348 }
  0xea   : > { %v3351_v37 = vunpack.i.h.bf16 %v3349_v16  ;;  %v3350_v57 = vunpack.i.l.bf16 %v3349_v16  ;;  %v1405_v36 = vpack.c.bf16 %v1296_v6, %v1295_v33  ;;  %v5155_v6 = vld [vmem:[#allocation12_spill] sm:$0xff] }
  0xeb   : > { %1864 = vmatmul.mubr.bf16.gmra.mrb[24].mxu0 %v1401_v30  ;;  %v1351_v61 = vsel %vm476_vm0, %v3505_v29, %v3345_v7  ;;  %v1352_v25 = vsel %vm476_vm0, %v3506_v50, %v3346_v53 }
  0xec   : > { %1871 = vmatprep.mubr.bf16.mxu0 %v1411_v55  ;;  %v3354_v32 = vpop.permute.xlu1 %3353  ;;  %v1329_v12 = vsel %vm476_vm0, %v4331_v4, %v3350_v57  ;;  %v1330_v23 = vsel %vm476_vm0, %v4334_v31, %v3351_v37  ;;  %v1396_v54 = vpack.c.bf16 %v1352_v25, %v1351_v61  ;;  %v3507_v61 = vld [vmem:[#allocation2 + $0xa8] sm:$0xff]  ;;  %v3508_v25 = vld [vmem:[#allocation2 + $0xb0] sm:$0xff] }
  0xed   : > { %v3355_v52 = vunpack.i.l.bf16 %v3354_v32  ;;  %v3356_v21 = vunpack.i.h.bf16 %v3354_v32  ;;  %v3359_v55 = vpop.permute.xlu0 %3358 }
  0xee   : > { %1993 = vmatmul.mubr.bf16.gmra.mrb[24].mxu1 %v1392_v49  ;;  %v1415_v49 = vpack.c.bf16 %v1330_v23, %v1329_v12  ;;  %v3360_v58 = vunpack.i.l.bf16 %v3359_v55  ;;  %v3361_v7 = vunpack.i.h.bf16 %v3359_v55 }
  0xef   : > { %2000 = vmatprep.mubr.bf16.mxu1 %v1397_v10  ;;  %v5154_v10 = vld [vmem:[#allocation11_spill] sm:$0xff]  ;;  %v1298_v16 = vsel %vm476_vm0, %v5155_v6, %v3356_v21 }
  0xf0   : > { %v3364_v18 = vpop.permute.xlu1 %3363  ;;  %v1297_v33 = vsel %vm476_vm0, %v5154_v10, %v3355_v52  ;;  %v1353_v50 = vsel %vm476_vm0, %v3507_v61, %v3360_v58  ;;  %v1354_v12 = vsel %vm476_vm0, %v3508_v25, %v3361_v7  ;;  %v3509_v61 = vld [vmem:[#allocation2 + $0xc8] sm:$0xff] }
  0xf1   : > { %v3366_v28 = vunpack.i.h.bf16 %v3364_v18  ;;  %v3365_v53 = vunpack.i.l.bf16 %v3364_v18  ;;  %v3369_v32 = vpop.permute.xlu0 %3368  ;;  %v1409_v29 = vpack.c.bf16 %v1298_v16, %v1297_v33  ;;  %v5157_v16 = vld [vmem:[#allocation15_spill] sm:$0xff] }
  0xf2   : > { %v3371_v23 = vunpack.i.h.bf16 %v3369_v32  ;;  %v3370_v55 = vunpack.i.l.bf16 %v3369_v32  ;;  %v5158_v32 = vld [vmem:[#allocation24_spill] sm:$0xff] }
  0xf3   : > { %1872 = vmatmul.mubr.bf16.gmra.mrb[28].mxu0 %v1405_v36  ;;  %v1331_v37 = vsel %vm476_vm0, %v4341_v45, %v3365_v53  ;;  %v1332_v57 = vsel %vm476_vm0, %v4344_v0, %v3366_v28  ;;  %v5156_v28 = vld [vmem:[#allocation14_spill] sm:$0xff] }
  0xf4   : > { %1879 = vmatprep.mubr.bf16.mxu0 %v1415_v49  ;;  %v3374_v52 = vpop.permute.xlu1 %3373  ;;  %v1419_v21 = vpack.c.bf16 %v1332_v57, %v1331_v37  ;;  %v1400_v49 = vpack.c.bf16 %v1354_v12, %v1353_v50  ;;  %v1299_v58 = vsel %vm476_vm0, %v5156_v28, %v3370_v55  ;;  %v3510_v12 = vld [vmem:[#allocation2 + $0xd0] sm:$0xff] }
  0xf5   : > { %v3376_v18 = vunpack.i.h.bf16 %v3374_v52  ;;  %v3375_v10 = vunpack.i.l.bf16 %v3374_v52  ;;  %v3379_v53 = vpop.permute.xlu0 %3378 }
  0xf6   : > { %2001 = vmatmul.mubr.bf16.gmra.mrb[28].mxu1 %v1396_v54  ;;  %v3381_v54 = vunpack.i.h.bf16 %v3379_v53  ;;  %v3380_v33 = vunpack.i.l.bf16 %v3379_v53 }
  0xf7   : > { %2008 = vmatprep.mubr.bf16.mxu1 %v1401_v30  ;;  %v1300_v30 = vsel %vm476_vm0, %v5157_v16, %v3371_v23  ;;  %v1355_v50 = vsel %vm476_vm0, %v3509_v61, %v3375_v10  ;;  %v1356_v55 = vsel %vm476_vm0, %v3510_v12, %v3376_v18  ;;  %v5161_v61 = vld [vmem:[#allocation26_spill] sm:$0xff] }
  0xf8   : > { %v3384_v6 = vpop.permute.xlu1 %3383  ;;  %v1333_v7 = vsel %vm476_vm0, %v4353_v17, %v3380_v33  ;;  %v1334_v37 = vsel %vm476_vm0, %v5158_v32, %v3381_v54  ;;  %v1413_v57 = vpack.c.bf16 %v1300_v30, %v1299_v58  ;;  %v1404_v33 = vpack.c.bf16 %v1356_v55, %v1355_v50  ;;  %v5159_v58 = vld [vmem:[#allocation16_spill] sm:$0xff]  ;;  %v5160_v30 = vld [vmem:[#allocation19_spill] sm:$0xff] }
  0xf9   : > { %v3389_v52 = vpop.permute.xlu0 %3388  ;;  %v3385_v53 = vunpack.i.l.bf16 %v3384_v6  ;;  %v1423_v23 = vpack.c.bf16 %v1334_v37, %v1333_v7  ;;  %v3511_v37 = vld [vmem:[#allocation2 + $0xe8] sm:$0xff] }
  0xfa   : > { %v3390_v56 = vunpack.i.l.bf16 %v3389_v52 }
  0xfb   : > { %1880 = vmatmul.mubr.bf16.gmra.mrb[32].mxu0 %v1409_v29  ;;  %v1301_v10 = vsel %vm476_vm0, %v5159_v58, %v3385_v53 }
  0xfc   : > { %1887 = vmatprep.mubr.bf16.mxu0 %v1419_v21  ;;  %v3394_v25 = vpop.permute.xlu1 %3393  ;;  %v3386_v21 = vunpack.i.h.bf16 %v3384_v6  ;;  %v1357_v50 = vsel %vm476_vm0, %v3511_v37, %v3390_v56  ;;  %v5163_v56 = vld [vmem:[#allocation23_spill] sm:$0xff] }
  0xfd   : > { %v3396_v28 = vunpack.i.h.bf16 %v3394_v25  ;;  %v3395_v16 = vunpack.i.l.bf16 %v3394_v25  ;;  %v3399_v54 = vpop.permute.xlu0 %3398 }
  0xfe   : > { %2009 = vmatmul.mubr.bf16.gmra.mrb[32].mxu1 %v1400_v49  ;;  %v3391_v49 = vunpack.i.h.bf16 %v3389_v52  ;;  %v3512_v52 = vld [vmem:[#allocation2 + $0xf0] sm:$0xff]  ;;  %v3401_v55 = vunpack.i.h.bf16 %v3399_v54  ;;  %v3400_v53 = vunpack.i.l.bf16 %v3399_v54  ;;  %v3513_v54 = vld [vmem:[#allocation2 + $0x108] sm:$0xff] }
  0xff   : > { %2016 = vmatprep.mubr.bf16.mxu1 %v1405_v36  ;;  %v1302_v36 = vsel %vm476_vm0, %v5160_v30, %v3386_v21  ;;  %v1335_v18 = vsel %vm476_vm0, %v4375_v11, %v3395_v16  ;;  %v1336_v6 = vsel %vm476_vm0, %v5161_v61, %v3396_v28 }
 0x100   : > { %v1417_v7 = vpack.c.bf16 %v1302_v36, %v1301_v10  ;;  %v1358_v12 = vsel %vm476_vm0, %v3512_v52, %v3391_v49  ;;  %v3404_v21 = vpop.permute.xlu1 %3403  ;;  %v651_v52 = vld [vmem:[#allocation2 + $0x220] sm:$0xff] }
 0x101   : > { %v3409_v25 = vpop.permute.xlu0 %3408  ;;  %v1408_v58 = vpack.c.bf16 %v1358_v12, %v1357_v50  ;;  %v3406_v30 = vunpack.i.h.bf16 %v3404_v21  ;;  %v3405_v28 = vunpack.i.l.bf16 %v3404_v21  ;;  %v1385_v50 = vpack.c.bf16 %v4106_v39, %v4091_v44  ;;  %v3515_v39 = vld [vmem:[#allocation2 + $0x128] sm:$0xff] }
 0x102   : > { %v3410_v21 = vunpack.i.l.bf16 %v3409_v25 }
 0x103   : > { %1888 = vmatmul.mubr.bf16.gmra.mrb[36].mxu0 %v1413_v57 }
 0x104   : > { %1895 = vmatprep.mubr.bf16.mxu0 %v1423_v23  ;;  %v1427_v23 = vpack.c.bf16 %v1336_v6, %v1335_v18  ;;  %v1359_v18 = vsel %vm476_vm0, %v3513_v54, %v3405_v28  ;;  %v3514_v6 = vld [vmem:[#allocation2 + $0x110] sm:$0xff]  ;;  %v1361_v28 = vsel %vm476_vm0, %v3515_v39, %v3410_v21  ;;  %v3517_v54 = vld [vmem:[#allocation2 + $0x148] sm:$0xff] }
 0x105   : > { %v4672_v16 = vpop.permute.xlu0 %3418  ;;  %v1360_v37 = vsel %vm476_vm0, %v3514_v6, %v3406_v30 }
 0x106   : > { %2017 = vmatmul.mubr.bf16.gmra.mrb[36].mxu1 %v1404_v33  ;;  %v5162_v33 = vld [vmem:[#allocation22_spill] sm:$0xff]  ;;  %v1412_v12 = vpack.c.bf16 %v1360_v37, %v1359_v18  ;;  %v1402_v37 = vpack.c.bf16 %v5149_v63, %v5148_v26  ;;  %v1410_v63 = vpack.c.bf16 %v4334_v31, %v4331_v4  ;;  %v1418_v31 = vpack.c.bf16 %v5158_v32, %v4353_v17 }
 0x107   : > { %2024 = vmatprep.mubr.bf16.mxu1 %v1409_v29  ;;  %v1303_v10 = vsel %vm476_vm0, %v5162_v33, %v3400_v53  ;;  %v1304_v29 = vsel %vm476_vm0, %v5163_v56, %v3401_v55  ;;  %v962_v55 = vrot.slane %v651_v52, 7  ;;  %v3516_v33 = vld [vmem:[#allocation2 + $0x130] sm:$0xff]  ;;  %v3421_v52 = vunpack.i.h.bf16 %v4672_v16 }
 0x108   : > { %v1421_v36 = vpack.c.bf16 %v1304_v29, %v1303_v10  ;;  %v3414_v29 = vpop.permute.xlu1 %3413 }
 0x109   : > { %v4678_v49 = vpop.permute.xlu0 %3428  ;;  %v964_v44 = vsel %vm703_vm7, %v962_v55, %v963_v14  ;;  %v3416_v43 = vunpack.i.h.bf16 %v3414_v29  ;;  %v3415_v14 = vunpack.i.l.bf16 %v3414_v29  ;;  %v5165_v55 = vld [vmem:[#allocation21_spill] sm:$0xff] }
 0x10a   : > { %v1366_v26 = vsel %vm476_vm0, %v5165_v55, %v3421_v52  ;;  %v3430_v39 = vunpack.i.l.bf16 %v4678_v49  ;;  %v3522_v29 = vld [vmem:[#allocation2 + $0x1d0] sm:$0xff] }
 0x10b   : > { %1896 = vmatmul.mubr.bf16.gmra.mrb[40].mxu0 %v1417_v7  ;;  %v1363_v18 = vsel %vm476_vm0, %v3517_v54, %v3415_v14  ;;  %v5169_v14 = vld [vmem:[#allocation3_spill] sm:$0xff] }
 0x10c   : > { %1903 = vmatprep.mubr.bf16.mxu0 %v1427_v23  ;;  %v3411_v23 = vunpack.i.h.bf16 %v3409_v25 }
 0x10d   : > { %v4684_v53 = vpop.permute.xlu0 %3438 }
 0x10e   : > { %2025 = vmatmul.mubr.bf16.gmra.mrb[40].mxu1 %v1408_v58  ;;  %v1394_v58 = vpack.c.bf16 %v4168_v3, %v4163_v19  ;;  %v1362_v25 = vsel %vm476_vm0, %v3516_v33, %v3411_v23  ;;  %v3424_v23 = vpop.permute.xlu1 %3423 }
 0x10f   : > { %2032 = vmatprep.mubr.bf16.mxu1 %v1413_v57  ;;  %v1390_v57 = vpack.c.bf16 %v4139_v34, %v4136_v51  ;;  %v1416_v34 = vpack.c.bf16 %v1362_v25, %v1361_v28  ;;  %v3426_v21 = vunpack.i.h.bf16 %v3424_v23  ;;  %v5167_v28 = vld [vmem:[#allocation28_spill] sm:$0xff] }
 0x111   : > { %v3449_v30 = vpop.permute.xlu0 %3448 }
 0x112   : > { %v3451_v10 = vunpack.i.h.bf16 %v3449_v30  ;;  %v3450_v56 = vunpack.i.l.bf16 %v3449_v30  ;;  %v3434_v32 = vpop.permute.xlu1 %3433 }
 0x113   : > { %1904 = vmatmul.mubr.bf16.gmra.mrb[44].mxu0 %v1421_v36  ;;  %v3436_v25 = vunpack.i.h.bf16 %v3434_v32 }
 0x114   : > { %3149 = vmatprep.mubr.msk.bf16.mxu0 %vm476_vm0, %v1385_v50  ;;  %v4697_v51 = vsel %vm476_vm0, %v964_v44, %v3450_v56  ;;  %v4701_v19 = vsel %vm476_vm0, %v4566_v20, %v3451_v10  ;;  %v3518_v20 = vld [vmem:[#allocation2 + $0x150] sm:$0xff]  ;;  %v3431_v44 = vunpack.i.h.bf16 %v4678_v49  ;;  %v3435_v49 = vunpack.i.l.bf16 %v3434_v32 }
 0x115   : > { %v1445_v3 = vpack.c.bf16 %v4701_v19, %v4697_v51  ;;  %v1364_v6 = vsel %vm476_vm0, %v3518_v20, %v3416_v43  ;;  %v5168_v10 = vpack.c.bf16 %v4307_v60, %v4304_v46  ;;  %v5170_v46 = vld [vmem:[#allocation4_spill] sm:$0xff]  ;;  %v1438_v20 = vpack.c.bf16 %v4418_v1, %v4415_v42 }
 0x116   : > { %2033 = vmatmul.mubr.bf16.gmra.mrb[44].mxu1 %v1412_v12  ;;  %v1420_v50 = vpack.c.bf16 %v1364_v6, %v1363_v18  ;;  %v3420_v12 = vunpack.i.l.bf16 %v4672_v16  ;;  %v1370_v17 = vsel %vm476_vm0, %v5167_v28, %v3431_v44  ;;  %v3444_v43 = vpop.permute.xlu1 %3443  ;;  %v3523_v6 = vld [vmem:[#allocation2 + $0x1e8] sm:$0xff] }
 0x117   : > { %2040 = vmatprep.mubr.bf16.mxu1 %v1417_v7  ;;  %v1398_v7 = vpack.c.bf16 %v5145_v59, %v4202_v47  ;;  %v1406_v47 = vpack.c.bf16 %v4294_v27, %v4288_v24  ;;  %v5164_v59 = vld [vmem:[#allocation20_spill] sm:$0xff]  ;;  %v1414_v24 = vpack.c.bf16 %v4344_v0, %v4341_v45  ;;  %v1422_v0 = vpack.c.bf16 %v5161_v61, %v4375_v11  ;;  %v5166_v45 = vld [vmem:[#allocation27_spill] sm:$0xff] }
 0x118   : > { %v3519_v27 = vld [vmem:[#allocation2 + $0x188] sm:$0xff]  ;;  %v3441_v11 = vunpack.i.h.bf16 %v4684_v53  ;;  %v3445_v54 = vunpack.i.l.bf16 %v3444_v43 }
 0x119   : > { %v3521_v61 = vld [vmem:[#allocation2 + $0x1c8] sm:$0xff] }
 0x11a   : > { %v1371_v56 = vsel %vm476_vm0, %v3521_v61, %v3435_v49  ;;  %v1378_v60 = vsel %vm476_vm0, %v5170_v46, %v3441_v11  ;;  %v3525_v42 = vld [vmem:[#allocation2 + $0x208] sm:$0xff] }
 0x11b   : > { %3150 = vmatmul.mubr.msk.bf16.vlgmr.msra.gmra.mrb[48].mxu0 %vm476_vm0, %v1390_v57  ;;  %v3425_v57 = vunpack.i.l.bf16 %v3424_v23 }
 0x11c   : > { %3153 = vmatprep.mubr.msk.bf16.mxu0 %vm476_vm0, %v1394_v58  ;;  %v3520_v58 = vld [vmem:[#allocation2 + $0x190] sm:$0xff] }
 0x11d   : > { %v1368_v4 = vsel %vm476_vm0, %v3520_v58, %v3426_v21 }
 0x11e   : > { %2041 = vmatmul.mubr.bf16.gmra.mrb[48].mxu1 %v1416_v34  ;;  %v1372_v34 = vsel %vm476_vm0, %v3522_v29, %v3436_v25 }
 0x11f   : > { %2048 = vmatprep.mubr.bf16.mxu1 %v1421_v36  ;;  %v1365_v36 = vsel %vm476_vm0, %v5164_v59, %v3420_v12  ;;  %v3526_v12 = vld [vmem:[#allocation2 + $0x210] sm:$0xff]  ;;  %v5173_v59 = vpack.c.bf16 %v4590_v35, %v4580_v38 }
 0x120   : > { %v1424_v16 = vpack.c.bf16 %v1366_v26, %v1365_v36 }
 0x123   : > { %3154 = vmatmul.mubr.msk.bf16.gmra.mrb[52].mxu0 %vm476_vm0, %v1398_v7 }
 0x124   : > { %3157 = vmatprep.mubr.msk.bf16.mxu0 %vm476_vm0, %v1402_v37  ;;  %v1373_v37 = vsel %vm476_vm0, %v3523_v6, %v3445_v54 }
 0x126   : > { %2049 = vmatmul.mubr.bf16.gmra.mrb[52].mxu1 %v1420_v50 }
 0x127   : > { %2056 = vmatprep.mubr.bf16.mxu1 %v4461_v40  ;;  %v1367_v40 = vsel %vm476_vm0, %v3519_v27, %v3425_v57 }
 0x128   : > { %v1428_v30 = vpack.c.bf16 %v1368_v4, %v1367_v40 }
 0x12b   : > { %3158 = vmatmul.mubr.msk.bf16.gmra.mrb[56].mxu0 %vm476_vm0, %v1406_v47 }
 0x12c   : > { %3161 = vmatprep.mubr.msk.bf16.mxu0 %vm476_vm0, %v1410_v63 }
 0x12e   : > { %2057 = vmatmul.mubr.bf16.gmra.mrb[56].mxu1 %v1424_v16 }
 0x12f   : > { %2064 = vmatprep.mubr.bf16.mxu1 %v4510_v62  ;;  %v1369_v62 = vsel %vm476_vm0, %v5166_v45, %v3430_v39 }
 0x130   : > { %v1432_v33 = vpack.c.bf16 %v1370_v17, %v1369_v62 }
 0x133   : > { %3162 = vmatmul.mubr.msk.bf16.gmra.mrb[60].mxu0 %vm476_vm0, %v1414_v24 }
 0x134   : > { %3165 = vmatprep.mubr.msk.bf16.mxu0 %vm476_vm0, %v1418_v31 }
 0x136   : > { %2065 = vmatmul.mubr.bf16.gmra.mrb[60].mxu1 %v1428_v30 }
 0x137   : > { %2072 = vmatprep.mubr.bf16.mxu1 %v4555_v41  ;;  %v3440_v41 = vunpack.i.l.bf16 %v4684_v53  ;;  %v1436_v53 = vpack.c.bf16 %v1372_v34, %v1371_v56 }
 0x139   : > { %v1377_v7 = vsel %vm476_vm0, %v5169_v14, %v3440_v41 }
 0x13a   : > { %v1441_v18 = vpack.c.bf16 %v1378_v60, %v1377_v7 }
 0x13b   : > { %3166 = vmatmul.mubr.msk.bf16.gmra.mrb[64].mxu0 %vm476_vm0, %v1422_v0 }
 0x13c   : > { %3169 = vmatprep.mubr.msk.bf16.mxu0 %vm476_vm0, %v5168_v10 }
 0x13e   : > { %2073 = vmatmul.mubr.bf16.gmra.mrb[64].mxu1 %v1432_v33 }
 0x13f   : > { %2080 = vmatprep.mubr.bf16.mxu1 %v4592_v5  ;;  %v3446_v5 = vunpack.i.h.bf16 %v3444_v43 }
 0x141   : > { %v1374_v9 = vsel %vm476_vm0, %v3524_v8, %v3446_v5 }
 0x142   : > { %v1440_v50 = vpack.c.bf16 %v1374_v9, %v1373_v37 }
 0x143   : > { %3170 = vmatmul.mubr.msk.bf16.gmra.mrb[68].mxu0 %vm476_vm0, %v1430_v15  ;;  %v3454_v15 = vpop.permute.xlu1 %3453 }
 0x144   : > { %3173 = vmatprep.mubr.msk.bf16.mxu0 %vm476_vm0, %v1434_v13  ;;  %v3456_v52 = vunpack.i.h.bf16 %v3454_v15  ;;  %v3455_v48 = vunpack.i.l.bf16 %v3454_v15  ;;  %v5172_v13 = vpack.c.bf16 %v4364_v22, %v5171_v2 }
 0x146   : > { %2081 = vmatmul.mubr.bf16.gmra.mrb[68].mxu1 %v1436_v53  ;;  %v1375_v1 = vsel %vm476_vm0, %v3525_v42, %v3455_v48  ;;  %v1376_v47 = vsel %vm476_vm0, %v3526_v12, %v3456_v52 }
 0x147   : > { %2088 = vmatprep.mubr.bf16.mxu1 %v1441_v18  ;;  %v1444_v36 = vpack.c.bf16 %v1376_v47, %v1375_v1 }
 0x14b   : > { %3174 = vmatmul.mubr.msk.bf16.gmra.mrb[72].mxu0 %vm476_vm0, %v1438_v20 }
 0x14c   : > { %3177 = vmatprep.mubr.msk.bf16.mxu0 %vm476_vm0, %v5172_v13 }
 0x14e   : > { %2089 = vmatmul.mubr.bf16.gmra.mrb[72].mxu1 %v1440_v50 }
 0x14f   : > { %2096 = vmatprep.mubr.bf16.mxu1 %v1445_v3 }
 0x153   : > { %3178 = vmatmul.mubr.msk.bf16.gmra.mrb[76].mxu0 %vm476_vm0, %v5173_v59 }
 0x156   : > { %2097 = vmatmul.mubr.bf16.gmra.mrb[76].mxu1 %v1444_v36 }
 0x18b   : > { %v2913_v22 = vpop.f32.mrb[0].mxu0 }
 0x18c   : > { %v2914_v55 = vpop.f32.mrb[1].mxu0 }
 0x18d   : > { %v2915_v26 = vadd.f32 %v2914_v55, %v2913_v22  ;;  %v2916_v63 = vpop.f32.mrb[2].mxu0 }
 0x18e   : > { %v2917_v23 = vpop.f32.mrb[3].mxu0 }
 0x18f   : > { %v2918_v51 = vadd.f32 %v2917_v23, %v2916_v63  ;;  %v2985_v19 = vpop.f32.mrb[0].mxu1 }
 0x190   : > { %v2986_v3 = vpop.f32.mrb[1].mxu1 }
 0x191   : > { %v4786_v16 = vadd.f32 %v2986_v3, %v2985_v19  ;;  %v2988_v21 = vpop.f32.mrb[2].mxu1 }
 0x192   : > { %v2989_v57 = vpop.f32.mrb[3].mxu1 }
 0x193   : > { %v4788_v24 = vadd.f32 %v2989_v57, %v2988_v21 }
 0x196   : > { %v2919_v27 = vpop.f32.mrb[4].mxu0 }
 0x197   : > { %v2920_v38 = vpop.f32.mrb[5].mxu0 }
 0x198   : > { %v2921_v35 = vadd.f32 %v2920_v38, %v2919_v27  ;;  %v2922_v40 = vpop.f32.mrb[6].mxu0 }
 0x199   : > { %v2923_v58 = vpop.f32.mrb[7].mxu0  ;;  %v2991_v31 = vpop.f32.mrb[4].mxu1 }
 0x19a   : > { %v2924_v4 = vadd.f32 %v2923_v58, %v2922_v40  ;;  %v2992_v30 = vpop.f32.mrb[5].mxu1 }
 0x19b   : > { %v4790_v44 = vadd.f32 %v2992_v30, %v2991_v31  ;;  %v2994_v39 = vpop.f32.mrb[6].mxu1 }
 0x19c   : > { %v2995_v0 = vpop.f32.mrb[7].mxu1 }
 0x19d   : > { %v4792_v45 = vadd.f32 %v2995_v0, %v2994_v39 }
 0x19e   : > { %v2925_v62 = vpop.f32.mrb[8].mxu0 }
 0x19f   : > { %v2926_v28 = vpop.f32.mrb[9].mxu0 }
 0x1a0   : > { %v4794_v17 = vadd.f32 %v2926_v28, %v2925_v62  ;;  %v2928_v32 = vpop.f32.mrb[10].mxu0 }
 0x1a1   : > { %v2929_v33 = vpop.f32.mrb[11].mxu0  ;;  %v2997_v49 = vpop.f32.mrb[8].mxu1 }
 0x1a2   : > { %v4796_v25 = vadd.f32 %v2929_v33, %v2928_v32  ;;  %v2998_v10 = vpop.f32.mrb[9].mxu1 }
 0x1a3   : > { %v4798_v11 = vadd.f32 %v2998_v10, %v2997_v49  ;;  %v3000_v41 = vpop.f32.mrb[10].mxu1 }
 0x1a4   : > { %v3001_v61 = vpop.f32.mrb[11].mxu1 }
 0x1a5   : > { %v4800_v56 = vadd.f32 %v3001_v61, %v3000_v41 }
 0x1a6   : > { %v2931_v29 = vpop.f32.mrb[12].mxu0 }
 0x1a7   : > { %v2932_v34 = vpop.f32.mrb[13].mxu0 }
 0x1a8   : > { %v4802_v43 = vadd.f32 %v2932_v34, %v2931_v29  ;;  %v2934_v14 = vpop.f32.mrb[14].mxu0 }
 0x1a9   : > { %v2935_v7 = vpop.f32.mrb[15].mxu0  ;;  %v3003_v46 = vpop.f32.mrb[12].mxu1 }
 0x1aa   : > { %v4804_v60 = vadd.f32 %v2935_v7, %v2934_v14  ;;  %v3004_v53 = vpop.f32.mrb[13].mxu1 }
 0x1ab   : > { %v4806_v5 = vadd.f32 %v3004_v53, %v3003_v46  ;;  %v3006_v54 = vpop.f32.mrb[14].mxu1 }
 0x1ac   : > { %v3007_v18 = vpop.f32.mrb[15].mxu1 }
 0x1ad   : > { %v4808_v20 = vadd.f32 %v3007_v18, %v3006_v54 }
 0x1ae   : > { %v2937_v6 = vpop.f32.mrb[16].mxu0 }
 0x1af   : > { %v2938_v37 = vpop.f32.mrb[17].mxu0 }
 0x1b0   : > { %v4810_v8 = vadd.f32 %v2938_v37, %v2937_v6  ;;  %v2940_v9 = vpop.f32.mrb[18].mxu0 }
 0x1b1   : > { %v2941_v15 = vpop.f32.mrb[19].mxu0  ;;  %v3025_v50 = vpop.f32.mrb[16].mxu1 }
 0x1b2   : > { %v4812_v52 = vadd.f32 %v2941_v15, %v2940_v9  ;;  %v3026_v48 = vpop.f32.mrb[17].mxu1 }
 0x1b3   : > { %v3027_v2 = vadd.f32 %v3026_v48, %v3025_v50  ;;  %v3028_v13 = vpop.f32.mrb[18].mxu1 }
 0x1b4   : > { %v3029_v42 = vpop.f32.mrb[19].mxu1 }
 0x1b5   : > { %v3030_v1 = vadd.f32 %v3029_v42, %v3028_v13  ;;  %v4814_v47 = vadd.f32 %v3027_v2, %v2915_v26 }
 0x1b6   : > { %v2943_v12 = vpop.f32.mrb[20].mxu0 }
 0x1b7   : > { %v2944_v59 = vpop.f32.mrb[21].mxu0  ;;  %v4818_v55 = vadd.f32 %v3030_v1, %v2918_v51 }
 0x1b8   : > { %v4816_v36 = vadd.f32 %v2944_v59, %v2943_v12  ;;  %v2946_v22 = vpop.f32.mrb[22].mxu0 }
 0x1b9   : > { %v2947_v63 = vpop.f32.mrb[23].mxu0  ;;  %v3031_v23 = vpop.f32.mrb[20].mxu1 }
 0x1ba   : > { %v4820_v19 = vadd.f32 %v2947_v63, %v2946_v22  ;;  %v3032_v3 = vpop.f32.mrb[21].mxu1 }
 0x1bb   : > { %v3033_v21 = vadd.f32 %v3032_v3, %v3031_v23  ;;  %v3034_v57 = vpop.f32.mrb[22].mxu1 }
 0x1bc   : > { %v3035_v27 = vpop.f32.mrb[23].mxu1 }
 0x1bd   : > { %v3036_v38 = vadd.f32 %v3035_v27, %v3034_v57  ;;  %v4822_v58 = vadd.f32 %v3033_v21, %v2921_v35 }
 0x1be   : > { %v2949_v40 = vpop.f32.mrb[24].mxu0 }
 0x1bf   : > { %v2950_v26 = vpop.f32.mrb[25].mxu0  ;;  %v4826_v39 = vadd.f32 %v3036_v38, %v2924_v4 }
 0x1c0   : > { %v4824_v31 = vadd.f32 %v2950_v26, %v2949_v40  ;;  %v2952_v30 = vpop.f32.mrb[26].mxu0 }
 0x1c1   : > { %v2953_v51 = vpop.f32.mrb[27].mxu0  ;;  %v3037_v0 = vpop.f32.mrb[24].mxu1 }
 0x1c2   : > { %v4828_v62 = vadd.f32 %v2953_v51, %v2952_v30  ;;  %v3038_v28 = vpop.f32.mrb[25].mxu1 }
 0x1c3   : > { %v3039_v32 = vadd.f32 %v3038_v28, %v3037_v0  ;;  %v3040_v33 = vpop.f32.mrb[26].mxu1 }
 0x1c4   : > { %v3041_v49 = vpop.f32.mrb[27].mxu1 }
 0x1c5   : > { %v3042_v10 = vadd.f32 %v3041_v49, %v3040_v33  ;;  %v4831_v61 = vadd.f32 %v3039_v32, %v4794_v17 }
 0x1c6   : > { %v2955_v41 = vpop.f32.mrb[28].mxu0 }
 0x1c7   : > { %v2956_v35 = vpop.f32.mrb[29].mxu0  ;;  %v4836_v4 = vadd.f32 %v3042_v10, %v4796_v25 }
 0x1c8   : > { %v4833_v29 = vadd.f32 %v2956_v35, %v2955_v41  ;;  %v2958_v34 = vpop.f32.mrb[30].mxu0 }
 0x1c9   : > { %v2959_v14 = vpop.f32.mrb[31].mxu0  ;;  %v3043_v7 = vpop.f32.mrb[28].mxu1 }
 0x1ca   : > { %v4838_v46 = vadd.f32 %v2959_v14, %v2958_v34  ;;  %v3044_v53 = vpop.f32.mrb[29].mxu1 }
 0x1cb   : > { %v3045_v54 = vadd.f32 %v3044_v53, %v3043_v7  ;;  %v3046_v18 = vpop.f32.mrb[30].mxu1 }
 0x1cc   : > { %v3047_v6 = vpop.f32.mrb[31].mxu1 }
 0x1cd   : > { %v3048_v37 = vadd.f32 %v3047_v6, %v3046_v18  ;;  %v4841_v17 = vadd.f32 %v3045_v54, %v4802_v43 }
 0x1ce   : > { %v2961_v9 = vpop.f32.mrb[32].mxu0 }
 0x1cf   : > { %v2962_v15 = vpop.f32.mrb[33].mxu0  ;;  %v4846_v25 = vadd.f32 %v3048_v37, %v4804_v60 }
 0x1d0   : > { %v4843_v50 = vadd.f32 %v2962_v15, %v2961_v9  ;;  %v2964_v48 = vpop.f32.mrb[34].mxu0 }
 0x1d1   : > { %v2965_v2 = vpop.f32.mrb[35].mxu0  ;;  %v3049_v13 = vpop.f32.mrb[32].mxu1 }
 0x1d2   : > { %v4848_v42 = vadd.f32 %v2965_v2, %v2964_v48  ;;  %v3050_v1 = vpop.f32.mrb[33].mxu1 }
 0x1d3   : > { %v3051_v12 = vadd.f32 %v3050_v1, %v3049_v13  ;;  %v3052_v59 = vpop.f32.mrb[34].mxu1 }
 0x1d4   : > { %v3053_v22 = vpop.f32.mrb[35].mxu1 }
 0x1d5   : > { %v3054_v63 = vadd.f32 %v3053_v22, %v3052_v59  ;;  %v4851_v43 = vadd.f32 %v3051_v12, %v4810_v8 }
 0x1d6   : > { %v2967_v23 = vpop.f32.mrb[36].mxu0 }
 0x1d7   : > { %v2968_v3 = vpop.f32.mrb[37].mxu0  ;;  %v4856_v60 = vadd.f32 %v3054_v63, %v4812_v52 }
 0x1d8   : > { %v4853_v21 = vadd.f32 %v2968_v3, %v2967_v23  ;;  %v2970_v57 = vpop.f32.mrb[38].mxu0 }
 0x1d9   : > { %v2971_v27 = vpop.f32.mrb[39].mxu0  ;;  %v3055_v38 = vpop.f32.mrb[36].mxu1 }
 0x1da   : > { %v4858_v40 = vadd.f32 %v2971_v27, %v2970_v57  ;;  %v3056_v26 = vpop.f32.mrb[37].mxu1 }
 0x1db   : > { %v3057_v30 = vadd.f32 %v3056_v26, %v3055_v38  ;;  %v3058_v51 = vpop.f32.mrb[38].mxu1 }
 0x1dc   : > { %v3059_v0 = vpop.f32.mrb[39].mxu1 }
 0x1dd   : > { %v3060_v28 = vadd.f32 %v3059_v0, %v3058_v51  ;;  %v4861_v8 = vadd.f32 %v3057_v30, %v4816_v36 }
 0x1de   : > { %v2973_v32 = vpop.f32.mrb[40].mxu0 }
 0x1df   : > { %v2974_v33 = vpop.f32.mrb[41].mxu0  ;;  %v4866_v52 = vadd.f32 %v3060_v28, %v4820_v19 }
 0x1e0   : > { %v4863_v49 = vadd.f32 %v2974_v33, %v2973_v32  ;;  %v2976_v10 = vpop.f32.mrb[42].mxu0 }
 0x1e1   : > { %v2977_v41 = vpop.f32.mrb[43].mxu0  ;;  %v3061_v35 = vpop.f32.mrb[40].mxu1 }
 0x1e2   : > { %v4868_v34 = vadd.f32 %v2977_v41, %v2976_v10  ;;  %v3062_v14 = vpop.f32.mrb[41].mxu1 }
 0x1e3   : > { %v3063_v7 = vadd.f32 %v3062_v14, %v3061_v35  ;;  %v3064_v53 = vpop.f32.mrb[42].mxu1 }
 0x1e4   : > { %v3065_v54 = vpop.f32.mrb[43].mxu1 }
 0x1e5   : > { %v3066_v18 = vadd.f32 %v3065_v54, %v3064_v53  ;;  %v4872_v6 = vadd.f32 %v3063_v7, %v4824_v31 }
 0x1e6   : > { %v2979_v36 = vpop.f32.mrb[44].mxu0 }
 0x1e7   : > { %v2980_v37 = vpop.f32.mrb[45].mxu0  ;;  %v4877_v15 = vadd.f32 %v3066_v18, %v4828_v62 }
 0x1e8   : > { %v4874_v9 = vadd.f32 %v2980_v37, %v2979_v36  ;;  %v2982_v19 = vpop.f32.mrb[46].mxu0 }
 0x1e9   : > { %v2983_v48 = vpop.f32.mrb[47].mxu0  ;;  %v3067_v2 = vpop.f32.mrb[44].mxu1 }
 0x1ea   : > { %v4879_v13 = vadd.f32 %v2983_v48, %v2982_v19  ;;  %v3068_v1 = vpop.f32.mrb[45].mxu1 }
 0x1eb   : > { %v3069_v12 = vadd.f32 %v3068_v1, %v3067_v2  ;;  %v3070_v59 = vpop.f32.mrb[46].mxu1 }
 0x1ec   : > { %v3071_v22 = vpop.f32.mrb[47].mxu1 }
 0x1ed   : > { %v3072_v63 = vadd.f32 %v3071_v22, %v3070_v59  ;;  %v4882_v23 = vadd.f32 %v3069_v12, %v4833_v29 }
 0x1ee   : > { %v3151_v31 = vpop.f32.mrb[48].mxu0 }
 0x1ef   : > { %v2148_v3 = vadd.f32 %v3151_v31, %v4822_v58  ;;  %v2139_v57 = vpop.f32.mrb[49].mxu0  ;;  %v4892_v38 = vadd.f32 %v3072_v63, %v4838_v46 }
 0x1f0   : > { %v2140_v62 = vadd.f32 %v2139_v57, %v4814_v47  ;;  %v3152_v27 = vpop.f32.mrb[50].mxu0 }
 0x1f1   : > { %v2788_v26 = vpack.c.bf16 %v2148_v3, %v2148_v3  ;;  %v2151_v29 = vadd.f32 %v3152_v27, %v4826_v39  ;;  %v2142_v58 = vpop.f32.mrb[51].mxu0  ;;  %v3073_v30 = vpop.f32.mrb[48].mxu1  ;;  %v2498_v35 = vmul.f32 %v2148_v3, %v2148_v3  ;;  %v2430_v53 = vsel %vm476_vm0, %v2148_v3, 0.0 }
 0x1f2   : > { %v2786_v51 = vpack.c.bf16 %v2140_v62, %v2140_v62  ;;  %v2143_v0 = vadd.f32 %v2142_v58, %v4818_v55  ;;  %v2496_v28 = vmul.f32 %v2140_v62, %v2140_v62  ;;  %v3074_v32 = vpop.f32.mrb[49].mxu1  ;;  %v2427_v47 = vsel %vm476_vm0, %v2140_v62, 0.0 }
 0x1f3   : > { %2397 = vst.msk [vmem:[%s4888_s23 + $0x8] sm:$0xf] %vm2394_vm6, %v2788_v26  ;;  %v2789_v33 = vpack.c.bf16 %v2151_v29, %v2151_v29  ;;  %v3075_v46 = vadd.f32 %v3074_v32, %v3073_v30  ;;  %v3076_v10 = vpop.f32.mrb[50].mxu1  ;;  %v2499_v54 = vmul.f32 %v2151_v29, %v2151_v29  ;;  %v2432_v59 = vsel %vm476_vm0, %v2151_v29, 0.0 }
 0x1f4   : > { %2395 = vst.msk [vmem:[%s4888_s23] sm:$0xf] %vm2394_vm6, %v2786_v51  ;;  %v2787_v41 = vpack.c.bf16 %v2143_v0, %v2143_v0  ;;  %v2428_v39 = vsel %vm476_vm0, %v2143_v0, 0.0  ;;  %v2497_v55 = vmul.f32 %v2143_v0, %v2143_v0  ;;  %v3077_v7 = vpop.f32.mrb[51].mxu1  ;;  %v2528_v19 = vsel %vm476_vm0, %v2496_v28, 0.0 }
 0x1f5   : > { %2398 = vst.msk [vmem:[%s4888_s23 + $0xc] sm:$0xf] %vm2394_vm6, %v2789_v33  ;;  %v2429_v14 = vadd.f32 %v2428_v39, %v2427_v47  ;;  %v3078_v18 = vadd.f32 %v3077_v7, %v3076_v10  ;;  %v4908_v37 = vadd.f32 %v3075_v46, %v4843_v50  ;;  %v2531_v50 = vsel %vm476_vm0, %v2498_v35, 0.0 }
 0x1f6   : > { %2396 = vst.msk [vmem:[%s4888_s23 + $0x4] sm:$0xf] %vm2394_vm6, %v2787_v41  ;;  %v3155_v36 = vpop.f32.mrb[52].mxu0  ;;  %v2529_v2 = vsel %vm476_vm0, %v2497_v55, 0.0  ;;  %v2533_v29 = vsel %vm476_vm0, %v2499_v54, 0.0 }
 0x1f7   : > { %v2431_v48 = vadd.f32 %v2430_v53, %v2429_v14  ;;  %v2164_v1 = vadd.f32 %v3155_v36, %v4841_v17  ;;  %v2155_v12 = vpop.f32.mrb[53].mxu0  ;;  %v2530_v22 = vadd.f32 %v2529_v2, %v2528_v19  ;;  %v4916_v3 = vadd.f32 %v3078_v18, %v4848_v42 }
 0x1f8   : > { %v2156_v63 = vadd.f32 %v2155_v12, %v4831_v61  ;;  %v3156_v31 = vpop.f32.mrb[54].mxu0 }
 0x1f9   : > { %v2792_v57 = vpack.c.bf16 %v2164_v1, %v2164_v1  ;;  %v2433_v62 = vadd.f32 %v2432_v59, %v2431_v48  ;;  %v2158_v27 = vpop.f32.mrb[55].mxu0  ;;  %v2532_v26 = vadd.f32 %v2531_v50, %v2530_v22  ;;  %v3079_v58 = vpop.f32.mrb[52].mxu1  ;;  %v2167_v42 = vadd.f32 %v3156_v31, %v4846_v25 }
 0x1fa   : > { %v2790_v17 = vpack.c.bf16 %v2156_v63, %v2156_v63  ;;  %v2434_v30 = vsel %vm476_vm0, %v2156_v63, 0.0  ;;  %v2500_v51 = vmul.f32 %v2156_v63, %v2156_v63  ;;  %v3080_v0 = vpop.f32.mrb[53].mxu1  ;;  %v2159_v28 = vadd.f32 %v2158_v27, %v4836_v4 }
 0x1fb   : > { %2401 = vst.msk [vmem:[%s4888_s23 + $0x18] sm:$0xf] %vm2394_vm6, %v2792_v57  ;;  %v2435_v61 = vadd.f32 %v2434_v30, %v2433_v62  ;;  %v2534_v32 = vadd.f32 %v2533_v29, %v2532_v26  ;;  %v3081_v47 = vadd.f32 %v3080_v0, %v3079_v58  ;;  %v3082_v46 = vpop.f32.mrb[54].mxu1  ;;  %v2502_v10 = vmul.f32 %v2164_v1, %v2164_v1 }
 0x1fc   : > { %2399 = vst.msk [vmem:[%s4888_s23 + $0x10] sm:$0xf] %vm2394_vm6, %v2790_v17  ;;  %v2535_v33 = vsel %vm476_vm0, %v2500_v51, 0.0  ;;  %v2793_v41 = vpack.c.bf16 %v2167_v42, %v2167_v42  ;;  %v2791_v39 = vpack.c.bf16 %v2159_v28, %v2159_v28  ;;  %v3083_v35 = vpop.f32.mrb[55].mxu1  ;;  %v2436_v55 = vsel %vm476_vm0, %v2159_v28, 0.0 }
 0x1fd   : > { %v2536_v14 = vadd.f32 %v2535_v33, %v2534_v32  ;;  %v2501_v7 = vmul.f32 %v2159_v28, %v2159_v28  ;;  %v3084_v25 = vadd.f32 %v3083_v35, %v3082_v46  ;;  %v2438_v4 = vsel %vm476_vm0, %v2164_v1, 0.0 }
 0x1fe   : > { %v3159_v53 = vpop.f32.mrb[56].mxu0  ;;  %2402 = vst.msk [vmem:[%s4888_s23 + $0x1c] sm:$0xf] %vm2394_vm6, %v2793_v41  ;;  %2400 = vst.msk [vmem:[%s4888_s23 + $0x14] sm:$0xf] %vm2394_vm6, %v2791_v39  ;;  %v2437_v54 = vadd.f32 %v2436_v55, %v2435_v61  ;;  %v4936_v19 = vadd.f32 %v3081_v47, %v4853_v21  ;;  %v2503_v48 = vmul.f32 %v2167_v42, %v2167_v42  ;;  %v2539_v22 = vsel %vm476_vm0, %v2502_v10, 0.0 }
 0x1ff   : > { %v2180_v18 = vadd.f32 %v3159_v53, %v4861_v8  ;;  %v2171_v36 = vpop.f32.mrb[57].mxu0  ;;  %v2537_v2 = vsel %vm476_vm0, %v2501_v7, 0.0  ;;  %v4941_v1 = vadd.f32 %v3084_v25, %v4858_v40  ;;  %v2440_v21 = vsel %vm476_vm0, %v2167_v42, 0.0 }
 0x200   : > { %v2172_v12 = vadd.f32 %v2171_v36, %v4851_v43  ;;  %v3160_v59 = vpop.f32.mrb[58].mxu0  ;;  %v2439_v63 = vadd.f32 %v2438_v4, %v2437_v54  ;;  %v2538_v31 = vadd.f32 %v2537_v2, %v2536_v14  ;;  %v2541_v51 = vsel %vm476_vm0, %v2503_v48, 0.0 }
 0x201   : > { %v2796_v8 = vpack.c.bf16 %v2180_v18, %v2180_v18  ;;  %v2174_v50 = vpop.f32.mrb[59].mxu0  ;;  %v3085_v57 = vpop.f32.mrb[56].mxu1  ;;  %v2183_v17 = vadd.f32 %v3160_v59, %v4866_v52  ;;  %v2506_v29 = vmul.f32 %v2180_v18, %v2180_v18  ;;  %v2446_v28 = vsel %vm476_vm0, %v2180_v18, 0.0 }
 0x202   : > { %v2794_v62 = vpack.c.bf16 %v2172_v12, %v2172_v12  ;;  %v2442_v27 = vsel %vm476_vm0, %v2172_v12, 0.0  ;;  %v2504_v26 = vmul.f32 %v2172_v12, %v2172_v12  ;;  %v2540_v58 = vadd.f32 %v2539_v22, %v2538_v31  ;;  %v3086_v40 = vpop.f32.mrb[57].mxu1 }
 0x203   : > { %2405 = vst.msk [vmem:[%s4888_s23 + $0x28] sm:$0xf] %vm2394_vm6, %v2796_v8  ;;  %v2441_v43 = vadd.f32 %v2440_v21, %v2439_v63  ;;  %v2175_v30 = vadd.f32 %v2174_v50, %v4856_v60  ;;  %v3087_v0 = vadd.f32 %v3086_v40, %v3085_v57  ;;  %v3088_v42 = vpop.f32.mrb[58].mxu1  ;;  %v2797_v47 = vpack.c.bf16 %v2183_v17, %v2183_v17 }
 0x204   : > { %2403 = vst.msk [vmem:[%s4888_s23 + $0x20] sm:$0xf] %vm2394_vm6, %v2794_v62  ;;  %v2543_v61 = vsel %vm476_vm0, %v2504_v26, 0.0  ;;  %v2542_v33 = vadd.f32 %v2541_v51, %v2540_v58  ;;  %v3089_v46 = vpop.f32.mrb[59].mxu1  ;;  %v2507_v52 = vmul.f32 %v2183_v17, %v2183_v17  ;;  %v2547_v53 = vsel %vm476_vm0, %v2506_v29, 0.0 }
 0x205   : > { %v2443_v32 = vadd.f32 %v2442_v27, %v2441_v43  ;;  %v2795_v10 = vpack.c.bf16 %v2175_v30, %v2175_v30  ;;  %v2444_v60 = vsel %vm476_vm0, %v2175_v30, 0.0  ;;  %v2505_v41 = vmul.f32 %v2175_v30, %v2175_v30  ;;  %2406 = vst.msk [vmem:[%s4888_s23 + $0x2c] sm:$0xf] %vm2394_vm6, %v2797_v47 }
 0x206   : > { %v3163_v39 = vpop.f32.mrb[60].mxu0  ;;  %v2544_v35 = vadd.f32 %v2543_v61, %v2542_v33  ;;  %v3090_v55 = vadd.f32 %v3089_v46, %v3088_v42  ;;  %v4965_v36 = vadd.f32 %v3087_v0, %v4863_v49  ;;  %v2448_v48 = vsel %vm476_vm0, %v2183_v17, 0.0 }
 0x207   : > { %v2445_v14 = vadd.f32 %v2444_v60, %v2443_v32  ;;  %v2196_v7 = vadd.f32 %v3163_v39, %v4882_v23  ;;  %v2187_v25 = vpop.f32.mrb[61].mxu0  ;;  %2404 = vst.msk [vmem:[%s4888_s23 + $0x24] sm:$0xf] %vm2394_vm6, %v2795_v10  ;;  %v2545_v4 = vsel %vm476_vm0, %v2505_v41, 0.0  ;;  %v2549_v22 = vsel %vm476_vm0, %v2507_v52, 0.0 }
 0x208   : > { %v2188_v54 = vadd.f32 %v2187_v25, %v4872_v6  ;;  %v3164_v18 = vpop.f32.mrb[62].mxu0  ;;  %v2546_v12 = vadd.f32 %v2545_v4, %v2544_v35  ;;  %v4978_v40 = vadd.f32 %v3090_v55, %v4868_v34 }
 0x209   : > { %v2447_v2 = vadd.f32 %v2446_v28, %v2445_v14  ;;  %v2800_v23 = vpack.c.bf16 %v2196_v7, %v2196_v7  ;;  %v2190_v59 = vpop.f32.mrb[63].mxu0  ;;  %v3091_v63 = vpop.f32.mrb[60].mxu1  ;;  %v2199_v57 = vadd.f32 %v3164_v18, %v4892_v38  ;;  %v2510_v27 = vmul.f32 %v2196_v7, %v2196_v7 }
 0x20a   : > { %v2798_v31 = vpack.c.bf16 %v2188_v54, %v2188_v54  ;;  %v2450_v8 = vsel %vm476_vm0, %v2188_v54, 0.0  ;;  %v2508_v50 = vmul.f32 %v2188_v54, %v2188_v54  ;;  %v2548_v21 = vadd.f32 %v2547_v53, %v2546_v12  ;;  %v3092_v49 = vpop.f32.mrb[61].mxu1 }
 0x20b   : > { %2409 = vst.msk [vmem:[%s4888_s23 + $0x38] sm:$0xf] %vm2394_vm6, %v2800_v23  ;;  %v2449_v6 = vadd.f32 %v2448_v48, %v2447_v2  ;;  %v2191_v62 = vadd.f32 %v2190_v59, %v4877_v15  ;;  %v3093_v58 = vadd.f32 %v3092_v49, %v3091_v63  ;;  %v3094_v43 = vpop.f32.mrb[62].mxu1  ;;  %v2454_v17 = vsel %vm476_vm0, %v2196_v7, 0.0 }
 0x20c   : > { %2407 = vst.msk [vmem:[%s4888_s23 + $0x30] sm:$0xf] %vm2394_vm6, %v2798_v31  ;;  %v2551_v26 = vsel %vm476_vm0, %v2508_v50, 0.0  ;;  %v2550_v51 = vadd.f32 %v2549_v22, %v2548_v21  ;;  %v2801_v29 = vpack.c.bf16 %v2199_v57, %v2199_v57  ;;  %v3095_v38 = vpop.f32.mrb[63].mxu1  ;;  %v2511_v61 = vmul.f32 %v2199_v57, %v2199_v57 }
 0x20d   : > { %v2451_v30 = vadd.f32 %v2450_v8, %v2449_v6  ;;  %v2799_v15 = vpack.c.bf16 %v2191_v62, %v2191_v62  ;;  %v2452_v0 = vsel %vm476_vm0, %v2191_v62, 0.0  ;;  %v2509_v42 = vmul.f32 %v2191_v62, %v2191_v62 }
 0x20e   : > { %v3167_v28 = vpop.f32.mrb[64].mxu0  ;;  %v2552_v32 = vadd.f32 %v2551_v26, %v2550_v51  ;;  %2410 = vst.msk [vmem:[%s4888_s23 + $0x3c] sm:$0xf] %vm2394_vm6, %v2801_v29  ;;  %v3096_v47 = vadd.f32 %v3095_v38, %v3094_v43  ;;  %v2555_v52 = vsel %vm476_vm0, %v2510_v27, 0.0  ;;  %v2067_v39 = vadd.f32 %v3093_v58, %v4874_v9 }
 0x20f   : > { %v2453_v33 = vadd.f32 %v2452_v0, %v2451_v30  ;;  %v2212_v34 = vadd.f32 %v3167_v28, %v4936_v19  ;;  %v2203_v46 = vpop.f32.mrb[65].mxu0  ;;  %2408 = vst.msk [vmem:[%s4888_s23 + $0x34] sm:$0xf] %vm2394_vm6, %v2799_v15  ;;  %v2553_v10 = vsel %vm476_vm0, %v2509_v42, 0.0  ;;  %v2456_v35 = vsel %vm476_vm0, %v2199_v57, 0.0 }
 0x210   : > { %v2204_v60 = vadd.f32 %v2203_v46, %v4908_v37  ;;  %v3168_v41 = vpop.f32.mrb[66].mxu0  ;;  %v2554_v55 = vadd.f32 %v2553_v10, %v2552_v32  ;;  %v2557_v25 = vsel %vm476_vm0, %v2511_v61, 0.0  ;;  %v2070_v31 = vadd.f32 %v3096_v47, %v4879_v13 }
 0x211   : > { %v2455_v14 = vadd.f32 %v2454_v17, %v2453_v33  ;;  %v2804_v7 = vpack.c.bf16 %v2212_v34, %v2212_v34  ;;  %v2206_v19 = vpop.f32.mrb[67].mxu0  ;;  %v3097_v53 = vpop.f32.mrb[64].mxu1  ;;  %v2215_v9 = vadd.f32 %v3168_v41, %v4941_v1  ;;  %v2514_v23 = vmul.f32 %v2212_v34, %v2212_v34 }
 0x212   : > { %v2802_v4 = vpack.c.bf16 %v2204_v60, %v2204_v60  ;;  %v2458_v54 = vsel %vm476_vm0, %v2204_v60, 0.0  ;;  %v2512_v18 = vmul.f32 %v2204_v60, %v2204_v60  ;;  %v2556_v48 = vadd.f32 %v2555_v52, %v2554_v55  ;;  %v3098_v2 = vpop.f32.mrb[65].mxu1 }
 0x213   : > { %2413 = vst.msk [vmem:[%s4888_s23 + $0x48] sm:$0xf] %vm2394_vm6, %v2804_v7  ;;  %v2457_v37 = vadd.f32 %v2456_v35, %v2455_v14  ;;  %v2207_v12 = vadd.f32 %v2206_v19, %v4916_v3  ;;  %v3099_v22 = vadd.f32 %v3098_v2, %v3097_v53  ;;  %v3100_v63 = vpop.f32.mrb[66].mxu1  ;;  %v2462_v8 = vsel %vm476_vm0, %v2212_v34, 0.0 }
 0x214   : > { %2411 = vst.msk [vmem:[%s4888_s23 + $0x40] sm:$0xf] %vm2394_vm6, %v2802_v4  ;;  %v2559_v59 = vsel %vm476_vm0, %v2512_v18, 0.0  ;;  %v2558_v21 = vadd.f32 %v2557_v25, %v2556_v48  ;;  %v2805_v6 = vpack.c.bf16 %v2215_v9, %v2215_v9  ;;  %v3101_v49 = vpop.f32.mrb[67].mxu1  ;;  %v2515_v1 = vmul.f32 %v2215_v9, %v2215_v9 }
 0x215   : > { %v2459_v50 = vadd.f32 %v2458_v54, %v2457_v37  ;;  %v2803_v57 = vpack.c.bf16 %v2207_v12, %v2207_v12  ;;  %v2460_v3 = vsel %vm476_vm0, %v2207_v12, 0.0  ;;  %v2513_v62 = vmul.f32 %v2207_v12, %v2207_v12 }
 0x216   : > { %v3171_v27 = vpop.f32.mrb[68].mxu0  ;;  %v2560_v26 = vadd.f32 %v2559_v59, %v2558_v21  ;;  %2414 = vst.msk [vmem:[%s4888_s23 + $0x4c] sm:$0xf] %vm2394_vm6, %v2805_v6  ;;  %v3102_v43 = vadd.f32 %v3101_v49, %v3100_v63  ;;  %v2563_v30 = vsel %vm476_vm0, %v2514_v23, 0.0  ;;  %v2075_v61 = vadd.f32 %v3099_v22, %v4786_v16 }
 0x217   : > { %v2461_v58 = vadd.f32 %v2460_v3, %v2459_v50  ;;  %v2228_v17 = vadd.f32 %v3171_v27, %v2067_v39  ;;  %v2219_v13 = vpop.f32.mrb[69].mxu0  ;;  %2412 = vst.msk [vmem:[%s4888_s23 + $0x44] sm:$0xf] %vm2394_vm6, %v2803_v57  ;;  %v2561_v51 = vsel %vm476_vm0, %v2513_v62, 0.0  ;;  %v2464_v15 = vsel %vm476_vm0, %v2215_v9, 0.0 }
 0x218   : > { %v2220_v29 = vadd.f32 %v2219_v13, %v4965_v36  ;;  %v3172_v38 = vpop.f32.mrb[70].mxu0  ;;  %v2562_v42 = vadd.f32 %v2561_v51, %v2560_v26  ;;  %v2565_v33 = vsel %vm476_vm0, %v2515_v1, 0.0  ;;  %v2078_v7 = vadd.f32 %v3102_v43, %v4788_v24 }
 0x219   : > { %v2463_v0 = vadd.f32 %v2462_v8, %v2461_v58  ;;  %v2808_v28 = vpack.c.bf16 %v2228_v17, %v2228_v17  ;;  %v2222_v32 = vpop.f32.mrb[71].mxu0  ;;  %v3103_v47 = vpop.f32.mrb[68].mxu1  ;;  %v2231_v16 = vadd.f32 %v3172_v38, %v2070_v31  ;;  %v2518_v39 = vmul.f32 %v2228_v17, %v2228_v17 }
 0x21a   : > { %v2806_v34 = vpack.c.bf16 %v2220_v29, %v2220_v29  ;;  %v2466_v46 = vsel %vm476_vm0, %v2220_v29, 0.0  ;;  %v2516_v52 = vmul.f32 %v2220_v29, %v2220_v29  ;;  %v2564_v10 = vadd.f32 %v2563_v30, %v2562_v42  ;;  %v3104_v60 = vpop.f32.mrb[69].mxu1 }
 0x21b   : > { %2417 = vst.msk [vmem:[%s4888_s23 + $0x58] sm:$0xf] %vm2394_vm6, %v2808_v28  ;;  %v2465_v36 = vadd.f32 %v2464_v15, %v2463_v0  ;;  %v2223_v41 = vadd.f32 %v2222_v32, %v4978_v40  ;;  %v3105_v14 = vadd.f32 %v3104_v60, %v3103_v47  ;;  %v3106_v55 = vpop.f32.mrb[70].mxu1  ;;  %v2809_v53 = vpack.c.bf16 %v2231_v16, %v2231_v16 }
 0x21c   : > { %2415 = vst.msk [vmem:[%s4888_s23 + $0x50] sm:$0xf] %vm2394_vm6, %v2806_v34  ;;  %v2567_v35 = vsel %vm476_vm0, %v2516_v52, 0.0  ;;  %v2566_v25 = vadd.f32 %v2565_v33, %v2564_v10  ;;  %v3107_v4 = vpop.f32.mrb[71].mxu1  ;;  %v2519_v54 = vmul.f32 %v2231_v16, %v2231_v16  ;;  %v2470_v24 = vsel %vm476_vm0, %v2228_v17, 0.0 }
 0x21d   : > { %v2467_v19 = vadd.f32 %v2466_v46, %v2465_v36  ;;  %v2807_v18 = vpack.c.bf16 %v2223_v41, %v2223_v41  ;;  %v2468_v48 = vsel %vm476_vm0, %v2223_v41, 0.0  ;;  %v2517_v40 = vmul.f32 %v2223_v41, %v2223_v41  ;;  %2418 = vst.msk [vmem:[%s4888_s23 + $0x5c] sm:$0xf] %vm2394_vm6, %v2809_v53 }
 0x21e   : > { %v3175_v37 = vpop.f32.mrb[72].mxu0  ;;  %v2568_v2 = vadd.f32 %v2567_v35, %v2566_v25  ;;  %v3108_v12 = vadd.f32 %v3107_v4, %v3106_v55  ;;  %v2083_v23 = vadd.f32 %v3105_v14, %v4790_v44  ;;  %v2571_v22 = vsel %vm476_vm0, %v2518_v39, 0.0 }
 0x21f   : > { %v2469_v9 = vadd.f32 %v2468_v48, %v2467_v19  ;;  %v2235_v59 = vpop.f32.mrb[73].mxu0  ;;  %2416 = vst.msk [vmem:[%s4888_s23 + $0x54] sm:$0xf] %vm2394_vm6, %v2807_v18  ;;  %v2569_v63 = vsel %vm476_vm0, %v2517_v40, 0.0  ;;  %v2472_v44 = vsel %vm476_vm0, %v2231_v16, 0.0  ;;  %v2573_v26 = vsel %vm476_vm0, %v2519_v54, 0.0 }
 0x220   : > { %v2236_v31 = vadd.f32 %v2235_v59, %v2075_v61  ;;  %v3176_v8 = vpop.f32.mrb[74].mxu0  ;;  %v2570_v21 = vadd.f32 %v2569_v63, %v2568_v2  ;;  %v2244_v6 = vadd.f32 %v3175_v37, %v2083_v23  ;;  %v2086_v49 = vadd.f32 %v3108_v12, %v4792_v45 }
 0x221   : > { %v2471_v50 = vadd.f32 %v2470_v24, %v2469_v9  ;;  %v2238_v1 = vpop.f32.mrb[75].mxu0  ;;  %v3109_v57 = vpop.f32.mrb[72].mxu1 }
 0x222   : > { %v2810_v3 = vpack.c.bf16 %v2236_v31, %v2236_v31  ;;  %v2520_v62 = vmul.f32 %v2236_v31, %v2236_v31  ;;  %v2239_v27 = vadd.f32 %v2238_v1, %v2078_v7  ;;  %v2572_v58 = vadd.f32 %v2571_v22, %v2570_v21  ;;  %v3110_v13 = vpop.f32.mrb[73].mxu1 }
 0x223   : > { %v2812_v43 = vpack.c.bf16 %v2244_v6, %v2244_v6  ;;  %v2474_v17 = vsel %vm476_vm0, %v2236_v31, 0.0  ;;  %v2473_v30 = vadd.f32 %v2472_v44, %v2471_v50  ;;  %v3111_v51 = vadd.f32 %v3110_v13, %v3109_v57  ;;  %v3112_v38 = vpop.f32.mrb[74].mxu1 }
 0x224   : > { %2419 = vst.msk [vmem:[%s4888_s23 + $0x60] sm:$0xf] %vm2394_vm6, %v2810_v3  ;;  %v2575_v45 = vsel %vm476_vm0, %v2520_v62, 0.0  ;;  %v2247_v29 = vadd.f32 %v3176_v8, %v2086_v49  ;;  %v2574_v61 = vadd.f32 %v2573_v26, %v2572_v58  ;;  %v2811_v15 = vpack.c.bf16 %v2239_v27, %v2239_v27  ;;  %v3113_v42 = vpop.f32.mrb[75].mxu1 }
 0x225   : > { %2421 = vst.msk [vmem:[%s4888_s23 + $0x68] sm:$0xf] %vm2394_vm6, %v2812_v43  ;;  %v2476_v0 = vsel %vm476_vm0, %v2239_v27, 0.0  ;;  %v2522_v28 = vmul.f32 %v2244_v6, %v2244_v6  ;;  %v2475_v32 = vadd.f32 %v2474_v17, %v2473_v30  ;;  %v2521_v46 = vmul.f32 %v2239_v27, %v2239_v27 }
 0x226   : > { %v2813_v33 = vpack.c.bf16 %v2247_v29, %v2247_v29  ;;  %v3179_v47 = vpop.f32.mrb[76].mxu0  ;;  %v2576_v34 = vadd.f32 %v2575_v45, %v2574_v61  ;;  %2420 = vst.msk [vmem:[%s4888_s23 + $0x64] sm:$0xf] %vm2394_vm6, %v2811_v15  ;;  %v3114_v52 = vadd.f32 %v3113_v42, %v3112_v38  ;;  %v2091_v10 = vadd.f32 %v3111_v51, %v4798_v11 }
 0x227   : > { %v2251_v36 = vpop.f32.mrb[77].mxu0  ;;  %v2523_v60 = vmul.f32 %v2247_v29, %v2247_v29  ;;  %v2477_v16 = vadd.f32 %v2476_v0, %v2475_v32  ;;  %v2478_v39 = vsel %vm476_vm0, %v2244_v6, 0.0  ;;  %v2577_v35 = vsel %vm476_vm0, %v2521_v46, 0.0 }
 0x228   : > { %2422 = vst.msk [vmem:[%s4888_s23 + $0x6c] sm:$0xf] %vm2394_vm6, %v2813_v33  ;;  %v3180_v41 = vpop.f32.mrb[78].mxu0  ;;  %v2252_v14 = vadd.f32 %v2251_v36, %v2091_v10  ;;  %v2094_v55 = vadd.f32 %v3114_v52, %v4800_v56  ;;  %v2579_v19 = vsel %vm476_vm0, %v2522_v28, 0.0  ;;  %v2480_v25 = vsel %vm476_vm0, %v2247_v29, 0.0 }
 0x229   : > { %v2254_v7 = vpop.f32.mrb[79].mxu0  ;;  %v2479_v11 = vadd.f32 %v2478_v39, %v2477_v16  ;;  %v2578_v53 = vadd.f32 %v2577_v35, %v2576_v34  ;;  %v3115_v4 = vpop.f32.mrb[76].mxu1  ;;  %v2581_v2 = vsel %vm476_vm0, %v2523_v60, 0.0 }
 0x22a   : > { %v2814_v54 = vpack.c.bf16 %v2252_v14, %v2252_v14  ;;  %v2482_v18 = vsel %vm476_vm0, %v2252_v14, 0.0  ;;  %v2524_v48 = vmul.f32 %v2252_v14, %v2252_v14  ;;  %v3116_v40 = vpop.f32.mrb[77].mxu1  ;;  %v2255_v37 = vadd.f32 %v2254_v7, %v2094_v55 }
 0x22b   : > { %v2580_v9 = vadd.f32 %v2579_v19, %v2578_v53  ;;  %v2481_v56 = vadd.f32 %v2480_v25, %v2479_v11  ;;  %v3117_v12 = vadd.f32 %v3116_v40, %v3115_v4  ;;  %v3118_v23 = vpop.f32.mrb[78].mxu1 }
 0x22c   : > { %2423 = vst.msk [vmem:[%s4888_s23 + $0x70] sm:$0xf] %vm2394_vm6, %v2814_v54  ;;  %v2583_v59 = vsel %vm476_vm0, %v2524_v48, 0.0  ;;  %v2815_v24 = vpack.c.bf16 %v2255_v37, %v2255_v37  ;;  %v2484_v22 = vsel %vm476_vm0, %v2255_v37, 0.0  ;;  %v2525_v63 = vmul.f32 %v2255_v37, %v2255_v37  ;;  %v3119_v31 = vpop.f32.mrb[79].mxu1 }
 0x22d   : > { %v2483_v8 = vadd.f32 %v2482_v18, %v2481_v56  ;;  %v2582_v50 = vadd.f32 %v2581_v2, %v2580_v9  ;;  %v2099_v21 = vadd.f32 %v3117_v12, %v4806_v5  ;;  %v3120_v6 = vadd.f32 %v3119_v31, %v3118_v23 }
 0x22e   : > { %2424 = vst.msk [vmem:[%s4888_s23 + $0x74] sm:$0xf] %vm2394_vm6, %v2815_v24  ;;  %v2585_v49 = vsel %vm476_vm0, %v2525_v63, 0.0 }
 0x22f   : > { %v2584_v1 = vadd.f32 %v2583_v59, %v2582_v50  ;;  %v2260_v44 = vadd.f32 %v3179_v47, %v2099_v21  ;;  %v2485_v57 = vadd.f32 %v2484_v22, %v2483_v8  ;;  %v2102_v3 = vadd.f32 %v3120_v6, %v4808_v20 }
 0x231   : > { %v2816_v62 = vpack.c.bf16 %v2260_v44, %v2260_v44  ;;  %v2526_v27 = vmul.f32 %v2260_v44, %v2260_v44  ;;  %v2486_v26 = vsel %vm476_vm0, %v2260_v44, 0.0  ;;  %v2586_v58 = vadd.f32 %v2585_v49, %v2584_v1 }
 0x232   : > { %v2487_v43 = vadd.f32 %v2486_v26, %v2485_v57  ;;  %v2263_v17 = vadd.f32 %v3180_v41, %v2102_v3 }
 0x233   : > { %2425 = vst.msk [vmem:[%s4888_s23 + $0x78] sm:$0xf] %vm2394_vm6, %v2816_v62  ;;  %v2587_v5 = vsel %vm476_vm0, %v2526_v27, 0.0 }
 0x234   : > { %v2588_v13 = vadd.f32 %v2587_v5, %v2586_v58  ;;  %v2817_v30 = vpack.c.bf16 %v2263_v17, %v2263_v17  ;;  %v2488_v45 = vsel %vm476_vm0, %v2263_v17, 0.0  ;;  %v2527_v51 = vmul.f32 %v2263_v17, %v2263_v17 }
 0x235   : > { %v2489_v29 = vadd.f32 %v2488_v45, %v2487_v43 }
 0x236   : > { %2426 = vst.msk [vmem:[%s4888_s23 + $0x7c] sm:$0xf] %vm2394_vm6, %v2817_v30  ;;  %v2589_v20 = vsel %vm476_vm0, %v2527_v51, 0.0 }
 0x237   : > { %v2490_v38 = vrot.slane %v2489_v29, 4  ;;  %v2590_v61 = vadd.f32 %v2589_v20, %v2588_v13 }
 0x239   : > { %v2491_v15 = vadd.f32 %v2490_v38, %v2489_v29  ;;  %v2591_v0 = vrot.slane %v2590_v61, 4 }
 0x23b   : > { %v2492_v42 = vrot.slane %v2491_v15, 2  ;;  %v2592_v28 = vadd.f32 %v2591_v0, %v2590_v61 }
 0x23d   : > { %v2493_v32 = vadd.f32 %v2492_v42, %v2491_v15  ;;  %v2593_v33 = vrot.slane %v2592_v28, 2 }
 0x23f   : > { %v2494_v47 = vrot.slane %v2493_v32, 1  ;;  %v2594_v34 = vadd.f32 %v2593_v33, %v2592_v28 }
 0x241   : > { %v2595_v46 = vrot.slane %v2594_v34, 1  ;;  %v2495_v52 = vadd.f32 %v2494_v47, %v2493_v32 }
 0x243   : > { %v2596_v10 = vadd.f32 %v2595_v46, %v2594_v34 }
 0x245   : > { %v2597_v36 = vsel %vm703_vm7, %v2495_v52, %v2596_v10 }
 0x246   : > { %2599 = vst.msk [vmem:[%s236_s26] sm:$0x3] %vm2598_vm9, %v2597_v36 }
 0x247 PF: > { %s16_s18 = sadd.s32 1, %s3533_s18  }
 0x248   : > { %p13_p5 = scmp.ge.s32.totalorder %s16_s18, 4  }
 0x24a   :  { %15 = sbr.rel (!%p13_p5) target bundleno = 1 (0x1), region = 79 }

// kernel: res_layer.7
= control target key start
LH: loop header
LB: loop body
LE: loop exit
PB: predicated region body
PF: predicated region fallthrough
CT: control target
= control target key end

     0   :  { %s112_s0 = inlined_call_operand.vmem [shape: f32[32,128], index: 0, kind: input, shape index: {}]   ;;  %s113_s1 = inlined_call_operand.vmem [shape: f32[1,128], index: 1, kind: input, shape index: {}]   ;;  %s114_s2 = inlined_call_operand.vmem [shape: f32[1,128], index: 2, kind: input, shape index: {}]   ;;  %s115_s3 = inlined_call_operand.vmem [shape: f32[32,128], index: 3, kind: output, shape index: {}]  }
   0x1   :  { %v14_v0 = vld [vmem:[%s112_s0] sm:$0xff]  ;;  %v15_v4 = vld [vmem:[%s112_s0 + $0x8] sm:$0xff]  ;;  %v16_v5 = vld [vmem:[%s112_s0 + $0x10] sm:$0xff] }
   0x2   :  { %v60_v1 = vld [vmem:[%s113_s1] ss:$0 sm:$0xff]  ;;  %v17_v6 = vld [vmem:[%s112_s0 + $0x18] sm:$0xff] }
   0x3   :  { %v61_v2 = vld [vmem:[%s114_s2] ss:$0 sm:$0xff]  ;;  %v25_v3 = vmul.f32 %v60_v1, %v14_v0  ;;  %v26_v7 = vmul.f32 %v60_v1, %v15_v4  ;;  %v27_v8 = vmul.f32 %v60_v1, %v16_v5  ;;  %v28_v9 = vmul.f32 %v60_v1, %v17_v6 }
   0x5   :  { %v36_v10 = vadd.f32 %v61_v2, %v25_v3  ;;  %v37_v11 = vadd.f32 %v61_v2, %v26_v7  ;;  %v38_v12 = vadd.f32 %v61_v2, %v27_v8  ;;  %v39_v13 = vadd.f32 %v61_v2, %v28_v9 }
   0x7   :  { %vm40_vm0 = vcmp.ge.f32.partialorder %v36_v10, 0.0  ;;  %v44_v14 = vmul.f32 0.01, %v36_v10  ;;  %vm41_vm1 = vcmp.ge.f32.partialorder %v37_v11, 0.0  ;;  %v45_v15 = vmul.f32 0.01, %v37_v11 }
   0x8   :  { %vm42_vm2 = vcmp.ge.f32.partialorder %v38_v12, 0.0  ;;  %v46_v16 = vmul.f32 0.01, %v38_v12  ;;  %vm43_vm3 = vcmp.ge.f32.partialorder %v39_v13, 0.0  ;;  %v47_v18 = vmul.f32 0.01, %v39_v13 }
   0x9   :  { %v48_v17 = vsel %vm40_vm0, %v36_v10, %v44_v14  ;;  %v49_v19 = vsel %vm41_vm1, %v37_v11, %v45_v15 }
   0xa   :  { %52 = vst [vmem:[%s115_s3] sm:$0xff] %v48_v17  ;;  %v50_v20 = vsel %vm42_vm2, %v38_v12, %v46_v16  ;;  %53 = vst [vmem:[%s115_s3 + $0x8] sm:$0xff] %v49_v19  ;;  %v51_v21 = vsel %vm43_vm3, %v39_v13, %v47_v18 }
   0xb   :  { %54 = vst [vmem:[%s115_s3 + $0x10] sm:$0xff] %v50_v20  ;;  %55 = vst [vmem:[%s115_s3 + $0x18] sm:$0xff] %v51_v21 }

// kernel: res_layer.6
= control target key start
LH: loop header
LB: loop body
LE: loop exit
PB: predicated region body
PF: predicated region fallthrough
CT: control target
= control target key end

     0   :  { %v73_v23 = vlaneseq  ;;  %s1778_s2 = inlined_call_operand.vmem [shape: bf16[1024,128], index: 2, kind: input, shape index: {}]   ;;  %s1779_s0 = inlined_call_operand.vmem [shape: bf16[32,1024], index: 0, kind: input, shape index: {}]   ;;  %s1780_s3 = inlined_call_operand.vmem [shape: f32[1,1024], index: 3, kind: input, shape index: {}]   ;;  %s1781_s4 = inlined_call_operand.vmem [shape: f32[1,1024], index: 4, kind: input, shape index: {}]   ;;  %s1782_s1 = inlined_call_operand.vmem [shape: f32[32,128], index: 1, kind: input, shape index: {}]   ;;  %s1783_s5 = inlined_call_operand.vmem [shape: f32[32,128], index: 5, kind: output, shape index: {0}]   ;;  %s1784_s6 = inlined_call_operand.vmem [shape: f32[1,2,128], index: 6, kind: output, shape index: {1}]  }
   0x1   :  { %v1260_v0 = vld [vmem:[%s1778_s2 + $0x40] sm:$0xff]   ;;  %v1264_v4 = vld [vmem:[%s1778_s2 + $0x48] sm:$0xff]   ;;  %v1268_v8 = vld [vmem:[%s1778_s2 + $0x50] sm:$0xff]  }
   0x2   :  { %v1261_v1 = vld [vmem:[%s1778_s2 + $0xc0] sm:$0xff]   ;;  %1148 = vmatprep.subr.bf16.mxu0 %v1260_v0  ;;  %v1265_v5 = vld [vmem:[%s1778_s2 + $0xc8] sm:$0xff]   ;;  %v1269_v9 = vld [vmem:[%s1778_s2 + $0xd0] sm:$0xff]   ;;  %v1440_v28 = vshrl.u32 %v73_v23, 7 }
   0x3   :  { %v1262_v2 = vld [vmem:[%s1778_s2] sm:$0xff]   ;;  %1176 = vmatprep.subr.bf16.mxu1 %v1261_v1  ;;  %v1266_v6 = vld [vmem:[%s1778_s2 + $0x8] sm:$0xff]   ;;  %v1270_v10 = vld [vmem:[%s1778_s2 + $0x10] sm:$0xff]  }
   0x4   :  { %v1263_v3 = vld [vmem:[%s1778_s2 + $0x80] sm:$0xff]   ;;  %1149 = vmatpush3.bf16.msra.mxu0 %v1262_v2  ;;  %v1267_v7 = vld [vmem:[%s1778_s2 + $0x88] sm:$0xff]   ;;  %v1271_v11 = vld [vmem:[%s1778_s2 + $0x90] sm:$0xff]   ;;  %v79_v33 = vsub.s32 1, %v1440_v28  ;;  %v87_v35 = vsub.s32 3, %v1440_v28  ;;  %v75_v39 = vsub.s32 0, %v1440_v28 }
   0x5   :  { %1177 = vmatpush3.bf16.msra.mxu1 %v1263_v3  ;;  %1150 = vmatprep.subr.bf16.mxu0 %v1264_v4  ;;  %v1272_v12 = vld [vmem:[%s1778_s2 + $0x58] sm:$0xff]   ;;  %v1276_v16 = vld [vmem:[%s1778_s2 + $0x60] sm:$0xff]   ;;  %v1280_v20 = vld [vmem:[%s1778_s2 + $0x68] sm:$0xff]   ;;  %v83_v40 = vsub.s32 2, %v1440_v28 }
   0x6   :  { %1178 = vmatprep.subr.bf16.mxu1 %v1265_v5  ;;  %v1273_v13 = vld [vmem:[%s1778_s2 + $0xd8] sm:$0xff]   ;;  %v1277_v17 = vld [vmem:[%s1778_s2 + $0xe0] sm:$0xff]   ;;  %v1281_v21 = vld [vmem:[%s1778_s2 + $0xe8] sm:$0xff]  }
   0x7   :  { %v1274_v14 = vld [vmem:[%s1778_s2 + $0x18] sm:$0xff]   ;;  %v1278_v18 = vld [vmem:[%s1778_s2 + $0x20] sm:$0xff]   ;;  %v1282_v22 = vld [vmem:[%s1778_s2 + $0x28] sm:$0xff]  }
   0x8   :  { %1151 = vmatpush3.bf16.msra.mxu0 %v1266_v6  ;;  %v1275_v15 = vld [vmem:[%s1778_s2 + $0x98] sm:$0xff]   ;;  %v1279_v19 = vld [vmem:[%s1778_s2 + $0xa0] sm:$0xff]   ;;  %v1283_v24 = vld [vmem:[%s1778_s2 + $0xa8] sm:$0xff]  }
   0x9   :  { %1179 = vmatpush3.bf16.msra.mxu1 %v1267_v7  ;;  %1152 = vmatprep.subr.bf16.mxu0 %v1268_v8  ;;  %v1284_v25 = vld [vmem:[%s1778_s2 + $0x70] sm:$0xff]   ;;  %v1288_v30 = vld [vmem:[%s1778_s2 + $0x78] sm:$0xff]   ;;  %v23_v36 = vld [vmem:[%s1779_s0] sm:$0xff] }
   0xa   :  { %1180 = vmatprep.subr.bf16.mxu1 %v1269_v9  ;;  %v1285_v26 = vld [vmem:[%s1778_s2 + $0xf0] sm:$0xff]   ;;  %v1289_v31 = vld [vmem:[%s1778_s2 + $0xf8] sm:$0xff]   ;;  %v27_v37 = vld [vmem:[%s1779_s0 + $0x20] sm:$0xff]  ;;  %v39_v41 = vunpack.c.l.bf16 %v23_v36  ;;  %v40_v42 = vunpack.c.h.bf16 %v23_v36 }
   0xb   :  { %v1286_v27 = vld [vmem:[%s1778_s2 + $0x30] sm:$0xff]   ;;  %v1290_v32 = vld [vmem:[%s1778_s2 + $0x38] sm:$0xff]   ;;  %v1468_v38 = vld [vmem:[%s1780_s3] sm:$0xff]  ;;  %v47_v43 = vunpack.c.l.bf16 %v27_v37  ;;  %v48_v44 = vunpack.c.h.bf16 %v27_v37 }
   0xc   :  { %1153 = vmatpush3.bf16.msra.mxu0 %v1270_v10  ;;  %v1287_v29 = vld [vmem:[%s1778_s2 + $0xb0] sm:$0xff]   ;;  %v1291_v34 = vld [vmem:[%s1778_s2 + $0xb8] sm:$0xff]   ;;  %v1475_v45 = vld [vmem:[%s1781_s4] sm:$0xff]  ;;  %v1484_v48 = vrot.slane %v1468_v38, %v79_v33  ;;  %v1493_v55 = vrot.slane %v1468_v38, %v87_v35  ;;  %v1504_v60 = vrot.slane %v1468_v38, %v75_v39  ;;  %v1512_v0 = vrot.slane %v1468_v38, %v83_v40 }
   0xd   :  { %1181 = vmatpush3.bf16.msra.mxu1 %v1271_v11  ;;  %1154 = vmatprep.subr.bf16.mxu0 %v1272_v12  ;;  %v24_v46 = vld [vmem:[%s1779_s0 + $0x8] sm:$0xff]  ;;  %v1487_v49 = vrot.slane %v1475_v45, %v79_v33  ;;  %v1292_v52 = vld [vmem:[%s1778_s2 + $0x140] sm:$0xff]   ;;  %v1496_v56 = vrot.slane %v1475_v45, %v87_v35  ;;  %v1507_v61 = vrot.slane %v1475_v45, %v75_v39 }
   0xe   :  { %1182 = vmatprep.subr.bf16.mxu1 %v1273_v13  ;;  %v28_v47 = vld [vmem:[%s1779_s0 + $0x28] sm:$0xff]  ;;  %v41_v50 = vunpack.c.l.bf16 %v24_v46  ;;  %v42_v51 = vunpack.c.h.bf16 %v24_v46  ;;  %v1293_v57 = vld [vmem:[%s1778_s2 + $0x1c0] sm:$0xff]   ;;  %v114_v58 = vmul.f32 %v1484_v48, %v40_v42  ;;  %v122_v59 = vmul.f32 %v1484_v48, %v48_v44  ;;  %v1300_v42 = vld [vmem:[%s1778_s2 + $0x150] sm:$0xff]  }
   0xf   :  { %v49_v53 = vunpack.c.l.bf16 %v28_v47  ;;  %v50_v54 = vunpack.c.h.bf16 %v28_v47  ;;  %v1515_v1 = vrot.slane %v1475_v45, %v83_v40  ;;  %v113_v4 = vmul.f32 %v1504_v60, %v39_v41  ;;  %v1295_v33 = vld [vmem:[%s1778_s2 + $0x180] sm:$0xff]   ;;  %v1296_v35 = vld [vmem:[%s1778_s2 + $0x148] sm:$0xff]   ;;  %v1302_v44 = vld [vmem:[%s1778_s2 + $0x110] sm:$0xff]  }
  0x10   :  { %1155 = vmatpush3.bf16.msra.mxu0 %v1274_v14  ;;  %v116_v62 = vmul.f32 %v1493_v55, %v42_v51  ;;  %v188_v2 = vadd.f32 %v1487_v49, %v114_v58  ;;  %v196_v3 = vadd.f32 %v1487_v49, %v122_v59  ;;  %v121_v5 = vmul.f32 %v1504_v60, %v47_v43  ;;  %v1297_v37 = vld [vmem:[%s1778_s2 + $0x1c8] sm:$0xff]   ;;  %v1301_v43 = vld [vmem:[%s1778_s2 + $0x1d0] sm:$0xff]   ;;  %v1304_v47 = vld [vmem:[%s1778_s2 + $0x158] sm:$0xff]  }
  0x11   :  { %1183 = vmatpush3.bf16.msra.mxu1 %v1275_v15  ;;  %1156 = vmatprep.subr.bf16.mxu0 %v1276_v16  ;;  %v124_v63 = vmul.f32 %v1493_v55, %v50_v54  ;;  %v115_v8 = vmul.f32 %v1512_v0, %v41_v50  ;;  %v123_v9 = vmul.f32 %v1512_v0, %v49_v53  ;;  %v1298_v40 = vld [vmem:[%s1778_s2 + $0x108] sm:$0xff]   ;;  %v1303_v46 = vld [vmem:[%s1778_s2 + $0x190] sm:$0xff]   ;;  %v1305_v50 = vld [vmem:[%s1778_s2 + $0x1d8] sm:$0xff]   ;;  %v91_v53 = vsub.s32 4, %v1440_v28 }
  0x12   :  { %1184 = vmatprep.subr.bf16.mxu1 %v1277_v17  ;;  %v190_v6 = vadd.f32 %v1496_v56, %v116_v62  ;;  %vm220_vm0 = vcmp.ge.f32.partialorder %v188_v2, 0.0  ;;  %vm228_vm1 = vcmp.ge.f32.partialorder %v196_v3, 0.0  ;;  %v252_v10 = vmul.f32 0.01, %v188_v2  ;;  %v1299_v41 = vld [vmem:[%s1778_s2 + $0x188] sm:$0xff]   ;;  %v1306_v51 = vld [vmem:[%s1778_s2 + $0x118] sm:$0xff]  }
  0x13   :  { %v198_v7 = vadd.f32 %v1496_v56, %v124_v63  ;;  %v260_v11 = vmul.f32 0.01, %v196_v3  ;;  %v187_v16 = vadd.f32 %v1507_v61, %v113_v4  ;;  %v195_v17 = vadd.f32 %v1507_v61, %v121_v5  ;;  %v32_v59 = vld [vmem:[%s1779_s0 + $0x48] sm:$0xff]  ;;  %v1307_v4 = vld [vmem:[%s1778_s2 + $0x198] sm:$0xff]  }
  0x14   :  { %1157 = vmatpush3.bf16.msra.mxu0 %v1278_v18  ;;  %vm222_vm2 = vcmp.ge.f32.partialorder %v190_v6, 0.0  ;;  %v254_v12 = vmul.f32 0.01, %v190_v6  ;;  %v284_v14 = vsel %vm220_vm0, %v188_v2, %v252_v10  ;;  %v95_v54 = vsub.s32 5, %v1440_v28  ;;  %v36_v62 = vld [vmem:[%s1779_s0 + $0x68] sm:$0xff] }
  0x15   :  { %1185 = vmatpush3.bf16.msra.mxu1 %v1279_v19  ;;  %1158 = vmatprep.subr.bf16.mxu0 %v1280_v20  ;;  %vm230_vm3 = vcmp.ge.f32.partialorder %v198_v7, 0.0  ;;  %v262_v13 = vmul.f32 0.01, %v198_v7  ;;  %v292_v15 = vsel %vm228_vm1, %v196_v3, %v260_v11  ;;  %vm219_vm4 = vcmp.ge.f32.partialorder %v187_v16, 0.0 }
  0x16   :  { %1186 = vmatprep.subr.bf16.mxu1 %v1281_v21  ;;  %v320_v18 = vpack.c.bf16 %v292_v15, %v284_v14  ;;  %v286_v19 = vsel %vm222_vm2, %v190_v6, %v254_v12  ;;  %v189_v21 = vadd.f32 %v1515_v1, %v115_v8  ;;  %vm227_vm5 = vcmp.ge.f32.partialorder %v195_v17, 0.0  ;;  %v1309_v14 = vld [vmem:[%s1778_s2 + $0x1e0] sm:$0xff]  }
  0x17   :  { %v294_v20 = vsel %vm230_vm3, %v198_v7, %v262_v13  ;;  %v251_v23 = vmul.f32 0.01, %v187_v16  ;;  %v99_v2 = vsub.s32 6, %v1440_v28  ;;  %v103_v3 = vsub.s32 7, %v1440_v28  ;;  %v30_v28 = vld [vmem:[%s1779_s0 + $0x38] sm:$0xff] }
  0x18   :  { %1159 = vmatpush3.bf16.msra.mxu0 %v1282_v22  ;;  %v322_v22 = vpack.c.bf16 %v294_v20, %v286_v19  ;;  %879 = vmatprep.mubr.bf16.mxu0 %v320_v18  ;;  %vm221_vm6 = vcmp.ge.f32.partialorder %v189_v21, 0.0  ;;  %v58_v6 = vunpack.c.h.bf16 %v32_v59  ;;  %v66_v7 = vunpack.c.h.bf16 %v36_v62  ;;  %v1310_v19 = vld [vmem:[%s1778_s2 + $0x120] sm:$0xff]  }
  0x19   :  { %1187 = vmatpush3.bf16.msra.mxu1 %v1283_v24  ;;  %1160 = vmatprep.subr.bf16.mxu0 %v1284_v25  ;;  %v259_v24 = vmul.f32 0.01, %v195_v17  ;;  %v197_v25 = vadd.f32 %v1515_v1, %v123_v9  ;;  %v1308_v9 = vld [vmem:[%s1778_s2 + $0x160] sm:$0xff]   ;;  %v57_v12 = vunpack.c.l.bf16 %v32_v59  ;;  %v65_v13 = vunpack.c.l.bf16 %v36_v62 }
  0x1a   :  { %1188 = vmatprep.subr.bf16.mxu1 %v1285_v26  ;;  %v253_v26 = vmul.f32 0.01, %v189_v21  ;;  %928 = vmatprep.mubr.bf16.mxu1 %v322_v22  ;;  %v1645_v59 = vrot.slane %v1468_v38, %v91_v53 }
  0x1b   :  { %vm229_vm7 = vcmp.ge.f32.partialorder %v197_v25, 0.0  ;;  %v131_v22 = vmul.f32 %v1512_v0, %v57_v12  ;;  %v1692_v12 = vrot.slane %v1475_v45, %v99_v2 }
  0x1c   :  { %1161 = vmatpush3.bf16.msra.mxu0 %v1286_v27  ;;  %v1294_v27 = vld [vmem:[%s1778_s2 + $0x100] sm:$0xff]  }
  0x1d   :  { %1189 = vmatpush3.bf16.msra.mxu1 %v1287_v29  ;;  %1162 = vmatprep.subr.bf16.mxu0 %v1288_v30  ;;  %v283_v29 = vsel %vm219_vm4, %v187_v16, %v251_v23  ;;  %v291_v30 = vsel %vm227_vm5, %v195_v17, %v259_v24  ;;  %v132_v16 = vmul.f32 %v1493_v55, %v58_v6 }
  0x1e   :  { %1190 = vmatprep.subr.bf16.mxu1 %v1289_v31  ;;  %v261_v31 = vmul.f32 0.01, %v197_v25  ;;  %v140_v17 = vmul.f32 %v1493_v55, %v66_v7  ;;  %v139_v23 = vmul.f32 %v1512_v0, %v65_v13  ;;  %v1663_v6 = vrot.slane %v1468_v38, %v99_v2  ;;  %v1321_v7 = vld [vmem:[%s1778_s2 + $0x1f8] sm:$0xff]  }
  0x20   :  { %1163 = vmatpush3.bf16.msra.mxu0 %v1290_v32  ;;  %v285_v32 = vsel %vm221_vm6, %v189_v21, %v253_v26  ;;  %v293_v36 = vsel %vm229_vm7, %v197_v25, %v261_v31  ;;  %v214_v24 = vadd.f32 %v1496_v56, %v140_v17  ;;  %v1312_v25 = vld [vmem:[%s1778_s2 + $0x168] sm:$0xff]   ;;  %v54_v17 = vunpack.c.h.bf16 %v30_v28 }
  0x21   :  { %1191 = vmatpush3.bf16.msra.mxu1 %v1291_v34  ;;  %1204 = vmatprep.subr.bf16.mxu0 %v1292_v52  ;;  %v319_v34 = vpack.c.bf16 %v291_v30, %v283_v29  ;;  %v321_v39 = vpack.c.bf16 %v293_v36, %v285_v32  ;;  %v31_v52 = vld [vmem:[%s1779_s0 + $0x40] sm:$0xff]  ;;  %v1316_v32 = vld [vmem:[%s1778_s2 + $0x170] sm:$0xff]   ;;  %v205_v36 = vadd.f32 %v1515_v1, %v131_v22 }
  0x22   :  { %1232 = vmatprep.subr.bf16.mxu1 %v1293_v57  ;;  %v35_v57 = vld [vmem:[%s1779_s0 + $0x60] sm:$0xff]  ;;  %v56_v58 = vunpack.c.h.bf16 %v31_v52  ;;  %v55_v63 = vunpack.c.l.bf16 %v31_v52  ;;  %vm246_vm12 = vcmp.ge.f32.partialorder %v214_v24, 0.0  ;;  %v278_v31 = vmul.f32 0.01, %v214_v24  ;;  %v1318_v52 = vld [vmem:[%s1778_s2 + $0x130] sm:$0xff]  }
  0x23   :  { %880 = vmatmul.mubr.bf16.vlgmr.msra.gmra.mrb[0].mxu0 %v319_v34  ;;  %v64_v5 = vunpack.c.h.bf16 %v35_v57  ;;  %v63_v8 = vunpack.c.l.bf16 %v35_v57  ;;  %vm237_vm14 = vcmp.ge.f32.partialorder %v205_v36, 0.0 }
  0x24   :  { %1205 = vmatpush3.bf16.msra.mxu0 %v1294_v27  ;;  %929 = vmatmul.mubr.bf16.vlgmr.msra.gmra.mrb[0].mxu1 %v321_v39  ;;  %v130_v10 = vmul.f32 %v1484_v48, %v56_v58  ;;  %v129_v11 = vmul.f32 %v1504_v60, %v55_v63  ;;  %v1313_v27 = vld [vmem:[%s1778_s2 + $0x1e8] sm:$0xff]   ;;  %v1320_v58 = vld [vmem:[%s1778_s2 + $0x178] sm:$0xff]   ;;  %v1319_v63 = vld [vmem:[%s1778_s2 + $0x1b0] sm:$0xff]  }
  0x25   :  { %1206 = vmatprep.subr.bf16.mxu0 %v1296_v35  ;;  %1233 = vmatpush3.bf16.msra.mxu1 %v1295_v33  ;;  %v138_v15 = vmul.f32 %v1484_v48, %v64_v5  ;;  %v137_v18 = vmul.f32 %v1504_v60, %v63_v8  ;;  %v1311_v48 = vld [vmem:[%s1778_s2 + $0x1a0] sm:$0xff]   ;;  %v206_v60 = vadd.f32 %v1496_v56, %v132_v16  ;;  %v1314_v56 = vld [vmem:[%s1778_s2 + $0x128] sm:$0xff]   ;;  %v25_v8 = vld [vmem:[%s1779_s0 + $0x10] sm:$0xff]  ;;  %v53_v16 = vunpack.c.l.bf16 %v30_v28 }
  0x26   :  { %1234 = vmatprep.subr.bf16.mxu1 %v1297_v37  ;;  %v204_v20 = vadd.f32 %v1487_v49, %v130_v10  ;;  %v203_v21 = vadd.f32 %v1507_v61, %v129_v11  ;;  %v1315_v37 = vld [vmem:[%s1778_s2 + $0x1a8] sm:$0xff]   ;;  %v1658_v5 = vrot.slane %v1475_v45, %v95_v54  ;;  %v1682_v10 = vrot.slane %v1475_v45, %v103_v3 }
  0x27   :  { %v212_v55 = vadd.f32 %v1487_v49, %v138_v15  ;;  %v211_v26 = vadd.f32 %v1507_v61, %v137_v18  ;;  %vm238_vm11 = vcmp.ge.f32.partialorder %v206_v60, 0.0  ;;  %v270_v30 = vmul.f32 0.01, %v206_v60  ;;  %v1323_v18 = vld [vmem:[%s1778_s2 + $0x1b8] sm:$0xff]  }
  0x28   :  { %1207 = vmatpush3.bf16.msra.mxu0 %v1298_v40  ;;  %vm236_vm8 = vcmp.ge.f32.partialorder %v204_v20, 0.0  ;;  %v268_v0 = vmul.f32 0.01, %v204_v20  ;;  %vm235_vm9 = vcmp.ge.f32.partialorder %v203_v21, 0.0  ;;  %v267_v29 = vmul.f32 0.01, %v203_v21 }
  0x29   :  { %1208 = vmatprep.subr.bf16.mxu0 %v1300_v42  ;;  %1235 = vmatpush3.bf16.msra.mxu1 %v1299_v41  ;;  %vm244_vm10 = vcmp.ge.f32.partialorder %v212_v55, 0.0  ;;  %v276_v49 = vmul.f32 0.01, %v212_v55  ;;  %vm243_vm13 = vcmp.ge.f32.partialorder %v211_v26, 0.0  ;;  %v275_v34 = vmul.f32 0.01, %v211_v26 }
  0x2a   :  { %1236 = vmatprep.subr.bf16.mxu1 %v1301_v43  ;;  %v300_v61 = vsel %vm236_vm8, %v204_v20, %v268_v0  ;;  %v299_v35 = vsel %vm235_vm9, %v203_v21, %v267_v29  ;;  %v302_v40 = vsel %vm238_vm11, %v206_v60, %v270_v30  ;;  %v310_v41 = vsel %vm246_vm12, %v214_v24, %v278_v31 }
  0x2b   :  { %v308_v33 = vsel %vm244_vm10, %v212_v55, %v276_v49  ;;  %v213_v42 = vadd.f32 %v1515_v1, %v139_v23  ;;  %v330_v43 = vpack.c.bf16 %v310_v41, %v302_v40  ;;  %v1687_v11 = vrot.slane %v1475_v45, %v91_v53  ;;  %v26_v53 = vld [vmem:[%s1779_s0 + $0x18] sm:$0xff]  ;;  %v37_v41 = vld [vmem:[%s1779_s0 + $0x70] sm:$0xff] }
  0x2c   :  { %1209 = vmatpush3.bf16.msra.mxu0 %v1302_v44  ;;  %v328_v39 = vpack.c.bf16 %v308_v33, %v300_v61  ;;  %v307_v44 = vsel %vm243_vm13, %v211_v26, %v275_v34  ;;  %v43_v13 = vunpack.c.l.bf16 %v25_v8  ;;  %v45_v45 = vunpack.c.l.bf16 %v26_v53 }
  0x2d   :  { %1210 = vmatprep.subr.bf16.mxu0 %v1304_v47  ;;  %1237 = vmatpush3.bf16.msra.mxu1 %v1303_v46  ;;  %v269_v46 = vmul.f32 0.01, %v205_v36  ;;  %v1317_v47 = vld [vmem:[%s1778_s2 + $0x1f0] sm:$0xff]   ;;  %vm245_vm15 = vcmp.ge.f32.partialorder %v213_v42, 0.0  ;;  %v46_v2 = vunpack.c.h.bf16 %v26_v53  ;;  %v127_v55 = vmul.f32 %v1663_v6, %v53_v16 }
  0x2e   :  { %1238 = vmatprep.subr.bf16.mxu1 %v1305_v50  ;;  %887 = vmatprep.mubr.bf16.mxu0 %v328_v39  ;;  %v327_v50 = vpack.c.bf16 %v307_v44, %v299_v35  ;;  %v119_v23 = vmul.f32 %v1663_v6, %v45_v45  ;;  %v33_v35 = vld [vmem:[%s1779_s0 + $0x50] sm:$0xff]  ;;  %v67_v28 = vunpack.c.l.bf16 %v37_v41 }
  0x2f   :  { %936 = vmatprep.mubr.bf16.mxu1 %v330_v43  ;;  %v301_v1 = vsel %vm237_vm14, %v205_v36, %v269_v46  ;;  %v38_v43 = vld [vmem:[%s1779_s0 + $0x78] sm:$0xff]  ;;  %v59_v53 = vunpack.c.l.bf16 %v33_v35 }
  0x30   :  { %1211 = vmatpush3.bf16.msra.mxu0 %v1306_v51  ;;  %v277_v51 = vmul.f32 0.01, %v213_v42  ;;  %v193_v49 = vadd.f32 %v1692_v12, %v119_v23 }
  0x31   :  { %1212 = vmatprep.subr.bf16.mxu0 %v1308_v9  ;;  %1239 = vmatpush3.bf16.msra.mxu1 %v1307_v4  ;;  %v1653_v4 = vrot.slane %v1468_v38, %v95_v54  ;;  %v29_v9 = vld [vmem:[%s1779_s0 + $0x30] sm:$0xff]  ;;  %v1677_v54 = vrot.slane %v1468_v38, %v103_v3  ;;  %v1322_v38 = vld [vmem:[%s1778_s2 + $0x138] sm:$0xff]  }
  0x32   :  { %1240 = vmatprep.subr.bf16.mxu1 %v1309_v14  ;;  %888 = vmatmul.mubr.bf16.gmra.mrb[4].mxu0 %v327_v50  ;;  %v309_v57 = vsel %vm245_vm15, %v213_v42, %v277_v51  ;;  %v44_v14 = vunpack.c.h.bf16 %v25_v8  ;;  %v51_v3 = vunpack.c.l.bf16 %v29_v9  ;;  %v52_v15 = vunpack.c.h.bf16 %v29_v9  ;;  %v34_v42 = vld [vmem:[%s1779_s0 + $0x58] sm:$0xff] }
  0x33   :  { %v329_v62 = vpack.c.bf16 %v309_v57, %v301_v1  ;;  %v128_v60 = vmul.f32 %v1677_v54, %v54_v17  ;;  %vm225_vm6 = vcmp.ge.f32.partialorder %v193_v49, 0.0  ;;  %v257_v50 = vmul.f32 0.01, %v193_v49 }
  0x34   :  { %1213 = vmatpush3.bf16.msra.mxu0 %v1310_v19  ;;  %v117_v19 = vmul.f32 %v1645_v59, %v43_v13  ;;  %v118_v20 = vmul.f32 %v1653_v4, %v44_v14  ;;  %v125_v21 = vmul.f32 %v1645_v59, %v51_v3  ;;  %v126_v22 = vmul.f32 %v1653_v4, %v52_v15 }
  0x35   :  { %1214 = vmatprep.subr.bf16.mxu0 %v1312_v25  ;;  %1241 = vmatpush3.bf16.msra.mxu1 %v1311_v48  ;;  %v120_v48 = vmul.f32 %v1677_v54, %v46_v2  ;;  %v202_v29 = vadd.f32 %v1682_v10, %v128_v60  ;;  %v68_v57 = vunpack.c.h.bf16 %v37_v41  ;;  %v61_v45 = vunpack.c.l.bf16 %v34_v42 }
  0x36   :  { %1242 = vmatprep.subr.bf16.mxu1 %v1313_v27  ;;  %937 = vmatmul.mubr.bf16.gmra.mrb[4].mxu1 %v329_v62  ;;  %v192_v24 = vadd.f32 %v1658_v5, %v118_v20  ;;  %v200_v25 = vadd.f32 %v1658_v5, %v126_v22  ;;  %v191_v26 = vadd.f32 %v1687_v11, %v117_v19  ;;  %v70_v62 = vunpack.c.h.bf16 %v38_v43 }
  0x37   :  { %v199_v0 = vadd.f32 %v1687_v11, %v125_v21  ;;  %v194_v27 = vadd.f32 %v1682_v10, %v120_v48  ;;  %vm234_vm3 = vcmp.ge.f32.partialorder %v202_v29, 0.0  ;;  %v142_v13 = vmul.f32 %v1653_v4, %v68_v57 }
  0x38   :  { %1215 = vmatpush3.bf16.msra.mxu0 %v1314_v56  ;;  %v201_v56 = vadd.f32 %v1692_v12, %v127_v55  ;;  %vm224_vm0 = vcmp.ge.f32.partialorder %v192_v24, 0.0  ;;  %vm232_vm1 = vcmp.ge.f32.partialorder %v200_v25, 0.0  ;;  %v256_v61 = vmul.f32 0.01, %v192_v24 }
  0x39   :  { %1216 = vmatprep.subr.bf16.mxu0 %v1316_v32  ;;  %1243 = vmatpush3.bf16.msra.mxu1 %v1315_v37  ;;  %v264_v30 = vmul.f32 0.01, %v200_v25  ;;  %vm226_vm2 = vcmp.ge.f32.partialorder %v194_v27, 0.0  ;;  %v258_v31 = vmul.f32 0.01, %v194_v27  ;;  %vm223_vm4 = vcmp.ge.f32.partialorder %v191_v26, 0.0 }
  0x3a   :  { %1244 = vmatprep.subr.bf16.mxu1 %v1317_v47  ;;  %v266_v32 = vmul.f32 0.01, %v202_v29  ;;  %v288_v33 = vsel %vm224_vm0, %v192_v24, %v256_v61  ;;  %vm231_vm5 = vcmp.ge.f32.partialorder %v199_v0, 0.0  ;;  %v255_v40 = vmul.f32 0.01, %v191_v26 }
  0x3b   :  { %v296_v34 = vsel %vm232_vm1, %v200_v25, %v264_v30  ;;  %v290_v37 = vsel %vm226_vm2, %v194_v27, %v258_v31  ;;  %v263_v46 = vmul.f32 0.01, %v199_v0  ;;  %vm233_vm7 = vcmp.ge.f32.partialorder %v201_v56, 0.0 }
  0x3c   :  { %1217 = vmatpush3.bf16.msra.mxu0 %v1318_v52  ;;  %v324_v36 = vpack.c.bf16 %v296_v34, %v288_v33  ;;  %v298_v39 = vsel %vm234_vm3, %v202_v29, %v266_v32  ;;  %v287_v47 = vsel %vm223_vm4, %v191_v26, %v255_v40  ;;  %v265_v51 = vmul.f32 0.01, %v201_v56 }
  0x3d   :  { %1218 = vmatprep.subr.bf16.mxu0 %v1320_v58  ;;  %1245 = vmatpush3.bf16.msra.mxu1 %v1319_v63  ;;  %v326_v44 = vpack.c.bf16 %v298_v39, %v290_v37  ;;  %v60_v52 = vunpack.c.h.bf16 %v33_v35  ;;  %v295_v1 = vsel %vm231_vm5, %v199_v0, %v263_v46  ;;  %v62_v58 = vunpack.c.h.bf16 %v34_v42 }
  0x3e   :  { %1246 = vmatprep.subr.bf16.mxu1 %v1321_v7  ;;  %977 = vmatprep.mubr.bf16.mxu0 %v324_v36  ;;  %v323_v63 = vpack.c.bf16 %v295_v1, %v287_v47  ;;  %v289_v7 = vsel %vm225_vm6, %v193_v49, %v257_v50  ;;  %v297_v8 = vsel %vm233_vm7, %v201_v56, %v265_v51  ;;  %vm1073_vm0 = vcmask 1040384  }
  0x3f   :  { %1026 = vmatprep.mubr.bf16.mxu1 %v326_v44  ;;  %v134_v9 = vmul.f32 %v1653_v4, %v60_v52  ;;  %v136_v14 = vmul.f32 %v1677_v54, %v62_v58  ;;  %v144_v3 = vmul.f32 %v1677_v54, %v70_v62  ;;  %v216_v2 = vadd.f32 %v1658_v5, %v142_v13 }
  0x40   :  { %1219 = vmatpush3.bf16.msra.mxu0 %v1322_v38  ;;  %v325_v38 = vpack.c.bf16 %v297_v8, %v289_v7  ;;  %v133_v19 = vmul.f32 %v1645_v59, %v59_v53  ;;  %v141_v54 = vmul.f32 %v1645_v59, %v67_v28 }
  0x41   :  { %1247 = vmatpush3.bf16.msra.mxu1 %v1323_v18  ;;  %v208_v15 = vadd.f32 %v1658_v5, %v134_v9  ;;  %v210_v16 = vadd.f32 %v1682_v10, %v136_v14  ;;  %v218_v17 = vadd.f32 %v1682_v10, %v144_v3  ;;  %v69_v18 = vunpack.c.l.bf16 %v38_v43 }
  0x42   :  { %vm248_vm9 = vcmp.ge.f32.partialorder %v216_v2, 0.0  ;;  %v280_v20 = vmul.f32 0.01, %v216_v2  ;;  %v207_v5 = vadd.f32 %v1687_v11, %v133_v19  ;;  %v215_v55 = vadd.f32 %v1687_v11, %v141_v54 }
  0x43   :  { %978 = vmatmul.mubr.bf16.vlgmr.msra.gmra.mrb[8].mxu0 %v323_v63  ;;  %vm240_vm8 = vcmp.ge.f32.partialorder %v208_v15, 0.0  ;;  %v272_v4 = vmul.f32 0.01, %v208_v15  ;;  %vm242_vm10 = vcmp.ge.f32.partialorder %v210_v16, 0.0  ;;  %vm250_vm11 = vcmp.ge.f32.partialorder %v218_v17, 0.0 }
  0x44   :  { %1027 = vmatmul.mubr.bf16.vlgmr.msra.gmra.mrb[8].mxu1 %v325_v38  ;;  %v274_v22 = vmul.f32 0.01, %v210_v16  ;;  %v282_v23 = vmul.f32 0.01, %v218_v17  ;;  %v312_v48 = vsel %vm248_vm9, %v216_v2, %v280_v20  ;;  %v135_v10 = vmul.f32 %v1663_v6, %v61_v45 }
  0x45   :  { %v304_v21 = vsel %vm240_vm8, %v208_v15, %v272_v4  ;;  %v143_v60 = vmul.f32 %v1663_v6, %v69_v18  ;;  %vm239_vm12 = vcmp.ge.f32.partialorder %v207_v5, 0.0  ;;  %vm247_vm13 = vcmp.ge.f32.partialorder %v215_v55, 0.0 }
  0x46   :  { %v332_v24 = vpack.c.bf16 %v312_v48, %v304_v21  ;;  %v306_v25 = vsel %vm242_vm10, %v210_v16, %v274_v22  ;;  %v314_v26 = vsel %vm250_vm11, %v218_v17, %v282_v23  ;;  %v271_v0 = vmul.f32 0.01, %v207_v5  ;;  %v315_v21 = vld [vmem:[%s1782_s1] sm:$0xff]  ;;  %v316_v48 = vld [vmem:[%s1782_s1 + $0x8] sm:$0xff] }
  0x47   :  { %v334_v59 = vpack.c.bf16 %v314_v26, %v306_v25  ;;  %v279_v27 = vmul.f32 0.01, %v215_v55  ;;  %v209_v29 = vadd.f32 %v1692_v12, %v135_v10  ;;  %v217_v49 = vadd.f32 %v1692_v12, %v143_v60 }
  0x48   :  { %985 = vmatprep.mubr.bf16.mxu0 %v332_v24  ;;  %v303_v56 = vsel %vm239_vm12, %v207_v5, %v271_v0 }
  0x49   :  { %1034 = vmatprep.mubr.bf16.mxu1 %v334_v59  ;;  %v311_v11 = vsel %vm247_vm13, %v215_v55, %v279_v27  ;;  %vm241_vm14 = vcmp.ge.f32.partialorder %v209_v29, 0.0  ;;  %vm249_vm15 = vcmp.ge.f32.partialorder %v217_v49, 0.0  ;;  %v273_v6 = vmul.f32 0.01, %v209_v29 }
  0x4a   :  { %v331_v61 = vpack.c.bf16 %v311_v11, %v303_v56  ;;  %v281_v30 = vmul.f32 0.01, %v217_v49 }
  0x4b   :  { %v305_v31 = vsel %vm241_vm14, %v209_v29, %v273_v6 }
  0x4c   :  { %986 = vmatmul.mubr.bf16.gmra.mrb[12].mxu0 %v331_v61  ;;  %v313_v32 = vsel %vm249_vm15, %v217_v49, %v281_v30 }
  0x4d   :  { %v333_v33 = vpack.c.bf16 %v313_v32, %v305_v31 }
  0x4f   :  { %1035 = vmatmul.mubr.bf16.gmra.mrb[12].mxu1 %v333_v33 }
  0xf6   :  { %v1164_v34 = vpop.f32.mrb[0].mxu0 }
  0xf7   :  { %v1165_v35 = vpop.f32.mrb[1].mxu0  ;;  %v1192_v36 = vpop.f32.mrb[0].mxu1 }
  0xf8   :  { %v1166_v37 = vadd.f32 %v1165_v35, %v1164_v34  ;;  %v1167_v39 = vpop.f32.mrb[2].mxu0  ;;  %v1193_v40 = vpop.f32.mrb[1].mxu1  ;;  %v317_v34 = vld [vmem:[%s1782_s1 + $0x10] sm:$0xff] }
  0xf9   :  { %v1168_v12 = vpop.f32.mrb[3].mxu0  ;;  %v1194_v41 = vadd.f32 %v1193_v40, %v1192_v36  ;;  %v1195_v42 = vpop.f32.mrb[2].mxu1 }
  0xfa   :  { %v1169_v43 = vadd.f32 %v1168_v12, %v1167_v39  ;;  %v1196_v44 = vpop.f32.mrb[3].mxu1  ;;  %v318_v39 = vld [vmem:[%s1782_s1 + $0x18] sm:$0xff] }
  0xfb   :  { %v931_v46 = vadd.f32 %v1194_v41, %v1166_v37  ;;  %v1197_v47 = vadd.f32 %v1196_v44, %v1195_v42 }
  0xfd   :  { %v934_v50 = vadd.f32 %v1197_v47, %v1169_v43 }
 0x105   :  { %v1170_v51 = vpop.f32.mrb[4].mxu0 }
 0x106   :  { %v1171_v52 = vpop.f32.mrb[5].mxu0 }
 0x107   :  { %v1172_v1 = vadd.f32 %v1171_v52, %v1170_v51  ;;  %v1173_v57 = vpop.f32.mrb[6].mxu0 }
 0x108   :  { %v1174_v62 = vpop.f32.mrb[7].mxu0 }
 0x109   :  { %v1198_v58 = vpop.f32.mrb[4].mxu1  ;;  %v1175_v7 = vadd.f32 %v1174_v62, %v1173_v57 }
 0x10a   :  { %v1199_v63 = vpop.f32.mrb[5].mxu1 }
 0x10b   :  { %v1200_v8 = vadd.f32 %v1199_v63, %v1198_v58  ;;  %v1201_v9 = vpop.f32.mrb[6].mxu1 }
 0x10c   :  { %v1202_v38 = vpop.f32.mrb[7].mxu1 }
 0x10d   :  { %v939_v13 = vadd.f32 %v1200_v8, %v1172_v1  ;;  %v1203_v14 = vadd.f32 %v1202_v38, %v1201_v9 }
 0x10f   :  { %v942_v3 = vadd.f32 %v1203_v14, %v1175_v7 }
 0x116   :  { %v1220_v15 = vpop.f32.mrb[8].mxu0 }
 0x117   :  { %v1248_v53 = vpop.f32.mrb[8].mxu1  ;;  %v1221_v28 = vpop.f32.mrb[9].mxu0 }
 0x118   :  { %v1222_v45 = vadd.f32 %v1221_v28, %v1220_v15  ;;  %v1249_v2 = vpop.f32.mrb[9].mxu1  ;;  %v1223_v16 = vpop.f32.mrb[10].mxu0 }
 0x119   :  { %v1250_v17 = vadd.f32 %v1249_v2, %v1248_v53  ;;  %v1251_v18 = vpop.f32.mrb[10].mxu1  ;;  %v1224_v4 = vpop.f32.mrb[11].mxu0 }
 0x11a   :  { %v980_v19 = vadd.f32 %v1222_v45, %v931_v46  ;;  %v1225_v54 = vadd.f32 %v1224_v4, %v1223_v16  ;;  %v1252_v20 = vpop.f32.mrb[11].mxu1 }
 0x11b   :  { %v1253_v22 = vadd.f32 %v1252_v20, %v1251_v18 }
 0x11c   :  { %v1029_v23 = vadd.f32 %v1250_v17, %v980_v19  ;;  %v983_v5 = vadd.f32 %v1225_v54, %v934_v50 }
 0x11e   :  { %v1043_v55 = vadd.f32 %v1029_v23, %v315_v21  ;;  %v1032_v10 = vadd.f32 %v1253_v22, %v983_v5 }
 0x11f   :  { %v1226_v59 = vpop.f32.mrb[12].mxu0 }
 0x120   :  { %1047 = vst [vmem:[%s1783_s5] sm:$0xff] %v1043_v55  ;;  %v1044_v60 = vadd.f32 %v1032_v10, %v316_v48  ;;  %v1060_v24 = vmul.f32 %v1043_v55, %v1043_v55  ;;  %v1227_v0 = vpop.f32.mrb[13].mxu0 }
 0x121   :  { %v1228_v29 = vadd.f32 %v1227_v0, %v1226_v59  ;;  %v1229_v49 = vpop.f32.mrb[14].mxu0 }
 0x122   :  { %1048 = vst [vmem:[%s1783_s5 + $0x8] sm:$0xff] %v1044_v60  ;;  %v1051_v25 = vadd.f32 %v1044_v60, %v1043_v55  ;;  %v1061_v26 = vmul.f32 %v1044_v60, %v1044_v60  ;;  %v1230_v56 = vpop.f32.mrb[15].mxu0  ;;  %v1254_v11 = vpop.f32.mrb[12].mxu1 }
 0x123   :  { %v988_v61 = vadd.f32 %v1228_v29, %v939_v13  ;;  %v1231_v6 = vadd.f32 %v1230_v56, %v1229_v49  ;;  %v1255_v30 = vpop.f32.mrb[13].mxu1 }
 0x124   :  { %v1064_v27 = vadd.f32 %v1061_v26, %v1060_v24  ;;  %v1256_v31 = vadd.f32 %v1255_v30, %v1254_v11  ;;  %v1257_v32 = vpop.f32.mrb[14].mxu1 }
 0x125   :  { %v991_v33 = vadd.f32 %v1231_v6, %v942_v3  ;;  %v1258_v35 = vpop.f32.mrb[15].mxu1 }
 0x126   :  { %v1037_v36 = vadd.f32 %v1256_v31, %v988_v61  ;;  %v1259_v37 = vadd.f32 %v1258_v35, %v1257_v32 }
 0x128   :  { %v1045_v40 = vadd.f32 %v1037_v36, %v317_v34  ;;  %v1040_v12 = vadd.f32 %v1259_v37, %v991_v33 }
 0x12a   :  { %1049 = vst [vmem:[%s1783_s5 + $0x10] sm:$0xff] %v1045_v40  ;;  %v1052_v41 = vadd.f32 %v1051_v25, %v1045_v40  ;;  %v1062_v42 = vmul.f32 %v1045_v40, %v1045_v40  ;;  %v1046_v43 = vadd.f32 %v1040_v12, %v318_v39 }
 0x12c   :  { %v1065_v44 = vadd.f32 %v1064_v27, %v1062_v42  ;;  %1050 = vst [vmem:[%s1783_s5 + $0x18] sm:$0xff] %v1046_v43  ;;  %v1053_v46 = vadd.f32 %v1052_v41, %v1046_v43  ;;  %v1063_v47 = vmul.f32 %v1046_v43, %v1046_v43 }
 0x12e   :  { %v1054_v50 = vrot.slane %v1053_v46, 4  ;;  %v1066_v51 = vadd.f32 %v1065_v44, %v1063_v47 }
 0x130   :  { %v1055_v52 = vadd.f32 %v1054_v50, %v1053_v46  ;;  %v1067_v1 = vrot.slane %v1066_v51, 4 }
 0x132   :  { %v1056_v57 = vrot.slane %v1055_v52, 2  ;;  %v1068_v58 = vadd.f32 %v1067_v1, %v1066_v51 }
 0x134   :  { %v1057_v62 = vadd.f32 %v1056_v57, %v1055_v52  ;;  %v1069_v63 = vrot.slane %v1068_v58, 2 }
 0x136   :  { %v1058_v7 = vrot.slane %v1057_v62, 1  ;;  %v1070_v8 = vadd.f32 %v1069_v63, %v1068_v58 }
 0x138   :  { %v1071_v9 = vrot.slane %v1070_v8, 1  ;;  %v1059_v38 = vadd.f32 %v1058_v7, %v1057_v62 }
 0x13a   :  { %v1072_v13 = vadd.f32 %v1071_v9, %v1070_v8 }
 0x13c   :  { %v1074_v14 = vsel %vm1073_vm0, %v1059_v38, %v1072_v13 }
 0x13d   :  { %1075 = vst [vmem:[%s1784_s6] sm:$0x3] %v1074_v14 }

</bundles_post_ra>
